<compile_context>
chip_gen: v6e
topology: v6e:2x2x1
jax: 0.10.0
libtpu: 0.0.40
codegen_flags: <defaults>
</compile_context>

<pallas_src>
import functools

import jax
import jax.numpy as jnp
from jax import lax
from jax.experimental import pallas as pl
from jax.experimental.pallas import tpu as pltpu

EPS = 1e-5


def _vmem_limit_bytes():
    try:
        cap = getattr(pltpu.get_tpu_info(), "vmem_capacity_bytes", None)
    except Exception:
        cap = None
    if not cap:
        cap = 64 * 1024 * 1024            # conservative default (v7x per-TC)
    return int(min(cap * 3 // 4, 100 * 1024 * 1024))


_VMEM_LIMIT = _vmem_limit_bytes()
_TILE_BYTES = int(min(4 * 1024 * 1024, max(1 * 1024 * 1024, _VMEM_LIMIT // 16)))


def _compiler_params(sem):
    return pltpu.CompilerParams(dimension_semantics=sem,
                                vmem_limit_bytes=_VMEM_LIMIT)


def _gelu(x):
    # TODO(synk): PyTorch F.gelu default is the exact erf form; a Mosaic-safe tanh
    # approximation is used (max abs error ~1e-3).
    return 0.5 * x * (1.0 + jnp.tanh(0.7978845608028654 * (x + 0.044715 * x * x * x)))


def _pick_ntile(n, c, target_bytes=_TILE_BYTES):
    """Largest divisor of n (multiple of 128) whose (c, TN) f32 block ~ target."""
    if n % 128 != 0:
        return n
    t = (target_bytes // (4 * max(c, 1))) // 128 * 128
    t = max(128, min(n, t))
    while n % t != 0:
        t -= 128
    return t


def _pick_ctile(c, target=16):
    if c <= target or c % 8 != 0:
        return c
    t = (target // 8) * 8
    while c % t != 0:
        t -= 8
    return max(t, 8)


def _pick_mtile(m, target=512):
    if m % 128 != 0:
        return m
    t = max(128, min(m, (target // 128) * 128))
    while m % t != 0:
        t -= 128
    return t


# ----------------------------------------------------------------------------
# Pallas kernels
# ----------------------------------------------------------------------------
def _stats_kernel(x_ref, sum_ref, sq_ref):
    # Per-(batch, channel) sum / sum-of-squares, accumulated over the
    # "arbitrary" N-tile axis into resident (1, C, 1) output blocks.
    @pl.when(pl.program_id(1) == 0)
    def _init():
        sum_ref[...] = jnp.zeros_like(sum_ref)
        sq_ref[...] = jnp.zeros_like(sq_ref)

    x = x_ref[0].astype(jnp.float32)
    sum_ref[0] += jnp.sum(x, axis=-1, keepdims=True)
    sq_ref[0] += jnp.sum(x * x, axis=-1, keepdims=True)


def _make_pointwise_kernel(pre_affine, pre_gelu):
    # Optional fused GN-apply (y = x*scale+shift) and GELU, then 1x1 conv matmul.
    def kernel(*refs):
        idx = 0
        x_ref = refs[idx]; idx += 1
        if pre_affine:
            sc_ref, sh_ref = refs[idx], refs[idx + 1]; idx += 2
        w_ref, b_ref, out_ref = refs[idx], refs[idx + 1], refs[idx + 2]
        x = x_ref[0].astype(jnp.float32)
        if pre_affine:
            x = x * sc_ref[0] + sh_ref[0]
        if pre_gelu:
            x = _gelu(x)
        y = jnp.dot(w_ref[...], x.astype(jnp.bfloat16),
                    preferred_element_type=jnp.float32) + b_ref[...]
        out_ref[0] = y.astype(out_ref.dtype)
    return kernel


def _mlp_kernel(x_ref, r_ref, sc_ref, sh_ref, w1_ref, b1_ref, w2_ref, b2_ref,
                h_ref, sum_ref, sq_ref):
    # Fused: x1 = gelu(GN1(xs)+xf); h = Conv1d(C->C/2)->GELU->Conv1d(C/2->C);
    # also accumulates sum/sumsq of h (for the following timeCondIN norm).
    @pl.when(pl.program_id(1) == 0)
    def _init():
        sum_ref[...] = jnp.zeros_like(sum_ref)
        sq_ref[...] = jnp.zeros_like(sq_ref)

    x = x_ref[0].astype(jnp.float32)
    r = r_ref[0].astype(jnp.float32)
    x1 = _gelu(x * sc_ref[0] + sh_ref[0] + r)
    m = jnp.dot(w1_ref[...], x1.astype(jnp.bfloat16),
                preferred_element_type=jnp.float32) + b1_ref[...]
    m = _gelu(m)
    h = jnp.dot(w2_ref[...], m.astype(jnp.bfloat16),
                preferred_element_type=jnp.float32) + b2_ref[...]
    hb = h.astype(h_ref.dtype)
    h_ref[0] = hb
    hf = hb.astype(jnp.float32)
    sum_ref[0] += jnp.sum(hf, axis=-1, keepdims=True)
    sq_ref[0] += jnp.sum(hf * hf, axis=-1, keepdims=True)


def _apply_kernel(x_ref, sc_ref, sh_ref, r_ref, out_ref):
    # timeCondIN apply + skip2: out = x*scale + shift + gelu(residual)
    x = x_ref[0].astype(jnp.float32)
    r = _gelu(r_ref[0].astype(jnp.float32))
    out_ref[0] = (x * sc_ref[0] + sh_ref[0] + r).astype(out_ref.dtype)


def _make_spectral_mix_kernel(cin):
    # y[o,m] = sum_i x[i,m] * w[i,o,m] (complex), naive 4-multiply product,
    # static Cin unroll accumulating into two (TCo, TM) f32 accumulators.
    def kernel(xr_ref, xi_ref, wr_ref, wi_ref, yr_ref, yi_ref):
        accr = jnp.zeros(yr_ref.shape[1:], jnp.float32)
        acci = jnp.zeros(yi_ref.shape[1:], jnp.float32)
        for i in range(cin):
            ar = xr_ref[0, i:i + 1, :]          # (1, TM)
            ai = xi_ref[0, i:i + 1, :]
            wr = wr_ref[i]                      # (TCo, TM)
            wi = wi_ref[i]
            accr = accr + (ar * wr - ai * wi)
            acci = acci + (ar * wi + ai * wr)
        yr_ref[0] = accr
        yi_ref[0] = acci
    return kernel


def _make_proj_kernel(out_c):
    # Grouped conv expansion + per-channel GN + GELU + final 1x1 conv in one
    # kernel; the (hidden*out_c, TN) expansion stays in VMEM (never in HBM).
    def kernel(x_ref, sc_ref, sh_ref, w2_ref, b2_ref, out_ref):
        x = x_ref[0].astype(jnp.float32)                     # (hidden, TN)
        acc = jnp.zeros(out_ref.shape[1:], jnp.float32) + b2_ref[...]
        for k in range(out_c):
            z = _gelu(x * sc_ref[0, k] + sh_ref[0, k])       # (hidden, TN)
            acc = acc + jnp.dot(w2_ref[k], z.astype(jnp.bfloat16),
                                preferred_element_type=jnp.float32)
        out_ref[0] = acc
    return kernel


# ----------------------------------------------------------------------------
# Pallas wrappers
# ----------------------------------------------------------------------------
def channel_stats(x):
    B, C, N = x.shape
    TN = _pick_ntile(N, C)
    s, sq = pl.pallas_call(
        _stats_kernel,
        out_shape=(jax.ShapeDtypeStruct((B, C, 1), jnp.float32),
                   jax.ShapeDtypeStruct((B, C, 1), jnp.float32)),
        grid=(B, N // TN),
        in_specs=[pl.BlockSpec((1, C, TN), lambda i, j: (i, 0, j))],
        out_specs=(pl.BlockSpec((1, C, 1), lambda i, j: (i, 0, 0)),
                   pl.BlockSpec((1, C, 1), lambda i, j: (i, 0, 0))),
        compiler_params=_compiler_params(("parallel", "arbitrary")),
    )(x)
    return s[..., 0], sq[..., 0]


def pointwise_conv(x, w_bf16, b_col, scale=None, shift=None, pre_gelu=False,
                   out_dtype=jnp.float32):
    B, Cin, N = x.shape
    Cout = w_bf16.shape[0]
    TN = _pick_ntile(N, max(Cin, Cout))
    pre_affine = scale is not None
    in_specs = [pl.BlockSpec((1, Cin, TN), lambda i, j: (i, 0, j))]
    args = [x]
    if pre_affine:
        in_specs += [pl.BlockSpec((1, Cin, 1), lambda i, j: (i, 0, 0))] * 2
        args += [scale.reshape(B, Cin, 1), shift.reshape(B, Cin, 1)]
    in_specs += [pl.BlockSpec((Cout, Cin), lambda i, j: (0, 0)),
                 pl.BlockSpec((Cout, 1), lambda i, j: (0, 0))]
    args += [w_bf16, b_col]
    return pl.pallas_call(
        _make_pointwise_kernel(pre_affine, pre_gelu),
        out_shape=jax.ShapeDtypeStruct((B, Cout, N), out_dtype),
        grid=(B, N // TN),
        in_specs=in_specs,
        out_specs=pl.BlockSpec((1, Cout, TN), lambda i, j: (i, 0, j)),
        compiler_params=_compiler_params(("parallel", "parallel")),
    )(*args)


def mlp_fused(xs, resid, scale, shift, w1, b1, w2, b2, out_dtype=jnp.bfloat16):
    B, C, N = xs.shape
    Cmid = w1.shape[0]
    TN = _pick_ntile(N, C)
    h, s, sq = pl.pallas_call(
        _mlp_kernel,
        out_shape=(jax.ShapeDtypeStruct((B, C, N), out_dtype),
                   jax.ShapeDtypeStruct((B, C, 1), jnp.float32),
                   jax.ShapeDtypeStruct((B, C, 1), jnp.float32)),
        grid=(B, N // TN),
        in_specs=[
            pl.BlockSpec((1, C, TN), lambda i, j: (i, 0, j)),
            pl.BlockSpec((1, C, TN), lambda i, j: (i, 0, j)),
            pl.BlockSpec((1, C, 1), lambda i, j: (i, 0, 0)),
            pl.BlockSpec((1, C, 1), lambda i, j: (i, 0, 0)),
            pl.BlockSpec((Cmid, C), lambda i, j: (0, 0)),
            pl.BlockSpec((Cmid, 1), lambda i, j: (0, 0)),
            pl.BlockSpec((C, Cmid), lambda i, j: (0, 0)),
            pl.BlockSpec((C, 1), lambda i, j: (0, 0)),
        ],
        out_specs=(pl.BlockSpec((1, C, TN), lambda i, j: (i, 0, j)),
                   pl.BlockSpec((1, C, 1), lambda i, j: (i, 0, 0)),
                   pl.BlockSpec((1, C, 1), lambda i, j: (i, 0, 0))),
        compiler_params=_compiler_params(("parallel", "arbitrary")),
    )(xs, resid, scale.reshape(B, C, 1), shift.reshape(B, C, 1), w1, b1, w2, b2)
    return h, s[..., 0], sq[..., 0]


def affine_plus_gelu_residual(x, scale, shift, resid, out_dtype=jnp.bfloat16):
    B, C, N = x.shape
    TN = _pick_ntile(N, C)
    return pl.pallas_call(
        _apply_kernel,
        out_shape=jax.ShapeDtypeStruct((B, C, N), out_dtype),
        grid=(B, N // TN),
        in_specs=[
            pl.BlockSpec((1, C, TN), lambda i, j: (i, 0, j)),
            pl.BlockSpec((1, C, 1), lambda i, j: (i, 0, 0)),
            pl.BlockSpec((1, C, 1), lambda i, j: (i, 0, 0)),
            pl.BlockSpec((1, C, TN), lambda i, j: (i, 0, j)),
        ],
        out_specs=pl.BlockSpec((1, C, TN), lambda i, j: (i, 0, j)),
        compiler_params=_compiler_params(("parallel", "parallel")),
    )(x, scale.reshape(B, C, 1), shift.reshape(B, C, 1), resid)


def spectral_mix(xr, xi, wr, wi):
    B, Cin, M = xr.shape
    Cout = wr.shape[1]
    TM = _pick_mtile(M)
    TCo = _pick_ctile(Cout)
    grid = (Cout // TCo, M // TM, B)   # B innermost -> weight tile stays resident
    return pl.pallas_call(
        _make_spectral_mix_kernel(Cin),
        out_shape=(jax.ShapeDtypeStruct((B, Cout, M), jnp.float32),
                   jax.ShapeDtypeStruct((B, Cout, M), jnp.float32)),
        grid=grid,
        in_specs=[
            pl.BlockSpec((1, Cin, TM), lambda c, m, b: (b, 0, m)),
            pl.BlockSpec((1, Cin, TM), lambda c, m, b: (b, 0, m)),
            pl.BlockSpec((Cin, TCo, TM), lambda c, m, b: (0, c, m)),
            pl.BlockSpec((Cin, TCo, TM), lambda c, m, b: (0, c, m)),
        ],
        out_specs=(pl.BlockSpec((1, TCo, TM), lambda c, m, b: (b, c, m)),
                   pl.BlockSpec((1, TCo, TM), lambda c, m, b: (b, c, m))),
        compiler_params=_compiler_params(("parallel", "parallel", "parallel")),
    )(xr, xi, wr, wi)


def projection_conv(x, S4, T4, w2r_bf16, b2_col, out_c):
    B, C, N = x.shape
    TN = _pick_ntile(N, 2 * C)   # leave room for the in-VMEM expansion
    return pl.pallas_call(
        _make_proj_kernel(out_c),
        out_shape=jax.ShapeDtypeStruct((B, out_c, N), jnp.float32),
        grid=(B, N // TN),
        in_specs=[
            pl.BlockSpec((1, C, TN), lambda i, j: (i, 0, j)),
            pl.BlockSpec((1, out_c, C, 1), lambda i, j: (i, 0, 0, 0)),
            pl.BlockSpec((1, out_c, C, 1), lambda i, j: (i, 0, 0, 0)),
            pl.BlockSpec((out_c, out_c, C), lambda i, j: (0, 0, 0)),
            pl.BlockSpec((out_c, 1), lambda i, j: (0, 0)),
        ],
        out_specs=pl.BlockSpec((1, out_c, TN), lambda i, j: (i, 0, j)),
        compiler_params=_compiler_params(("parallel", "parallel")),
    )(x, S4, T4, w2r_bf16, b2_col)


# ----------------------------------------------------------------------------
# Model pieces (JAX glue around the kernels)
# ----------------------------------------------------------------------------
def spectral_conv(xf, wr, wi, dims, modes):
    # TODO(synk): neuralop SpectralConv source not provided; Tucker factorization
    # is materialized as a dense complex weight and centered corner-mode
    # selection is used.
    B, C, N = xf.shape
    D, H, W = dims
    m1, m2, m3 = modes
    m3h = m3 // 2 + 1
    hd, hh = m1 // 2, m2 // 2
    Cout = wr.shape[1]
    M = wr.shape[2]
    x3 = xf.astype(jnp.float32).reshape(B, C, D, H, W)
    xfft = jnp.fft.rfftn(x3, axes=(-3, -2, -1))              # (B,C,D,H,W//2+1)
    # corner-mode extraction via contiguous slices (no gather)
    xw = xfft[..., :m3h]
    top = jnp.concatenate([xw[:, :, :hd], xw[:, :, D - hd:]], axis=2)
    sel = jnp.concatenate([top[:, :, :, :hh], top[:, :, :, H - hh:]], axis=3)
    xr = jnp.real(sel).reshape(B, C, M).astype(jnp.float32)
    xi = jnp.imag(sel).reshape(B, C, M).astype(jnp.float32)
    yr, yi = spectral_mix(xr, xi, wr, wi)
    ysel = (yr + 1j * yi).reshape(B, Cout, 2 * hd, 2 * hh, m3h).astype(jnp.complex64)
    # corner write-back via contiguous dynamic_update_slice (no scatter)
    yfft = jnp.zeros((B, Cout, D, H, W // 2 + 1), jnp.complex64)
    yfft = yfft.at[:, :, :hd, :hh, :m3h].set(ysel[:, :, :hd, :hh])
    yfft = yfft.at[:, :, :hd, H - hh:, :m3h].set(ysel[:, :, :hd, hh:])
    yfft = yfft.at[:, :, D - hd:, :hh, :m3h].set(ysel[:, :, hd:, :hh])
    yfft = yfft.at[:, :, D - hd:, H - hh:, :m3h].set(ysel[:, :, hd:, hh:])
    y = jnp.fft.irfftn(yfft, s=(D, H, W), axes=(-3, -2, -1))
    return y.reshape(B, Cout, N).astype(jnp.float32)


def fno_block(xf, tv, bp, dims, modes):
    B, C, N = xf.shape
    # skip1 = xf ; skip2 = gelu(xf) (recomputed in the fused apply kernel)
    xs = spectral_conv(xf, bp['wr'], bp['wi'], dims, modes)
    # GroupNorm(1, C) of xs folded to per-(b,c) scale/shift
    s, sq = channel_stats(xs)
    mean_g = jnp.sum(s, axis=1, keepdims=True) / (C * N)
    var_g = jnp.maximum(jnp.sum(sq, axis=1, keepdims=True) / (C * N)
                        - mean_g * mean_g, 0.0)
    rstd_g = lax.rsqrt(var_g + EPS)
    scale1 = bp['n1_g'][None, :] * rstd_g                    # (B, C)
    shift1 = bp['n1_b'][None, :] - mean_g * scale1
    # fused: x1 = gelu(GN1(xs)+xf); h = MLP(x1); + stats of h
    h, hs, hsq = mlp_fused(xs, xf, scale1, shift1,
                           bp['mlp_w1'], bp['mlp_b1'], bp['mlp_w2'], bp['mlp_b2'])
    # timeCondIN: GroupNorm(1,C,affine=False), then gamma_b*(.)+beta_b
    mean2 = jnp.sum(hs, axis=1, keepdims=True) / (C * N)
    var2 = jnp.maximum(jnp.sum(hsq, axis=1, keepdims=True) / (C * N)
                       - mean2 * mean2, 0.0)
    rstd2 = lax.rsqrt(var2 + EPS)
    gamma_b = tv @ bp['tg_w'].T + bp['tg_b']                 # (B, C)
    beta_b = tv @ bp['tb_w'].T + bp['tb_b']
    scale2 = gamma_b * rstd2
    shift2 = beta_b - mean2 * scale2
    # out = norm2(h) + gelu(skip2-source)
    return affine_plus_gelu_residual(h, scale2, shift2, xf)


def time_embed(t, hidden, scale=0.1):
    # TODO(synk): time_embedding source not provided; deterministic sinusoidal
    # sin/cos embedding of width 2*hidden with base scale 0.1.
    freqs = scale * jnp.exp(jnp.linspace(0.0, jnp.log(1000.0), hidden))
    ang = t.reshape(-1, 1) * freqs[None, :]
    return jnp.concatenate([jnp.sin(ang), jnp.cos(ang)], axis=-1)


def tfno_forward(params, x, t0, t, *, hidden, out_c, modes):
    B, Cin, D, H, W = x.shape
    N = D * H * W
    cl = Cin + 1

    # time path (tiny; plain JAX). spectral_norm applied exactly at init time.
    e0 = time_embed(t0, hidden)
    e1 = time_embed(t, hidden)
    p0, p1 = params['tmlp0'], params['tmlp1']
    t0v = _gelu(e0 @ p0['w1'].T + p0['b1']) @ p0['w2'].T + p0['b2']   # (B, 1)
    tv = _gelu(e1 @ p1['w1'].T + p1['b1']) @ p1['w2'].T + p1['b2']    # (B, hidden)

    t0map = jnp.broadcast_to(t0v.reshape(B, 1, 1, 1, 1), (B, 1, D, H, W))
    xc = jnp.concatenate([x, t0map], axis=1).reshape(B, cl, N)

    # lifting: depthwise 1x1 conv + per-channel GN folded to a single
    # scale/shift (prescale folded analytically out of the stats), fused with
    # GELU into the 1x1-conv kernel.
    lp = params['lift']
    s, sq = channel_stats(xc)
    dw, db = lp['dw'], lp['db']
    su = dw[None] * s + db[None] * N
    squ = (dw * dw)[None] * sq + 2.0 * (dw * db)[None] * s + (db * db)[None] * N
    mean = su / N
    var = jnp.maximum(squ / N - mean * mean, 0.0)
    rstd = lax.rsqrt(var + EPS)
    scale = lp['gn_g'][None] * rstd * dw[None]
    shift = lp['gn_g'][None] * rstd * (db[None] - mean) + lp['gn_b'][None]
    xf = pointwise_conv(xc, lp['w2'], lp['b2'], scale, shift, pre_gelu=True,
                        out_dtype=jnp.bfloat16)              # (B, hidden, N)

    for bp in params['blocks']:
        xf = fno_block(xf, tv, bp, (D, H, W), modes)

    # projection: grouped conv (hidden -> hidden*out_c) + per-channel GN + GELU
    # + final 1x1 conv, all fused; only base-channel stats are needed
    # (per-channel GN of a*x+b -> x*S + T on the base channel; b cancels).
    pp = params['proj']
    s, sq = channel_stats(xf)
    mean = s / N
    var = jnp.maximum(sq / N - mean * mean, 0.0)              # (B, hidden)
    gw = pp['gw']                                             # (hidden, out_c)
    rs = lax.rsqrt((gw * gw)[None] * var[:, :, None] + EPS)   # (B, hidden, out_c)
    S = pp['gn_g'][None] * rs * gw[None]
    T = pp['gn_b'][None] - S * mean[:, :, None]
    S4 = jnp.transpose(S, (0, 2, 1))[..., None]               # (B, out_c, hidden, 1)
    T4 = jnp.transpose(T, (0, 2, 1))[..., None]
    out = projection_conv(xf, S4, T4, pp['w2r'], pp['b2'], out_c)
    return out.reshape(B, out_c, D, H, W)


# ----------------------------------------------------------------------------
# Deterministic parameter init (weights pre-reshaped / pre-cast once)
# ----------------------------------------------------------------------------
def init_params(key, in_c, out_c, hidden, layers, modes):
    keys = jax.random.split(key, 128)
    ki = iter(keys)

    def rnd(shape, scale=0.1):
        return scale * jax.random.normal(next(ki), shape, dtype=jnp.float32)

    def sn(w):  # spectral_norm: divide by the largest singular value (exact)
        return w / jnp.linalg.svd(w, compute_uv=False)[0]

    def bf(w):
        return w.astype(jnp.bfloat16)

    def col(b):
        return b.reshape(-1, 1).astype(jnp.float32)

    m1, m2, m3 = modes
    m3h = m3 // 2 + 1
    M = m1 * m2 * m3h
    cl = in_c + 1
    params = {
        'lift': dict(dw=rnd((cl,)), db=rnd((cl,)),
                     gn_g=jnp.ones((cl,), jnp.float32),
                     gn_b=jnp.zeros((cl,), jnp.float32),
                     w2=bf(rnd((hidden, cl))), b2=col(rnd((hidden,)))),
        'blocks': [],
    }
    wscale = 1.0 / (hidden * hidden)
    for _ in range(layers):
        params['blocks'].append(dict(
            wr=rnd((hidden, hidden, M), scale=wscale),      # pre-reshaped (Cin,Cout,M)
            wi=rnd((hidden, hidden, M), scale=wscale),
            n1_g=jnp.ones((hidden,), jnp.float32),
            n1_b=jnp.zeros((hidden,), jnp.float32),
            mlp_w1=bf(rnd((hidden // 2, hidden))), mlp_b1=col(rnd((hidden // 2,))),
            mlp_w2=bf(rnd((hidden, hidden // 2))), mlp_b2=col(rnd((hidden,))),
            tg_w=rnd((hidden, hidden)), tg_b=rnd((hidden,)),
            tb_w=rnd((hidden, hidden)), tb_b=rnd((hidden,)),
        ))
    w2 = rnd((out_c, hidden * out_c))
    params['proj'] = dict(
        gw=rnd((hidden, out_c)),
        gb=rnd((hidden, out_c)),        # cancels analytically in per-channel GN
        gn_g=jnp.ones((hidden, out_c), jnp.float32),
        gn_b=jnp.zeros((hidden, out_c), jnp.float32),
        # w2 reorganized once: w2r[k, o, g] = w2[o, g*out_c + k]
        w2r=bf(jnp.transpose(w2.reshape(out_c, hidden, out_c), (2, 0, 1))),
        b2=col(rnd((out_c,))))
    params['tmlp0'] = dict(w1=sn(rnd((64, 2 * hidden))), b1=rnd((64,)),
                           w2=sn(rnd((1, 64))), b2=rnd((1,)))
    params['tmlp1'] = dict(w1=sn(rnd((hidden, 2 * hidden))), b1=rnd((hidden,)),
                           w2=sn(rnd((hidden, hidden))), b2=rnd((hidden,)))
    return params


# ----------------------------------------------------------------------------
if __name__ == "__main__":
    B, IN_C, OUT_C, HIDDEN, LAYERS = 2, 2, 2, 8, 2
    MODES = (4, 4, 4)
    D = H = W = 8

    key = jax.random.PRNGKey(0)
    kx, kt0, kt1, kp = jax.random.split(key, 4)
    x = jax.random.normal(kx, (B, IN_C, D, H, W), jnp.float32)
    t0 = jax.random.uniform(kt0, (B,), jnp.float32)
    t = jax.random.uniform(kt1, (B,), jnp.float32)

    params = init_params(kp, IN_C, OUT_C, HIDDEN, LAYERS, MODES)
    fwd = jax.jit(functools.partial(tfno_forward, hidden=HIDDEN, out_c=OUT_C,
                                    modes=MODES))
    out = fwd(params, x, t0, t)
    jax.block_until_ready(out)
    assert out.shape == (B, OUT_C, D, H, W), out.shape
    assert jnp.all(jnp.isfinite(out))
    print("KERNEL_OK")
</pallas_src>

<mosaic_0001>
module attributes {stable_mosaic.version = 11 : i64} {
  func.func @_stats_kernel(%arg0: i32, %arg1: i32, %arg2: memref<1x3x512xf32, #tpu.memory_space<vmem>>, %arg3: memref<1x3x1xf32, #tpu.memory_space<vmem>>, %arg4: memref<1x3x1xf32, #tpu.memory_space<vmem>>) attributes {dimension_semantics = [#tpu.dimension_semantics<parallel>, #tpu.dimension_semantics<arbitrary>], iteration_bounds = array<i64: 2, 1>, scalar_prefetch = 0 : i64, scratch_operands = 0 : i64, tpu.core_type = #tpu.core_type<tc>, window_params = [{transform_indices = @transform_0, window_bounds = array<i64: 1, 3, 512>}, {transform_indices = @transform_1, window_bounds = array<i64: 1, 3, 1>}, {transform_indices = @transform_2, window_bounds = array<i64: 1, 3, 1>}]} {
    %c0_i32 = arith.constant 0 : i32
    %0 = arith.cmpi eq, %arg1, %c0_i32 : i32
    %1 = arith.extui %0 : i1 to i32
    %c0_i32_0 = arith.constant 0 : i32
    %2 = arith.cmpi ne, %1, %c0_i32_0 : i32
    scf.if %2 {
      %cst_16 = arith.constant 0.000000e+00 : f32
      %22 = vector.broadcast %cst_16 : f32 to vector<1x3x1xf32>
      %c0_17 = arith.constant 0 : index
      %c0_18 = arith.constant 0 : index
      %c0_19 = arith.constant 0 : index
      %23 = vector.load %arg3[%c0_17, %c0_18, %c0_19] : memref<1x3x1xf32, #tpu.memory_space<vmem>>, vector<1x3x1xf32>
      tpu.vector_store %arg3[%c0_17, %c0_18, %c0_19], %22 {strides = array<i32>} : memref<1x3x1xf32, #tpu.memory_space<vmem>>, vector<1x3x1xf32>,
      %cst_20 = arith.constant 0.000000e+00 : f32
      %24 = vector.broadcast %cst_20 : f32 to vector<1x3x1xf32>
      %c0_21 = arith.constant 0 : index
      %c0_22 = arith.constant 0 : index
      %c0_23 = arith.constant 0 : index
      %25 = vector.load %arg4[%c0_21, %c0_22, %c0_23] : memref<1x3x1xf32, #tpu.memory_space<vmem>>, vector<1x3x1xf32>
      tpu.vector_store %arg4[%c0_21, %c0_22, %c0_23], %24 {strides = array<i32>} : memref<1x3x1xf32, #tpu.memory_space<vmem>>, vector<1x3x1xf32>,
    } else {
    }
    %c0 = arith.constant 0 : index
    %c0_1 = arith.constant 0 : index
    %c0_2 = arith.constant 0 : index
    %3 = vector.load %arg2[%c0, %c0_1, %c0_2] : memref<1x3x512xf32, #tpu.memory_space<vmem>>, vector<1x3x512xf32>
    %4 = vector.shape_cast %3 : vector<1x3x512xf32> to vector<3x512xf32>
    %c0_3 = arith.constant 0 : index
    %c0_4 = arith.constant 0 : index
    %c0_5 = arith.constant 0 : index
    %5 = vector.load %arg3[%c0_3, %c0_4, %c0_5] : memref<1x3x1xf32, #tpu.memory_space<vmem>>, vector<1x3x1xf32>
    %6 = vector.shape_cast %5 : vector<1x3x1xf32> to vector<3x1xf32>
    %cst = arith.constant dense<0.000000e+00> : vector<3xf32>
    %7 = vector.multi_reduction <add>, %4, %cst [1] : vector<3x512xf32> to vector<3xf32>
    %8 = vector.shape_cast %7 : vector<3xf32> to vector<3x1xf32>
    %9 = arith.addf %6, %8 : vector<3x1xf32>
    %c0_6 = arith.constant 0 : index
    %c0_7 = arith.constant 0 : index
    %c0_8 = arith.constant 0 : index
    %10 = vector.load %arg3[%c0_6, %c0_7, %c0_8] : memref<1x3x1xf32, #tpu.memory_space<vmem>>, vector<1x3x1xf32>
    %11 = vector.shape_cast %10 : vector<1x3x1xf32> to vector<3x1xf32>
    %12 = vector.shape_cast %9 : vector<3x1xf32> to vector<1x3x1xf32>
    tpu.vector_store %arg3[%c0_6, %c0_7, %c0_8], %12 {strides = array<i32>} : memref<1x3x1xf32, #tpu.memory_space<vmem>>, vector<1x3x1xf32>,
    %c0_9 = arith.constant 0 : index
    %c0_10 = arith.constant 0 : index
    %c0_11 = arith.constant 0 : index
    %13 = vector.load %arg4[%c0_9, %c0_10, %c0_11] : memref<1x3x1xf32, #tpu.memory_space<vmem>>, vector<1x3x1xf32>
    %14 = vector.shape_cast %13 : vector<1x3x1xf32> to vector<3x1xf32>
    %15 = arith.mulf %4, %4 : vector<3x512xf32>
    %cst_12 = arith.constant dense<0.000000e+00> : vector<3xf32>
    %16 = vector.multi_reduction <add>, %15, %cst_12 [1] : vector<3x512xf32> to vector<3xf32>
    %17 = vector.shape_cast %16 : vector<3xf32> to vector<3x1xf32>
    %18 = arith.addf %14, %17 : vector<3x1xf32>
    %c0_13 = arith.constant 0 : index
    %c0_14 = arith.constant 0 : index
    %c0_15 = arith.constant 0 : index
    %19 = vector.load %arg4[%c0_13, %c0_14, %c0_15] : memref<1x3x1xf32, #tpu.memory_space<vmem>>, vector<1x3x1xf32>
    %20 = vector.shape_cast %19 : vector<1x3x1xf32> to vector<3x1xf32>
    %21 = vector.shape_cast %18 : vector<3x1xf32> to vector<1x3x1xf32>
    tpu.vector_store %arg4[%c0_13, %c0_14, %c0_15], %21 {strides = array<i32>} : memref<1x3x1xf32, #tpu.memory_space<vmem>>, vector<1x3x1xf32>,
    return
  }
  func.func @transform_0(%arg0: i32, %arg1: i32) -> (i32, i32, i32) {
    %c0_i32 = arith.constant 0 : i32
    %c0_i32_0 = arith.constant 0 : i32
    return %arg0, %c0_i32, %arg1 : i32, i32, i32
  }
  func.func @transform_1(%arg0: i32, %arg1: i32) -> (i32, i32, i32) {
    %c0_i32 = arith.constant 0 : i32
    %c0_i32_0 = arith.constant 0 : i32
    %c0_i32_1 = arith.constant 0 : i32
    return %arg0, %c0_i32, %c0_i32_0 : i32, i32, i32
  }
  func.func @transform_2(%arg0: i32, %arg1: i32) -> (i32, i32, i32) {
    %c0_i32 = arith.constant 0 : i32
    %c0_i32_0 = arith.constant 0 : i32
    %c0_i32_1 = arith.constant 0 : i32
    return %arg0, %c0_i32, %c0_i32_0 : i32, i32, i32
  }
}

module attributes {stable_mosaic.version = 11 : i64} {
  func.func @kernel(%arg0: i32, %arg1: i32, %arg2: memref<1x3x512xf32, #tpu.memory_space<vmem>>, %arg3: memref<1x3x1xf32, #tpu.memory_space<vmem>>, %arg4: memref<1x3x1xf32, #tpu.memory_space<vmem>>, %arg5: memref<8x3xbf16, #tpu.memory_space<vmem>>, %arg6: memref<8x1xf32, #tpu.memory_space<vmem>>, %arg7: memref<1x8x512xbf16, #tpu.memory_space<vmem>>) attributes {dimension_semantics = [#tpu.dimension_semantics<parallel>, #tpu.dimension_semantics<parallel>], iteration_bounds = array<i64: 2, 1>, scalar_prefetch = 0 : i64, scratch_operands = 0 : i64, tpu.core_type = #tpu.core_type<tc>, window_params = [{transform_indices = @transform_0, window_bounds = array<i64: 1, 3, 512>}, {transform_indices = @transform_1, window_bounds = array<i64: 1, 3, 1>}, {transform_indices = @transform_2, window_bounds = array<i64: 1, 3, 1>}, {pipeline_mode = #tpu.pipeline_mode<synchronous>, transform_indices = @transform_3, window_bounds = array<i64: 8, 3>}, {pipeline_mode = #tpu.pipeline_mode<synchronous>, transform_indices = @transform_4, window_bounds = array<i64: 8, 1>}, {transform_indices = @transform_5, window_bounds = array<i64: 1, 8, 512>}]} {
    %c0 = arith.constant 0 : index
    %c0_0 = arith.constant 0 : index
    %c0_1 = arith.constant 0 : index
    %0 = vector.load %arg2[%c0, %c0_0, %c0_1] : memref<1x3x512xf32, #tpu.memory_space<vmem>>, vector<1x3x512xf32>
    %1 = vector.shape_cast %0 : vector<1x3x512xf32> to vector<3x512xf32>
    %c0_2 = arith.constant 0 : index
    %c0_3 = arith.constant 0 : index
    %c0_4 = arith.constant 0 : index
    %2 = vector.load %arg3[%c0_2, %c0_3, %c0_4] : memref<1x3x1xf32, #tpu.memory_space<vmem>>, vector<1x3x1xf32>
    %3 = vector.shape_cast %2 : vector<1x3x1xf32> to vector<3x1xf32>
    %4 = vector.broadcast %3 : vector<3x1xf32> to vector<3x512xf32>
    %5 = arith.mulf %1, %4 : vector<3x512xf32>
    %c0_5 = arith.constant 0 : index
    %c0_6 = arith.constant 0 : index
    %c0_7 = arith.constant 0 : index
    %6 = vector.load %arg4[%c0_5, %c0_6, %c0_7] : memref<1x3x1xf32, #tpu.memory_space<vmem>>, vector<1x3x1xf32>
    %7 = vector.shape_cast %6 : vector<1x3x1xf32> to vector<3x1xf32>
    %8 = vector.broadcast %7 : vector<3x1xf32> to vector<3x512xf32>
    %9 = arith.addf %5, %8 : vector<3x512xf32>
    %cst = arith.constant 5.000000e-01 : f32
    %10 = vector.broadcast %cst : f32 to vector<3x512xf32>
    %11 = arith.mulf %10, %9 : vector<3x512xf32>
    %cst_8 = arith.constant 4.471500e-02 : f32
    %12 = vector.broadcast %cst_8 : f32 to vector<3x512xf32>
    %13 = arith.mulf %12, %9 : vector<3x512xf32>
    %14 = arith.mulf %13, %9 : vector<3x512xf32>
    %15 = arith.mulf %14, %9 : vector<3x512xf32>
    %16 = arith.addf %9, %15 : vector<3x512xf32>
    %cst_9 = arith.constant 0.797884583 : f32
    %17 = vector.broadcast %cst_9 : f32 to vector<3x512xf32>
    %18 = arith.mulf %17, %16 : vector<3x512xf32>
    %19 = math.tanh %18 : vector<3x512xf32>
    %cst_10 = arith.constant 1.000000e+00 : f32
    %20 = vector.broadcast %cst_10 : f32 to vector<3x512xf32>
    %21 = arith.addf %20, %19 : vector<3x512xf32>
    %22 = arith.mulf %11, %21 : vector<3x512xf32>
    %c0_11 = arith.constant 0 : index
    %c0_12 = arith.constant 0 : index
    %23 = vector.load %arg5[%c0_11, %c0_12] : memref<8x3xbf16, #tpu.memory_space<vmem>>, vector<8x3xbf16>
    %24 = arith.truncf %22 : vector<3x512xf32> to vector<3x512xbf16>
    %cst_13 = arith.constant dense<0.000000e+00> : vector<8x512xf32>
    %25 = tpu.matmul %23, %24, %cst_13 {dimension_numbers = #tpu.dot_dimension_numbers<[1], [0], [0], [1], [0, 0, 1, 1], [], []>} : vector<8x3xbf16>, vector<3x512xbf16>, vector<8x512xf32> -> vector<8x512xf32>
    %c0_14 = arith.constant 0 : index
    %c0_15 = arith.constant 0 : index
    %26 = vector.load %arg6[%c0_14, %c0_15] : memref<8x1xf32, #tpu.memory_space<vmem>>, vector<8x1xf32>
    %27 = vector.broadcast %26 : vector<8x1xf32> to vector<8x512xf32>
    %28 = arith.addf %25, %27 : vector<8x512xf32>
    %29 = arith.truncf %28 : vector<8x512xf32> to vector<8x512xbf16>
    %c0_16 = arith.constant 0 : index
    %c0_17 = arith.constant 0 : index
    %c0_18 = arith.constant 0 : index
    %30 = vector.load %arg7[%c0_16, %c0_17, %c0_18] : memref<1x8x512xbf16, #tpu.memory_space<vmem>>, vector<1x8x512xbf16>
    %31 = vector.shape_cast %30 : vector<1x8x512xbf16> to vector<8x512xbf16>
    %32 = vector.shape_cast %29 : vector<8x512xbf16> to vector<1x8x512xbf16>
    tpu.vector_store %arg7[%c0_16, %c0_17, %c0_18], %32 {strides = array<i32>} : memref<1x8x512xbf16, #tpu.memory_space<vmem>>, vector<1x8x512xbf16>,
    return
  }
  func.func @transform_0(%arg0: i32, %arg1: i32) -> (i32, i32, i32) {
    %c0_i32 = arith.constant 0 : i32
    %c0_i32_0 = arith.constant 0 : i32
    return %arg0, %c0_i32, %arg1 : i32, i32, i32
  }
  func.func @transform_1(%arg0: i32, %arg1: i32) -> (i32, i32, i32) {
    %c0_i32 = arith.constant 0 : i32
    %c0_i32_0 = arith.constant 0 : i32
    %c0_i32_1 = arith.constant 0 : i32
    return %arg0, %c0_i32, %c0_i32_0 : i32, i32, i32
  }
  func.func @transform_2(%arg0: i32, %arg1: i32) -> (i32, i32, i32) {
    %c0_i32 = arith.constant 0 : i32
    %c0_i32_0 = arith.constant 0 : i32
    %c0_i32_1 = arith.constant 0 : i32
    return %arg0, %c0_i32, %c0_i32_0 : i32, i32, i32
  }
  func.func @transform_3(%arg0: i32, %arg1: i32) -> (i32, i32) {
    %c0_i32 = arith.constant 0 : i32
    %c0_i32_0 = arith.constant 0 : i32
    %c0_i32_1 = arith.constant 0 : i32
    return %c0_i32, %c0_i32_0 : i32, i32
  }
  func.func @transform_4(%arg0: i32, %arg1: i32) -> (i32, i32) {
    %c0_i32 = arith.constant 0 : i32
    %c0_i32_0 = arith.constant 0 : i32
    %c0_i32_1 = arith.constant 0 : i32
    return %c0_i32, %c0_i32_0 : i32, i32
  }
  func.func @transform_5(%arg0: i32, %arg1: i32) -> (i32, i32, i32) {
    %c0_i32 = arith.constant 0 : i32
    %c0_i32_0 = arith.constant 0 : i32
    return %arg0, %c0_i32, %arg1 : i32, i32, i32
  }
}

module attributes {stable_mosaic.version = 11 : i64} {
  func.func @kernel(%arg0: i32, %arg1: i32, %arg2: i32, %arg3: memref<1x8x48xf32, #tpu.memory_space<vmem>>, %arg4: memref<1x8x48xf32, #tpu.memory_space<vmem>>, %arg5: memref<8x8x48xf32, #tpu.memory_space<vmem>>, %arg6: memref<8x8x48xf32, #tpu.memory_space<vmem>>, %arg7: memref<1x8x48xf32, #tpu.memory_space<vmem>>, %arg8: memref<1x8x48xf32, #tpu.memory_space<vmem>>) attributes {dimension_semantics = [#tpu.dimension_semantics<parallel>, #tpu.dimension_semantics<parallel>, #tpu.dimension_semantics<parallel>], iteration_bounds = array<i64: 1, 1, 2>, scalar_prefetch = 0 : i64, scratch_operands = 0 : i64, tpu.core_type = #tpu.core_type<tc>, window_params = [{transform_indices = @transform_0, window_bounds = array<i64: 1, 8, 48>}, {transform_indices = @transform_1, window_bounds = array<i64: 1, 8, 48>}, {transform_indices = @transform_2, window_bounds = array<i64: 8, 8, 48>}, {transform_indices = @transform_3, window_bounds = array<i64: 8, 8, 48>}, {transform_indices = @transform_4, window_bounds = array<i64: 1, 8, 48>}, {transform_indices = @transform_5, window_bounds = array<i64: 1, 8, 48>}]} {
    %cst = arith.constant 0.000000e+00 : f32
    %0 = vector.broadcast %cst : f32 to vector<8x48xf32>
    %cst_0 = arith.constant 0.000000e+00 : f32
    %1 = vector.broadcast %cst_0 : f32 to vector<8x48xf32>
    %c0 = arith.constant 0 : index
    %c0_1 = arith.constant 0 : index
    %c0_2 = arith.constant 0 : index
    %2 = vector.load %arg3[%c0, %c0_1, %c0_2] : memref<1x8x48xf32, #tpu.memory_space<vmem>>, vector<1x1x48xf32>
    %3 = vector.shape_cast %2 : vector<1x1x48xf32> to vector<1x48xf32>
    %c0_3 = arith.constant 0 : index
    %c0_4 = arith.constant 0 : index
    %c0_5 = arith.constant 0 : index
    %4 = vector.load %arg4[%c0_3, %c0_4, %c0_5] : memref<1x8x48xf32, #tpu.memory_space<vmem>>, vector<1x1x48xf32>
    %5 = vector.shape_cast %4 : vector<1x1x48xf32> to vector<1x48xf32>
    %c0_6 = arith.constant 0 : index
    %c0_7 = arith.constant 0 : index
    %c0_8 = arith.constant 0 : index
    %6 = vector.load %arg5[%c0_6, %c0_7, %c0_8] : memref<8x8x48xf32, #tpu.memory_space<vmem>>, vector<1x8x48xf32>
    %7 = vector.shape_cast %6 : vector<1x8x48xf32> to vector<8x48xf32>
    %c0_9 = arith.constant 0 : index
    %c0_10 = arith.constant 0 : index
    %c0_11 = arith.constant 0 : index
    %8 = vector.load %arg6[%c0_9, %c0_10, %c0_11] : memref<8x8x48xf32, #tpu.memory_space<vmem>>, vector<1x8x48xf32>
    %9 = vector.shape_cast %8 : vector<1x8x48xf32> to vector<8x48xf32>
    %10 = vector.broadcast %3 : vector<1x48xf32> to vector<8x48xf32>
    %11 = arith.mulf %10, %7 : vector<8x48xf32>
    %12 = vector.broadcast %5 : vector<1x48xf32> to vector<8x48xf32>
    %13 = arith.mulf %12, %9 : vector<8x48xf32>
    %14 = arith.subf %11, %13 : vector<8x48xf32>
    %15 = arith.addf %0, %14 : vector<8x48xf32>
    %16 = vector.broadcast %3 : vector<1x48xf32> to vector<8x48xf32>
    %17 = arith.mulf %16, %9 : vector<8x48xf32>
    %18 = vector.broadcast %5 : vector<1x48xf32> to vector<8x48xf32>
    %19 = arith.mulf %18, %7 : vector<8x48xf32>
    %20 = arith.addf %17, %19 : vector<8x48xf32>
    %21 = arith.addf %1, %20 : vector<8x48xf32>
    %c0_12 = arith.constant 0 : index
    %c1 = arith.constant 1 : index
    %c0_13 = arith.constant 0 : index
    %22 = vector.load %arg3[%c0_12, %c1, %c0_13] : memref<1x8x48xf32, #tpu.memory_space<vmem>>, vector<1x1x48xf32>
    %23 = vector.shape_cast %22 : vector<1x1x48xf32> to vector<1x48xf32>
    %c0_14 = arith.constant 0 : index
    %c1_15 = arith.constant 1 : index
    %c0_16 = arith.constant 0 : index
    %24 = vector.load %arg4[%c0_14, %c1_15, %c0_16] : memref<1x8x48xf32, #tpu.memory_space<vmem>>, vector<1x1x48xf32>
    %25 = vector.shape_cast %24 : vector<1x1x48xf32> to vector<1x48xf32>
    %c1_17 = arith.constant 1 : index
    %c0_18 = arith.constant 0 : index
    %c0_19 = arith.constant 0 : index
    %26 = vector.load %arg5[%c1_17, %c0_18, %c0_19] : memref<8x8x48xf32, #tpu.memory_space<vmem>>, vector<1x8x48xf32>
    %27 = vector.shape_cast %26 : vector<1x8x48xf32> to vector<8x48xf32>
    %c1_20 = arith.constant 1 : index
    %c0_21 = arith.constant 0 : index
    %c0_22 = arith.constant 0 : index
    %28 = vector.load %arg6[%c1_20, %c0_21, %c0_22] : memref<8x8x48xf32, #tpu.memory_space<vmem>>, vector<1x8x48xf32>
    %29 = vector.shape_cast %28 : vector<1x8x48xf32> to vector<8x48xf32>
    %30 = vector.broadcast %23 : vector<1x48xf32> to vector<8x48xf32>
    %31 = arith.mulf %30, %27 : vector<8x48xf32>
    %32 = vector.broadcast %25 : vector<1x48xf32> to vector<8x48xf32>
    %33 = arith.mulf %32, %29 : vector<8x48xf32>
    %34 = arith.subf %31, %33 : vector<8x48xf32>
    %35 = arith.addf %15, %34 : vector<8x48xf32>
    %36 = vector.broadcast %23 : vector<1x48xf32> to vector<8x48xf32>
    %37 = arith.mulf %36, %29 : vector<8x48xf32>
    %38 = vector.broadcast %25 : vector<1x48xf32> to vector<8x48xf32>
    %39 = arith.mulf %38, %27 : vector<8x48xf32>
    %40 = arith.addf %37, %39 : vector<8x48xf32>
    %41 = arith.addf %21, %40 : vector<8x48xf32>
    %c0_23 = arith.constant 0 : index
    %c2 = arith.constant 2 : index
    %c0_24 = arith.constant 0 : index
    %42 = vector.load %arg3[%c0_23, %c2, %c0_24] : memref<1x8x48xf32, #tpu.memory_space<vmem>>, vector<1x1x48xf32>
    %43 = vector.shape_cast %42 : vector<1x1x48xf32> to vector<1x48xf32>
    %c0_25 = arith.constant 0 : index
    %c2_26 = arith.constant 2 : index
    %c0_27 = arith.constant 0 : index
    %44 = vector.load %arg4[%c0_25, %c2_26, %c0_27] : memref<1x8x48xf32, #tpu.memory_space<vmem>>, vector<1x1x48xf32>
    %45 = vector.shape_cast %44 : vector<1x1x48xf32> to vector<1x48xf32>
    %c2_28 = arith.constant 2 : index
    %c0_29 = arith.constant 0 : index
    %c0_30 = arith.constant 0 : index
    %46 = vector.load %arg5[%c2_28, %c0_29, %c0_30] : memref<8x8x48xf32, #tpu.memory_space<vmem>>, vector<1x8x48xf32>
    %47 = vector.shape_cast %46 : vector<1x8x48xf32> to vector<8x48xf32>
    %c2_31 = arith.constant 2 : index
    %c0_32 = arith.constant 0 : index
    %c0_33 = arith.constant 0 : index
    %48 = vector.load %arg6[%c2_31, %c0_32, %c0_33] : memref<8x8x48xf32, #tpu.memory_space<vmem>>, vector<1x8x48xf32>
    %49 = vector.shape_cast %48 : vector<1x8x48xf32> to vector<8x48xf32>
    %50 = vector.broadcast %43 : vector<1x48xf32> to vector<8x48xf32>
    %51 = arith.mulf %50, %47 : vector<8x48xf32>
    %52 = vector.broadcast %45 : vector<1x48xf32> to vector<8x48xf32>
    %53 = arith.mulf %52, %49 : vector<8x48xf32>
    %54 = arith.subf %51, %53 : vector<8x48xf32>
    %55 = arith.addf %35, %54 : vector<8x48xf32>
    %56 = vector.broadcast %43 : vector<1x48xf32> to vector<8x48xf32>
    %57 = arith.mulf %56, %49 : vector<8x48xf32>
    %58 = vector.broadcast %45 : vector<1x48xf32> to vector<8x48xf32>
    %59 = arith.mulf %58, %47 : vector<8x48xf32>
    %60 = arith.addf %57, %59 : vector<8x48xf32>
    %61 = arith.addf %41, %60 : vector<8x48xf32>
    %c0_34 = arith.constant 0 : index
    %c3 = arith.constant 3 : index
    %c0_35 = arith.constant 0 : index
    %62 = vector.load %arg3[%c0_34, %c3, %c0_35] : memref<1x8x48xf32, #tpu.memory_space<vmem>>, vector<1x1x48xf32>
    %63 = vector.shape_cast %62 : vector<1x1x48xf32> to vector<1x48xf32>
    %c0_36 = arith.constant 0 : index
    %c3_37 = arith.constant 3 : index
    %c0_38 = arith.constant 0 : index
    %64 = vector.load %arg4[%c0_36, %c3_37, %c0_38] : memref<1x8x48xf32, #tpu.memory_space<vmem>>, vector<1x1x48xf32>
    %65 = vector.shape_cast %64 : vector<1x1x48xf32> to vector<1x48xf32>
    %c3_39 = arith.constant 3 : index
    %c0_40 = arith.constant 0 : index
    %c0_41 = arith.constant 0 : index
    %66 = vector.load %arg5[%c3_39, %c0_40, %c0_41] : memref<8x8x48xf32, #tpu.memory_space<vmem>>, vector<1x8x48xf32>
    %67 = vector.shape_cast %66 : vector<1x8x48xf32> to vector<8x48xf32>
    %c3_42 = arith.constant 3 : index
    %c0_43 = arith.constant 0 : index
    %c0_44 = arith.constant 0 : index
    %68 = vector.load %arg6[%c3_42, %c0_43, %c0_44] : memref<8x8x48xf32, #tpu.memory_space<vmem>>, vector<1x8x48xf32>
    %69 = vector.shape_cast %68 : vector<1x8x48xf32> to vector<8x48xf32>
    %70 = vector.broadcast %63 : vector<1x48xf32> to vector<8x48xf32>
    %71 = arith.mulf %70, %67 : vector<8x48xf32>
    %72 = vector.broadcast %65 : vector<1x48xf32> to vector<8x48xf32>
    %73 = arith.mulf %72, %69 : vector<8x48xf32>
    %74 = arith.subf %71, %73 : vector<8x48xf32>
    %75 = arith.addf %55, %74 : vector<8x48xf32>
    %76 = vector.broadcast %63 : vector<1x48xf32> to vector<8x48xf32>
    %77 = arith.mulf %76, %69 : vector<8x48xf32>
    %78 = vector.broadcast %65 : vector<1x48xf32> to vector<8x48xf32>
    %79 = arith.mulf %78, %67 : vector<8x48xf32>
    %80 = arith.addf %77, %79 : vector<8x48xf32>
    %81 = arith.addf %61, %80 : vector<8x48xf32>
    %c0_45 = arith.constant 0 : index
    %c4 = arith.constant 4 : index
    %c0_46 = arith.constant 0 : index
    %82 = vector.load %arg3[%c0_45, %c4, %c0_46] : memref<1x8x48xf32, #tpu.memory_space<vmem>>, vector<1x1x48xf32>
    %83 = vector.shape_cast %82 : vector<1x1x48xf32> to vector<1x48xf32>
    %c0_47 = arith.constant 0 : index
    %c4_48 = arith.constant 4 : index
    %c0_49 = arith.constant 0 : index
    %84 = vector.load %arg4[%c0_47, %c4_48, %c0_49] : memref<1x8x48xf32, #tpu.memory_space<vmem>>, vector<1x1x48xf32>
    %85 = vector.shape_cast %84 : vector<1x1x48xf32> to vector<1x48xf32>
    %c4_50 = arith.constant 4 : index
    %c0_51 = arith.constant 0 : index
    %c0_52 = arith.constant 0 : index
    %86 = vector.load %arg5[%c4_50, %c0_51, %c0_52] : memref<8x8x48xf32, #tpu.memory_space<vmem>>, vector<1x8x48xf32>
    %87 = vector.shape_cast %86 : vector<1x8x48xf32> to vector<8x48xf32>
    %c4_53 = arith.constant 4 : index
    %c0_54 = arith.constant 0 : index
    %c0_55 = arith.constant 0 : index
    %88 = vector.load %arg6[%c4_53, %c0_54, %c0_55] : memref<8x8x48xf32, #tpu.memory_space<vmem>>, vector<1x8x48xf32>
    %89 = vector.shape_cast %88 : vector<1x8x48xf32> to vector<8x48xf32>
    %90 = vector.broadcast %83 : vector<1x48xf32> to vector<8x48xf32>
    %91 = arith.mulf %90, %87 : vector<8x48xf32>
    %92 = vector.broadcast %85 : vector<1x48xf32> to vector<8x48xf32>
    %93 = arith.mulf %92, %89 : vector<8x48xf32>
    %94 = arith.subf %91, %93 : vector<8x48xf32>
    %95 = arith.addf %75, %94 : vector<8x48xf32>
    %96 = vector.broadcast %83 : vector<1x48xf32> to vector<8x48xf32>
    %97 = arith.mulf %96, %89 : vector<8x48xf32>
    %98 = vector.broadcast %85 : vector<1x48xf32> to vector<8x48xf32>
    %99 = arith.mulf %98, %87 : vector<8x48xf32>
    %100 = arith.addf %97, %99 : vector<8x48xf32>
    %101 = arith.addf %81, %100 : vector<8x48xf32>
    %c0_56 = arith.constant 0 : index
    %c5 = arith.constant 5 : index
    %c0_57 = arith.constant 0 : index
    %102 = vector.load %arg3[%c0_56, %c5, %c0_57] : memref<1x8x48xf32, #tpu.memory_space<vmem>>, vector<1x1x48xf32>
    %103 = vector.shape_cast %102 : vector<1x1x48xf32> to vector<1x48xf32>
    %c0_58 = arith.constant 0 : index
    %c5_59 = arith.constant 5 : index
    %c0_60 = arith.constant 0 : index
    %104 = vector.load %arg4[%c0_58, %c5_59, %c0_60] : memref<1x8x48xf32, #tpu.memory_space<vmem>>, vector<1x1x48xf32>
    %105 = vector.shape_cast %104 : vector<1x1x48xf32> to vector<1x48xf32>
    %c5_61 = arith.constant 5 : index
    %c0_62 = arith.constant 0 : index
    %c0_63 = arith.constant 0 : index
    %106 = vector.load %arg5[%c5_61, %c0_62, %c0_63] : memref<8x8x48xf32, #tpu.memory_space<vmem>>, vector<1x8x48xf32>
    %107 = vector.shape_cast %106 : vector<1x8x48xf32> to vector<8x48xf32>
    %c5_64 = arith.constant 5 : index
    %c0_65 = arith.constant 0 : index
    %c0_66 = arith.constant 0 : index
    %108 = vector.load %arg6[%c5_64, %c0_65, %c0_66] : memref<8x8x48xf32, #tpu.memory_space<vmem>>, vector<1x8x48xf32>
    %109 = vector.shape_cast %108 : vector<1x8x48xf32> to vector<8x48xf32>
    %110 = vector.broadcast %103 : vector<1x48xf32> to vector<8x48xf32>
    %111 = arith.mulf %110, %107 : vector<8x48xf32>
    %112 = vector.broadcast %105 : vector<1x48xf32> to vector<8x48xf32>
    %113 = arith.mulf %112, %109 : vector<8x48xf32>
    %114 = arith.subf %111, %113 : vector<8x48xf32>
    %115 = arith.addf %95, %114 : vector<8x48xf32>
    %116 = vector.broadcast %103 : vector<1x48xf32> to vector<8x48xf32>
    %117 = arith.mulf %116, %109 : vector<8x48xf32>
    %118 = vector.broadcast %105 : vector<1x48xf32> to vector<8x48xf32>
    %119 = arith.mulf %118, %107 : vector<8x48xf32>
    %120 = arith.addf %117, %119 : vector<8x48xf32>
    %121 = arith.addf %101, %120 : vector<8x48xf32>
    %c0_67 = arith.constant 0 : index
    %c6 = arith.constant 6 : index
    %c0_68 = arith.constant 0 : index
    %122 = vector.load %arg3[%c0_67, %c6, %c0_68] : memref<1x8x48xf32, #tpu.memory_space<vmem>>, vector<1x1x48xf32>
    %123 = vector.shape_cast %122 : vector<1x1x48xf32> to vector<1x48xf32>
    %c0_69 = arith.constant 0 : index
    %c6_70 = arith.constant 6 : index
    %c0_71 = arith.constant 0 : index
    %124 = vector.load %arg4[%c0_69, %c6_70, %c0_71] : memref<1x8x48xf32, #tpu.memory_space<vmem>>, vector<1x1x48xf32>
    %125 = vector.shape_cast %124 : vector<1x1x48xf32> to vector<1x48xf32>
    %c6_72 = arith.constant 6 : index
    %c0_73 = arith.constant 0 : index
    %c0_74 = arith.constant 0 : index
    %126 = vector.load %arg5[%c6_72, %c0_73, %c0_74] : memref<8x8x48xf32, #tpu.memory_space<vmem>>, vector<1x8x48xf32>
    %127 = vector.shape_cast %126 : vector<1x8x48xf32> to vector<8x48xf32>
    %c6_75 = arith.constant 6 : index
    %c0_76 = arith.constant 0 : index
    %c0_77 = arith.constant 0 : index
    %128 = vector.load %arg6[%c6_75, %c0_76, %c0_77] : memref<8x8x48xf32, #tpu.memory_space<vmem>>, vector<1x8x48xf32>
    %129 = vector.shape_cast %128 : vector<1x8x48xf32> to vector<8x48xf32>
    %130 = vector.broadcast %123 : vector<1x48xf32> to vector<8x48xf32>
    %131 = arith.mulf %130, %127 : vector<8x48xf32>
    %132 = vector.broadcast %125 : vector<1x48xf32> to vector<8x48xf32>
    %133 = arith.mulf %132, %129 : vector<8x48xf32>
    %134 = arith.subf %131, %133 : vector<8x48xf32>
    %135 = arith.addf %115, %134 : vector<8x48xf32>
    %136 = vector.broadcast %123 : vector<1x48xf32> to vector<8x48xf32>
    %137 = arith.mulf %136, %129 : vector<8x48xf32>
    %138 = vector.broadcast %125 : vector<1x48xf32> to vector<8x48xf32>
    %139 = arith.mulf %138, %127 : vector<8x48xf32>
    %140 = arith.addf %137, %139 : vector<8x48xf32>
    %141 = arith.addf %121, %140 : vector<8x48xf32>
    %c0_78 = arith.constant 0 : index
    %c7 = arith.constant 7 : index
    %c0_79 = arith.constant 0 : index
    %142 = vector.load %arg3[%c0_78, %c7, %c0_79] : memref<1x8x48xf32, #tpu.memory_space<vmem>>, vector<1x1x48xf32>
    %143 = vector.shape_cast %142 : vector<1x1x48xf32> to vector<1x48xf32>
    %c0_80 = arith.constant 0 : index
    %c7_81 = arith.constant 7 : index
    %c0_82 = arith.constant 0 : index
    %144 = vector.load %arg4[%c0_80, %c7_81, %c0_82] : memref<1x8x48xf32, #tpu.memory_space<vmem>>, vector<1x1x48xf32>
    %145 = vector.shape_cast %144 : vector<1x1x48xf32> to vector<1x48xf32>
    %c7_83 = arith.constant 7 : index
    %c0_84 = arith.constant 0 : index
    %c0_85 = arith.constant 0 : index
    %146 = vector.load %arg5[%c7_83, %c0_84, %c0_85] : memref<8x8x48xf32, #tpu.memory_space<vmem>>, vector<1x8x48xf32>
    %147 = vector.shape_cast %146 : vector<1x8x48xf32> to vector<8x48xf32>
    %c7_86 = arith.constant 7 : index
    %c0_87 = arith.constant 0 : index
    %c0_88 = arith.constant 0 : index
    %148 = vector.load %arg6[%c7_86, %c0_87, %c0_88] : memref<8x8x48xf32, #tpu.memory_space<vmem>>, vector<1x8x48xf32>
    %149 = vector.shape_cast %148 : vector<1x8x48xf32> to vector<8x48xf32>
    %150 = vector.broadcast %143 : vector<1x48xf32> to vector<8x48xf32>
    %151 = arith.mulf %150, %147 : vector<8x48xf32>
    %152 = vector.broadcast %145 : vector<1x48xf32> to vector<8x48xf32>
    %153 = arith.mulf %152, %149 : vector<8x48xf32>
    %154 = arith.subf %151, %153 : vector<8x48xf32>
    %155 = arith.addf %135, %154 : vector<8x48xf32>
    %156 = vector.broadcast %143 : vector<1x48xf32> to vector<8x48xf32>
    %157 = arith.mulf %156, %149 : vector<8x48xf32>
    %158 = vector.broadcast %145 : vector<1x48xf32> to vector<8x48xf32>
    %159 = arith.mulf %158, %147 : vector<8x48xf32>
    %160 = arith.addf %157, %159 : vector<8x48xf32>
    %161 = arith.addf %141, %160 : vector<8x48xf32>
    %c0_89 = arith.constant 0 : index
    %c0_90 = arith.constant 0 : index
    %c0_91 = arith.constant 0 : index
    %162 = vector.load %arg7[%c0_89, %c0_90, %c0_91] : memref<1x8x48xf32, #tpu.memory_space<vmem>>, vector<1x8x48xf32>
    %163 = vector.shape_cast %162 : vector<1x8x48xf32> to vector<8x48xf32>
    %164 = vector.shape_cast %155 : vector<8x48xf32> to vector<1x8x48xf32>
    tpu.vector_store %arg7[%c0_89, %c0_90, %c0_91], %164 {strides = array<i32>} : memref<1x8x48xf32, #tpu.memory_space<vmem>>, vector<1x8x48xf32>,
    %c0_92 = arith.constant 0 : index
    %c0_93 = arith.constant 0 : index
    %c0_94 = arith.constant 0 : index
    %165 = vector.load %arg8[%c0_92, %c0_93, %c0_94] : memref<1x8x48xf32, #tpu.memory_space<vmem>>, vector<1x8x48xf32>
    %166 = vector.shape_cast %165 : vector<1x8x48xf32> to vector<8x48xf32>
    %167 = vector.shape_cast %161 : vector<8x48xf32> to vector<1x8x48xf32>
    tpu.vector_store %arg8[%c0_92, %c0_93, %c0_94], %167 {strides = array<i32>} : memref<1x8x48xf32, #tpu.memory_space<vmem>>, vector<1x8x48xf32>,
    return
  }
  func.func @transform_0(%arg0: i32, %arg1: i32, %arg2: i32) -> (i32, i32, i32) {
    %c0_i32 = arith.constant 0 : i32
    %c0_i32_0 = arith.constant 0 : i32
    return %arg2, %c0_i32, %arg1 : i32, i32, i32
  }
  func.func @transform_1(%arg0: i32, %arg1: i32, %arg2: i32) -> (i32, i32, i32) {
    %c0_i32 = arith.constant 0 : i32
    %c0_i32_0 = arith.constant 0 : i32
    return %arg2, %c0_i32, %arg1 : i32, i32, i32
  }
  func.func @transform_2(%arg0: i32, %arg1: i32, %arg2: i32) -> (i32, i32, i32) {
    %c0_i32 = arith.constant 0 : i32
    %c0_i32_0 = arith.constant 0 : i32
    return %c0_i32, %arg0, %arg1 : i32, i32, i32
  }
  func.func @transform_3(%arg0: i32, %arg1: i32, %arg2: i32) -> (i32, i32, i32) {
    %c0_i32 = arith.constant 0 : i32
    %c0_i32_0 = arith.constant 0 : i32
    return %c0_i32, %arg0, %arg1 : i32, i32, i32
  }
  func.func @transform_4(%arg0: i32, %arg1: i32, %arg2: i32) -> (i32, i32, i32) {
    %c0_i32 = arith.constant 0 : i32
    return %arg2, %arg0, %arg1 : i32, i32, i32
  }
  func.func @transform_5(%arg0: i32, %arg1: i32, %arg2: i32) -> (i32, i32, i32) {
    %c0_i32 = arith.constant 0 : i32
    return %arg2, %arg0, %arg1 : i32, i32, i32
  }
}

module attributes {stable_mosaic.version = 11 : i64} {
  func.func @_stats_kernel(%arg0: i32, %arg1: i32, %arg2: memref<1x8x512xf32, #tpu.memory_space<vmem>>, %arg3: memref<1x8x1xf32, #tpu.memory_space<vmem>>, %arg4: memref<1x8x1xf32, #tpu.memory_space<vmem>>) attributes {dimension_semantics = [#tpu.dimension_semantics<parallel>, #tpu.dimension_semantics<arbitrary>], iteration_bounds = array<i64: 2, 1>, scalar_prefetch = 0 : i64, scratch_operands = 0 : i64, tpu.core_type = #tpu.core_type<tc>, window_params = [{transform_indices = @transform_0, window_bounds = array<i64: 1, 8, 512>}, {transform_indices = @transform_1, window_bounds = array<i64: 1, 8, 1>}, {transform_indices = @transform_2, window_bounds = array<i64: 1, 8, 1>}]} {
    %c0_i32 = arith.constant 0 : i32
    %0 = arith.cmpi eq, %arg1, %c0_i32 : i32
    %1 = arith.extui %0 : i1 to i32
    %c0_i32_0 = arith.constant 0 : i32
    %2 = arith.cmpi ne, %1, %c0_i32_0 : i32
    scf.if %2 {
      %cst_16 = arith.constant 0.000000e+00 : f32
      %22 = vector.broadcast %cst_16 : f32 to vector<1x8x1xf32>
      %c0_17 = arith.constant 0 : index
      %c0_18 = arith.constant 0 : index
      %c0_19 = arith.constant 0 : index
      %23 = vector.load %arg3[%c0_17, %c0_18, %c0_19] : memref<1x8x1xf32, #tpu.memory_space<vmem>>, vector<1x8x1xf32>
      tpu.vector_store %arg3[%c0_17, %c0_18, %c0_19], %22 {strides = array<i32>} : memref<1x8x1xf32, #tpu.memory_space<vmem>>, vector<1x8x1xf32>,
      %cst_20 = arith.constant 0.000000e+00 : f32
      %24 = vector.broadcast %cst_20 : f32 to vector<1x8x1xf32>
      %c0_21 = arith.constant 0 : index
      %c0_22 = arith.constant 0 : index
      %c0_23 = arith.constant 0 : index
      %25 = vector.load %arg4[%c0_21, %c0_22, %c0_23] : memref<1x8x1xf32, #tpu.memory_space<vmem>>, vector<1x8x1xf32>
      tpu.vector_store %arg4[%c0_21, %c0_22, %c0_23], %24 {strides = array<i32>} : memref<1x8x1xf32, #tpu.memory_space<vmem>>, vector<1x8x1xf32>,
    } else {
    }
    %c0 = arith.constant 0 : index
    %c0_1 = arith.constant 0 : index
    %c0_2 = arith.constant 0 : index
    %3 = vector.load %arg2[%c0, %c0_1, %c0_2] : memref<1x8x512xf32, #tpu.memory_space<vmem>>, vector<1x8x512xf32>
    %4 = vector.shape_cast %3 : vector<1x8x512xf32> to vector<8x512xf32>
    %c0_3 = arith.constant 0 : index
    %c0_4 = arith.constant 0 : index
    %c0_5 = arith.constant 0 : index
    %5 = vector.load %arg3[%c0_3, %c0_4, %c0_5] : memref<1x8x1xf32, #tpu.memory_space<vmem>>, vector<1x8x1xf32>
    %6 = vector.shape_cast %5 : vector<1x8x1xf32> to vector<8x1xf32>
    %cst = arith.constant dense<0.000000e+00> : vector<8xf32>
    %7 = vector.multi_reduction <add>, %4, %cst [1] : vector<8x512xf32> to vector<8xf32>
    %8 = vector.shape_cast %7 : vector<8xf32> to vector<8x1xf32>
    %9 = arith.addf %6, %8 : vector<8x1xf32>
    %c0_6 = arith.constant 0 : index
    %c0_7 = arith.constant 0 : index
    %c0_8 = arith.constant 0 : index
    %10 = vector.load %arg3[%c0_6, %c0_7, %c0_8] : memref<1x8x1xf32, #tpu.memory_space<vmem>>, vector<1x8x1xf32>
    %11 = vector.shape_cast %10 : vector<1x8x1xf32> to vector<8x1xf32>
    %12 = vector.shape_cast %9 : vector<8x1xf32> to vector<1x8x1xf32>
    tpu.vector_store %arg3[%c0_6, %c0_7, %c0_8], %12 {strides = array<i32>} : memref<1x8x1xf32, #tpu.memory_space<vmem>>, vector<1x8x1xf32>,
    %c0_9 = arith.constant 0 : index
    %c0_10 = arith.constant 0 : index
    %c0_11 = arith.constant 0 : index
    %13 = vector.load %arg4[%c0_9, %c0_10, %c0_11] : memref<1x8x1xf32, #tpu.memory_space<vmem>>, vector<1x8x1xf32>
    %14 = vector.shape_cast %13 : vector<1x8x1xf32> to vector<8x1xf32>
    %15 = arith.mulf %4, %4 : vector<8x512xf32>
    %cst_12 = arith.constant dense<0.000000e+00> : vector<8xf32>
    %16 = vector.multi_reduction <add>, %15, %cst_12 [1] : vector<8x512xf32> to vector<8xf32>
    %17 = vector.shape_cast %16 : vector<8xf32> to vector<8x1xf32>
    %18 = arith.addf %14, %17 : vector<8x1xf32>
    %c0_13 = arith.constant 0 : index
    %c0_14 = arith.constant 0 : index
    %c0_15 = arith.constant 0 : index
    %19 = vector.load %arg4[%c0_13, %c0_14, %c0_15] : memref<1x8x1xf32, #tpu.memory_space<vmem>>, vector<1x8x1xf32>
    %20 = vector.shape_cast %19 : vector<1x8x1xf32> to vector<8x1xf32>
    %21 = vector.shape_cast %18 : vector<8x1xf32> to vector<1x8x1xf32>
    tpu.vector_store %arg4[%c0_13, %c0_14, %c0_15], %21 {strides = array<i32>} : memref<1x8x1xf32, #tpu.memory_space<vmem>>, vector<1x8x1xf32>,
    return
  }
  func.func @transform_0(%arg0: i32, %arg1: i32) -> (i32, i32, i32) {
    %c0_i32 = arith.constant 0 : i32
    %c0_i32_0 = arith.constant 0 : i32
    return %arg0, %c0_i32, %arg1 : i32, i32, i32
  }
  func.func @transform_1(%arg0: i32, %arg1: i32) -> (i32, i32, i32) {
    %c0_i32 = arith.constant 0 : i32
    %c0_i32_0 = arith.constant 0 : i32
    %c0_i32_1 = arith.constant 0 : i32
    return %arg0, %c0_i32, %c0_i32_0 : i32, i32, i32
  }
  func.func @transform_2(%arg0: i32, %arg1: i32) -> (i32, i32, i32) {
    %c0_i32 = arith.constant 0 : i32
    %c0_i32_0 = arith.constant 0 : i32
    %c0_i32_1 = arith.constant 0 : i32
    return %arg0, %c0_i32, %c0_i32_0 : i32, i32, i32
  }
}

module attributes {stable_mosaic.version = 11 : i64} {
  func.func @_mlp_kernel(%arg0: i32, %arg1: i32, %arg2: memref<1x8x512xf32, #tpu.memory_space<vmem>>, %arg3: memref<1x8x512xbf16, #tpu.memory_space<vmem>>, %arg4: memref<1x8x1xf32, #tpu.memory_space<vmem>>, %arg5: memref<1x8x1xf32, #tpu.memory_space<vmem>>, %arg6: memref<4x8xbf16, #tpu.memory_space<vmem>>, %arg7: memref<4x1xf32, #tpu.memory_space<vmem>>, %arg8: memref<8x4xbf16, #tpu.memory_space<vmem>>, %arg9: memref<8x1xf32, #tpu.memory_space<vmem>>, %arg10: memref<1x8x512xbf16, #tpu.memory_space<vmem>>, %arg11: memref<1x8x1xf32, #tpu.memory_space<vmem>>, %arg12: memref<1x8x1xf32, #tpu.memory_space<vmem>>) attributes {dimension_semantics = [#tpu.dimension_semantics<parallel>, #tpu.dimension_semantics<arbitrary>], iteration_bounds = array<i64: 2, 1>, scalar_prefetch = 0 : i64, scratch_operands = 0 : i64, tpu.core_type = #tpu.core_type<tc>, window_params = [{transform_indices = @transform_0, window_bounds = array<i64: 1, 8, 512>}, {transform_indices = @transform_1, window_bounds = array<i64: 1, 8, 512>}, {transform_indices = @transform_2, window_bounds = array<i64: 1, 8, 1>}, {transform_indices = @transform_3, window_bounds = array<i64: 1, 8, 1>}, {pipeline_mode = #tpu.pipeline_mode<synchronous>, transform_indices = @transform_4, window_bounds = array<i64: 4, 8>}, {pipeline_mode = #tpu.pipeline_mode<synchronous>, transform_indices = @transform_5, window_bounds = array<i64: 4, 1>}, {pipeline_mode = #tpu.pipeline_mode<synchronous>, transform_indices = @transform_6, window_bounds = array<i64: 8, 4>}, {pipeline_mode = #tpu.pipeline_mode<synchronous>, transform_indices = @transform_7, window_bounds = array<i64: 8, 1>}, {transform_indices = @transform_8, window_bounds = array<i64: 1, 8, 512>}, {transform_indices = @transform_9, window_bounds = array<i64: 1, 8, 1>}, {transform_indices = @transform_10, window_bounds = array<i64: 1, 8, 1>}]} {
    %c0_i32 = arith.constant 0 : i32
    %0 = arith.cmpi eq, %arg1, %c0_i32 : i32
    %1 = arith.extui %0 : i1 to i32
    %c0_i32_0 = arith.constant 0 : i32
    %2 = arith.cmpi ne, %1, %c0_i32_0 : i32
    scf.if %2 {
      %cst_46 = arith.constant 0.000000e+00 : f32
      %77 = vector.broadcast %cst_46 : f32 to vector<1x8x1xf32>
      %c0_47 = arith.constant 0 : index
      %c0_48 = arith.constant 0 : index
      %c0_49 = arith.constant 0 : index
      %78 = vector.load %arg11[%c0_47, %c0_48, %c0_49] : memref<1x8x1xf32, #tpu.memory_space<vmem>>, vector<1x8x1xf32>
      tpu.vector_store %arg11[%c0_47, %c0_48, %c0_49], %77 {strides = array<i32>} : memref<1x8x1xf32, #tpu.memory_space<vmem>>, vector<1x8x1xf32>,
      %cst_50 = arith.constant 0.000000e+00 : f32
      %79 = vector.broadcast %cst_50 : f32 to vector<1x8x1xf32>
      %c0_51 = arith.constant 0 : index
      %c0_52 = arith.constant 0 : index
      %c0_53 = arith.constant 0 : index
      %80 = vector.load %arg12[%c0_51, %c0_52, %c0_53] : memref<1x8x1xf32, #tpu.memory_space<vmem>>, vector<1x8x1xf32>
      tpu.vector_store %arg12[%c0_51, %c0_52, %c0_53], %79 {strides = array<i32>} : memref<1x8x1xf32, #tpu.memory_space<vmem>>, vector<1x8x1xf32>,
    } else {
    }
    %c0 = arith.constant 0 : index
    %c0_1 = arith.constant 0 : index
    %c0_2 = arith.constant 0 : index
    %3 = vector.load %arg2[%c0, %c0_1, %c0_2] : memref<1x8x512xf32, #tpu.memory_space<vmem>>, vector<1x8x512xf32>
    %4 = vector.shape_cast %3 : vector<1x8x512xf32> to vector<8x512xf32>
    %c0_3 = arith.constant 0 : index
    %c0_4 = arith.constant 0 : index
    %c0_5 = arith.constant 0 : index
    %5 = vector.load %arg3[%c0_3, %c0_4, %c0_5] : memref<1x8x512xbf16, #tpu.memory_space<vmem>>, vector<1x8x512xbf16>
    %6 = vector.shape_cast %5 : vector<1x8x512xbf16> to vector<8x512xbf16>
    %7 = arith.extf %6 : vector<8x512xbf16> to vector<8x512xf32>
    %c0_6 = arith.constant 0 : index
    %c0_7 = arith.constant 0 : index
    %c0_8 = arith.constant 0 : index
    %8 = vector.load %arg4[%c0_6, %c0_7, %c0_8] : memref<1x8x1xf32, #tpu.memory_space<vmem>>, vector<1x8x1xf32>
    %9 = vector.shape_cast %8 : vector<1x8x1xf32> to vector<8x1xf32>
    %10 = vector.broadcast %9 : vector<8x1xf32> to vector<8x512xf32>
    %11 = arith.mulf %4, %10 : vector<8x512xf32>
    %c0_9 = arith.constant 0 : index
    %c0_10 = arith.constant 0 : index
    %c0_11 = arith.constant 0 : index
    %12 = vector.load %arg5[%c0_9, %c0_10, %c0_11] : memref<1x8x1xf32, #tpu.memory_space<vmem>>, vector<1x8x1xf32>
    %13 = vector.shape_cast %12 : vector<1x8x1xf32> to vector<8x1xf32>
    %14 = vector.broadcast %13 : vector<8x1xf32> to vector<8x512xf32>
    %15 = arith.addf %11, %14 : vector<8x512xf32>
    %16 = arith.addf %15, %7 : vector<8x512xf32>
    %cst = arith.constant 5.000000e-01 : f32
    %17 = vector.broadcast %cst : f32 to vector<8x512xf32>
    %18 = arith.mulf %17, %16 : vector<8x512xf32>
    %cst_12 = arith.constant 4.471500e-02 : f32
    %19 = vector.broadcast %cst_12 : f32 to vector<8x512xf32>
    %20 = arith.mulf %19, %16 : vector<8x512xf32>
    %21 = arith.mulf %20, %16 : vector<8x512xf32>
    %22 = arith.mulf %21, %16 : vector<8x512xf32>
    %23 = arith.addf %16, %22 : vector<8x512xf32>
    %cst_13 = arith.constant 0.797884583 : f32
    %24 = vector.broadcast %cst_13 : f32 to vector<8x512xf32>
    %25 = arith.mulf %24, %23 : vector<8x512xf32>
    %26 = math.tanh %25 : vector<8x512xf32>
    %cst_14 = arith.constant 1.000000e+00 : f32
    %27 = vector.broadcast %cst_14 : f32 to vector<8x512xf32>
    %28 = arith.addf %27, %26 : vector<8x512xf32>
    %29 = arith.mulf %18, %28 : vector<8x512xf32>
    %c0_15 = arith.constant 0 : index
    %c0_16 = arith.constant 0 : index
    %30 = vector.load %arg6[%c0_15, %c0_16] : memref<4x8xbf16, #tpu.memory_space<vmem>>, vector<4x8xbf16>
    %31 = arith.truncf %29 : vector<8x512xf32> to vector<8x512xbf16>
    %cst_17 = arith.constant dense<0.000000e+00> : vector<4x512xf32>
    %32 = tpu.matmul %30, %31, %cst_17 {dimension_numbers = #tpu.dot_dimension_numbers<[1], [0], [0], [1], [0, 0, 1, 1], [], []>} : vector<4x8xbf16>, vector<8x512xbf16>, vector<4x512xf32> -> vector<4x512xf32>
    %c0_18 = arith.constant 0 : index
    %c0_19 = arith.constant 0 : index
    %33 = vector.load %arg7[%c0_18, %c0_19] : memref<4x1xf32, #tpu.memory_space<vmem>>, vector<4x1xf32>
    %34 = vector.broadcast %33 : vector<4x1xf32> to vector<4x512xf32>
    %35 = arith.addf %32, %34 : vector<4x512xf32>
    %cst_20 = arith.constant 5.000000e-01 : f32
    %36 = vector.broadcast %cst_20 : f32 to vector<4x512xf32>
    %37 = arith.mulf %36, %35 : vector<4x512xf32>
    %cst_21 = arith.constant 4.471500e-02 : f32
    %38 = vector.broadcast %cst_21 : f32 to vector<4x512xf32>
    %39 = arith.mulf %38, %35 : vector<4x512xf32>
    %40 = arith.mulf %39, %35 : vector<4x512xf32>
    %41 = arith.mulf %40, %35 : vector<4x512xf32>
    %42 = arith.addf %35, %41 : vector<4x512xf32>
    %cst_22 = arith.constant 0.797884583 : f32
    %43 = vector.broadcast %cst_22 : f32 to vector<4x512xf32>
    %44 = arith.mulf %43, %42 : vector<4x512xf32>
    %45 = math.tanh %44 : vector<4x512xf32>
    %cst_23 = arith.constant 1.000000e+00 : f32
    %46 = vector.broadcast %cst_23 : f32 to vector<4x512xf32>
    %47 = arith.addf %46, %45 : vector<4x512xf32>
    %48 = arith.mulf %37, %47 : vector<4x512xf32>
    %c0_24 = arith.constant 0 : index
    %c0_25 = arith.constant 0 : index
    %49 = vector.load %arg8[%c0_24, %c0_25] : memref<8x4xbf16, #tpu.memory_space<vmem>>, vector<8x4xbf16>
    %50 = arith.truncf %48 : vector<4x512xf32> to vector<4x512xbf16>
    %cst_26 = arith.constant dense<0.000000e+00> : vector<8x512xf32>
    %51 = tpu.matmul %49, %50, %cst_26 {dimension_numbers = #tpu.dot_dimension_numbers<[1], [0], [0], [1], [0, 0, 1, 1], [], []>} : vector<8x4xbf16>, vector<4x512xbf16>, vector<8x512xf32> -> vector<8x512xf32>
    %c0_27 = arith.constant 0 : index
    %c0_28 = arith.constant 0 : index
    %52 = vector.load %arg9[%c0_27, %c0_28] : memref<8x1xf32, #tpu.memory_space<vmem>>, vector<8x1xf32>
    %53 = vector.broadcast %52 : vector<8x1xf32> to vector<8x512xf32>
    %54 = arith.addf %51, %53 : vector<8x512xf32>
    %55 = arith.truncf %54 : vector<8x512xf32> to vector<8x512xbf16>
    %c0_29 = arith.constant 0 : index
    %c0_30 = arith.constant 0 : index
    %c0_31 = arith.constant 0 : index
    %56 = vector.load %arg10[%c0_29, %c0_30, %c0_31] : memref<1x8x512xbf16, #tpu.memory_space<vmem>>, vector<1x8x512xbf16>
    %57 = vector.shape_cast %56 : vector<1x8x512xbf16> to vector<8x512xbf16>
    %58 = vector.shape_cast %55 : vector<8x512xbf16> to vector<1x8x512xbf16>
    tpu.vector_store %arg10[%c0_29, %c0_30, %c0_31], %58 {strides = array<i32>} : memref<1x8x512xbf16, #tpu.memory_space<vmem>>, vector<1x8x512xbf16>,
    %59 = arith.extf %55 : vector<8x512xbf16> to vector<8x512xf32>
    %c0_32 = arith.constant 0 : index
    %c0_33 = arith.constant 0 : index
    %c0_34 = arith.constant 0 : index
    %60 = vector.load %arg11[%c0_32, %c0_33, %c0_34] : memref<1x8x1xf32, #tpu.memory_space<vmem>>, vector<1x8x1xf32>
    %61 = vector.shape_cast %60 : vector<1x8x1xf32> to vector<8x1xf32>
    %cst_35 = arith.constant dense<0.000000e+00> : vector<8xf32>
    %62 = vector.multi_reduction <add>, %59, %cst_35 [1] : vector<8x512xf32> to vector<8xf32>
    %63 = vector.shape_cast %62 : vector<8xf32> to vector<8x1xf32>
    %64 = arith.addf %61, %63 : vector<8x1xf32>
    %c0_36 = arith.constant 0 : index
    %c0_37 = arith.constant 0 : index
    %c0_38 = arith.constant 0 : index
    %65 = vector.load %arg11[%c0_36, %c0_37, %c0_38] : memref<1x8x1xf32, #tpu.memory_space<vmem>>, vector<1x8x1xf32>
    %66 = vector.shape_cast %65 : vector<1x8x1xf32> to vector<8x1xf32>
    %67 = vector.shape_cast %64 : vector<8x1xf32> to vector<1x8x1xf32>
    tpu.vector_store %arg11[%c0_36, %c0_37, %c0_38], %67 {strides = array<i32>} : memref<1x8x1xf32, #tpu.memory_space<vmem>>, vector<1x8x1xf32>,
    %c0_39 = arith.constant 0 : index
    %c0_40 = arith.constant 0 : index
    %c0_41 = arith.constant 0 : index
    %68 = vector.load %arg12[%c0_39, %c0_40, %c0_41] : memref<1x8x1xf32, #tpu.memory_space<vmem>>, vector<1x8x1xf32>
    %69 = vector.shape_cast %68 : vector<1x8x1xf32> to vector<8x1xf32>
    %70 = arith.mulf %59, %59 : vector<8x512xf32>
    %cst_42 = arith.constant dense<0.000000e+00> : vector<8xf32>
    %71 = vector.multi_reduction <add>, %70, %cst_42 [1] : vector<8x512xf32> to vector<8xf32>
    %72 = vector.shape_cast %71 : vector<8xf32> to vector<8x1xf32>
    %73 = arith.addf %69, %72 : vector<8x1xf32>
    %c0_43 = arith.constant 0 : index
    %c0_44 = arith.constant 0 : index
    %c0_45 = arith.constant 0 : index
    %74 = vector.load %arg12[%c0_43, %c0_44, %c0_45] : memref<1x8x1xf32, #tpu.memory_space<vmem>>, vector<1x8x1xf32>
    %75 = vector.shape_cast %74 : vector<1x8x1xf32> to vector<8x1xf32>
    %76 = vector.shape_cast %73 : vector<8x1xf32> to vector<1x8x1xf32>
    tpu.vector_store %arg12[%c0_43, %c0_44, %c0_45], %76 {strides = array<i32>} : memref<1x8x1xf32, #tpu.memory_space<vmem>>, vector<1x8x1xf32>,
    return
  }
  func.func @transform_0(%arg0: i32, %arg1: i32) -> (i32, i32, i32) {
    %c0_i32 = arith.constant 0 : i32
    %c0_i32_0 = arith.constant 0 : i32
    return %arg0, %c0_i32, %arg1 : i32, i32, i32
  }
  func.func @transform_1(%arg0: i32, %arg1: i32) -> (i32, i32, i32) {
    %c0_i32 = arith.constant 0 : i32
    %c0_i32_0 = arith.constant 0 : i32
    return %arg0, %c0_i32, %arg1 : i32, i32, i32
  }
  func.func @transform_2(%arg0: i32, %arg1: i32) -> (i32, i32, i32) {
    %c0_i32 = arith.constant 0 : i32
    %c0_i32_0 = arith.constant 0 : i32
    %c0_i32_1 = arith.constant 0 : i32
    return %arg0, %c0_i32, %c0_i32_0 : i32, i32, i32
  }
  func.func @transform_3(%arg0: i32, %arg1: i32) -> (i32, i32, i32) {
    %c0_i32 = arith.constant 0 : i32
    %c0_i32_0 = arith.constant 0 : i32
    %c0_i32_1 = arith.constant 0 : i32
    return %arg0, %c0_i32, %c0_i32_0 : i32, i32, i32
  }
  func.func @transform_4(%arg0: i32, %arg1: i32) -> (i32, i32) {
    %c0_i32 = arith.constant 0 : i32
    %c0_i32_0 = arith.constant 0 : i32
    %c0_i32_1 = arith.constant 0 : i32
    return %c0_i32, %c0_i32_0 : i32, i32
  }
  func.func @transform_5(%arg0: i32, %arg1: i32) -> (i32, i32) {
    %c0_i32 = arith.constant 0 : i32
    %c0_i32_0 = arith.constant 0 : i32
    %c0_i32_1 = arith.constant 0 : i32
    return %c0_i32, %c0_i32_0 : i32, i32
  }
  func.func @transform_6(%arg0: i32, %arg1: i32) -> (i32, i32) {
    %c0_i32 = arith.constant 0 : i32
    %c0_i32_0 = arith.constant 0 : i32
    %c0_i32_1 = arith.constant 0 : i32
    return %c0_i32, %c0_i32_0 : i32, i32
  }
  func.func @transform_7(%arg0: i32, %arg1: i32) -> (i32, i32) {
    %c0_i32 = arith.constant 0 : i32
    %c0_i32_0 = arith.constant 0 : i32
    %c0_i32_1 = arith.constant 0 : i32
    return %c0_i32, %c0_i32_0 : i32, i32
  }
  func.func @transform_8(%arg0: i32, %arg1: i32) -> (i32, i32, i32) {
    %c0_i32 = arith.constant 0 : i32
    %c0_i32_0 = arith.constant 0 : i32
    return %arg0, %c0_i32, %arg1 : i32, i32, i32
  }
  func.func @transform_9(%arg0: i32, %arg1: i32) -> (i32, i32, i32) {
    %c0_i32 = arith.constant 0 : i32
    %c0_i32_0 = arith.constant 0 : i32
    %c0_i32_1 = arith.constant 0 : i32
    return %arg0, %c0_i32, %c0_i32_0 : i32, i32, i32
  }
  func.func @transform_10(%arg0: i32, %arg1: i32) -> (i32, i32, i32) {
    %c0_i32 = arith.constant 0 : i32
    %c0_i32_0 = arith.constant 0 : i32
    %c0_i32_1 = arith.constant 0 : i32
    return %arg0, %c0_i32, %c0_i32_0 : i32, i32, i32
  }
}

module attributes {stable_mosaic.version = 11 : i64} {
  func.func @_apply_kernel(%arg0: i32, %arg1: i32, %arg2: memref<1x8x512xbf16, #tpu.memory_space<vmem>>, %arg3: memref<1x8x1xf32, #tpu.memory_space<vmem>>, %arg4: memref<1x8x1xf32, #tpu.memory_space<vmem>>, %arg5: memref<1x8x512xbf16, #tpu.memory_space<vmem>>, %arg6: memref<1x8x512xbf16, #tpu.memory_space<vmem>>) attributes {dimension_semantics = [#tpu.dimension_semantics<parallel>, #tpu.dimension_semantics<parallel>], iteration_bounds = array<i64: 2, 1>, scalar_prefetch = 0 : i64, scratch_operands = 0 : i64, tpu.core_type = #tpu.core_type<tc>, window_params = [{transform_indices = @transform_0, window_bounds = array<i64: 1, 8, 512>}, {transform_indices = @transform_1, window_bounds = array<i64: 1, 8, 1>}, {transform_indices = @transform_2, window_bounds = array<i64: 1, 8, 1>}, {transform_indices = @transform_3, window_bounds = array<i64: 1, 8, 512>}, {transform_indices = @transform_4, window_bounds = array<i64: 1, 8, 512>}]} {
    %c0 = arith.constant 0 : index
    %c0_0 = arith.constant 0 : index
    %c0_1 = arith.constant 0 : index
    %0 = vector.load %arg2[%c0, %c0_0, %c0_1] : memref<1x8x512xbf16, #tpu.memory_space<vmem>>, vector<1x8x512xbf16>
    %1 = vector.shape_cast %0 : vector<1x8x512xbf16> to vector<8x512xbf16>
    %2 = arith.extf %1 : vector<8x512xbf16> to vector<8x512xf32>
    %c0_2 = arith.constant 0 : index
    %c0_3 = arith.constant 0 : index
    %c0_4 = arith.constant 0 : index
    %3 = vector.load %arg5[%c0_2, %c0_3, %c0_4] : memref<1x8x512xbf16, #tpu.memory_space<vmem>>, vector<1x8x512xbf16>
    %4 = vector.shape_cast %3 : vector<1x8x512xbf16> to vector<8x512xbf16>
    %5 = arith.extf %4 : vector<8x512xbf16> to vector<8x512xf32>
    %cst = arith.constant 5.000000e-01 : f32
    %6 = vector.broadcast %cst : f32 to vector<8x512xf32>
    %7 = arith.mulf %6, %5 : vector<8x512xf32>
    %cst_5 = arith.constant 4.471500e-02 : f32
    %8 = vector.broadcast %cst_5 : f32 to vector<8x512xf32>
    %9 = arith.mulf %8, %5 : vector<8x512xf32>
    %10 = arith.mulf %9, %5 : vector<8x512xf32>
    %11 = arith.mulf %10, %5 : vector<8x512xf32>
    %12 = arith.addf %5, %11 : vector<8x512xf32>
    %cst_6 = arith.constant 0.797884583 : f32
    %13 = vector.broadcast %cst_6 : f32 to vector<8x512xf32>
    %14 = arith.mulf %13, %12 : vector<8x512xf32>
    %15 = math.tanh %14 : vector<8x512xf32>
    %cst_7 = arith.constant 1.000000e+00 : f32
    %16 = vector.broadcast %cst_7 : f32 to vector<8x512xf32>
    %17 = arith.addf %16, %15 : vector<8x512xf32>
    %18 = arith.mulf %7, %17 : vector<8x512xf32>
    %c0_8 = arith.constant 0 : index
    %c0_9 = arith.constant 0 : index
    %c0_10 = arith.constant 0 : index
    %19 = vector.load %arg3[%c0_8, %c0_9, %c0_10] : memref<1x8x1xf32, #tpu.memory_space<vmem>>, vector<1x8x1xf32>
    %20 = vector.shape_cast %19 : vector<1x8x1xf32> to vector<8x1xf32>
    %21 = vector.broadcast %20 : vector<8x1xf32> to vector<8x512xf32>
    %22 = arith.mulf %2, %21 : vector<8x512xf32>
    %c0_11 = arith.constant 0 : index
    %c0_12 = arith.constant 0 : index
    %c0_13 = arith.constant 0 : index
    %23 = vector.load %arg4[%c0_11, %c0_12, %c0_13] : memref<1x8x1xf32, #tpu.memory_space<vmem>>, vector<1x8x1xf32>
    %24 = vector.shape_cast %23 : vector<1x8x1xf32> to vector<8x1xf32>
    %25 = vector.broadcast %24 : vector<8x1xf32> to vector<8x512xf32>
    %26 = arith.addf %22, %25 : vector<8x512xf32>
    %27 = arith.addf %26, %18 : vector<8x512xf32>
    %28 = arith.truncf %27 : vector<8x512xf32> to vector<8x512xbf16>
    %c0_14 = arith.constant 0 : index
    %c0_15 = arith.constant 0 : index
    %c0_16 = arith.constant 0 : index
    %29 = vector.load %arg6[%c0_14, %c0_15, %c0_16] : memref<1x8x512xbf16, #tpu.memory_space<vmem>>, vector<1x8x512xbf16>
    %30 = vector.shape_cast %29 : vector<1x8x512xbf16> to vector<8x512xbf16>
    %31 = vector.shape_cast %28 : vector<8x512xbf16> to vector<1x8x512xbf16>
    tpu.vector_store %arg6[%c0_14, %c0_15, %c0_16], %31 {strides = array<i32>} : memref<1x8x512xbf16, #tpu.memory_space<vmem>>, vector<1x8x512xbf16>,
    return
  }
  func.func @transform_0(%arg0: i32, %arg1: i32) -> (i32, i32, i32) {
    %c0_i32 = arith.constant 0 : i32
    %c0_i32_0 = arith.constant 0 : i32
    return %arg0, %c0_i32, %arg1 : i32, i32, i32
  }
  func.func @transform_1(%arg0: i32, %arg1: i32) -> (i32, i32, i32) {
    %c0_i32 = arith.constant 0 : i32
    %c0_i32_0 = arith.constant 0 : i32
    %c0_i32_1 = arith.constant 0 : i32
    return %arg0, %c0_i32, %c0_i32_0 : i32, i32, i32
  }
  func.func @transform_2(%arg0: i32, %arg1: i32) -> (i32, i32, i32) {
    %c0_i32 = arith.constant 0 : i32
    %c0_i32_0 = arith.constant 0 : i32
    %c0_i32_1 = arith.constant 0 : i32
    return %arg0, %c0_i32, %c0_i32_0 : i32, i32, i32
  }
  func.func @transform_3(%arg0: i32, %arg1: i32) -> (i32, i32, i32) {
    %c0_i32 = arith.constant 0 : i32
    %c0_i32_0 = arith.constant 0 : i32
    return %arg0, %c0_i32, %arg1 : i32, i32, i32
  }
  func.func @transform_4(%arg0: i32, %arg1: i32) -> (i32, i32, i32) {
    %c0_i32 = arith.constant 0 : i32
    %c0_i32_0 = arith.constant 0 : i32
    return %arg0, %c0_i32, %arg1 : i32, i32, i32
  }
}

module attributes {stable_mosaic.version = 11 : i64} {
  func.func @_stats_kernel(%arg0: i32, %arg1: i32, %arg2: memref<1x8x512xbf16, #tpu.memory_space<vmem>>, %arg3: memref<1x8x1xf32, #tpu.memory_space<vmem>>, %arg4: memref<1x8x1xf32, #tpu.memory_space<vmem>>) attributes {dimension_semantics = [#tpu.dimension_semantics<parallel>, #tpu.dimension_semantics<arbitrary>], iteration_bounds = array<i64: 2, 1>, scalar_prefetch = 0 : i64, scratch_operands = 0 : i64, tpu.core_type = #tpu.core_type<tc>, window_params = [{transform_indices = @transform_0, window_bounds = array<i64: 1, 8, 512>}, {transform_indices = @transform_1, window_bounds = array<i64: 1, 8, 1>}, {transform_indices = @transform_2, window_bounds = array<i64: 1, 8, 1>}]} {
    %c0_i32 = arith.constant 0 : i32
    %0 = arith.cmpi eq, %arg1, %c0_i32 : i32
    %1 = arith.extui %0 : i1 to i32
    %c0_i32_0 = arith.constant 0 : i32
    %2 = arith.cmpi ne, %1, %c0_i32_0 : i32
    scf.if %2 {
      %cst_16 = arith.constant 0.000000e+00 : f32
      %23 = vector.broadcast %cst_16 : f32 to vector<1x8x1xf32>
      %c0_17 = arith.constant 0 : index
      %c0_18 = arith.constant 0 : index
      %c0_19 = arith.constant 0 : index
      %24 = vector.load %arg3[%c0_17, %c0_18, %c0_19] : memref<1x8x1xf32, #tpu.memory_space<vmem>>, vector<1x8x1xf32>
      tpu.vector_store %arg3[%c0_17, %c0_18, %c0_19], %23 {strides = array<i32>} : memref<1x8x1xf32, #tpu.memory_space<vmem>>, vector<1x8x1xf32>,
      %cst_20 = arith.constant 0.000000e+00 : f32
      %25 = vector.broadcast %cst_20 : f32 to vector<1x8x1xf32>
      %c0_21 = arith.constant 0 : index
      %c0_22 = arith.constant 0 : index
      %c0_23 = arith.constant 0 : index
      %26 = vector.load %arg4[%c0_21, %c0_22, %c0_23] : memref<1x8x1xf32, #tpu.memory_space<vmem>>, vector<1x8x1xf32>
      tpu.vector_store %arg4[%c0_21, %c0_22, %c0_23], %25 {strides = array<i32>} : memref<1x8x1xf32, #tpu.memory_space<vmem>>, vector<1x8x1xf32>,
    } else {
    }
    %c0 = arith.constant 0 : index
    %c0_1 = arith.constant 0 : index
    %c0_2 = arith.constant 0 : index
    %3 = vector.load %arg2[%c0, %c0_1, %c0_2] : memref<1x8x512xbf16, #tpu.memory_space<vmem>>, vector<1x8x512xbf16>
    %4 = vector.shape_cast %3 : vector<1x8x512xbf16> to vector<8x512xbf16>
    %5 = arith.extf %4 : vector<8x512xbf16> to vector<8x512xf32>
    %c0_3 = arith.constant 0 : index
    %c0_4 = arith.constant 0 : index
    %c0_5 = arith.constant 0 : index
    %6 = vector.load %arg3[%c0_3, %c0_4, %c0_5] : memref<1x8x1xf32, #tpu.memory_space<vmem>>, vector<1x8x1xf32>
    %7 = vector.shape_cast %6 : vector<1x8x1xf32> to vector<8x1xf32>
    %cst = arith.constant dense<0.000000e+00> : vector<8xf32>
    %8 = vector.multi_reduction <add>, %5, %cst [1] : vector<8x512xf32> to vector<8xf32>
    %9 = vector.shape_cast %8 : vector<8xf32> to vector<8x1xf32>
    %10 = arith.addf %7, %9 : vector<8x1xf32>
    %c0_6 = arith.constant 0 : index
    %c0_7 = arith.constant 0 : index
    %c0_8 = arith.constant 0 : index
    %11 = vector.load %arg3[%c0_6, %c0_7, %c0_8] : memref<1x8x1xf32, #tpu.memory_space<vmem>>, vector<1x8x1xf32>
    %12 = vector.shape_cast %11 : vector<1x8x1xf32> to vector<8x1xf32>
    %13 = vector.shape_cast %10 : vector<8x1xf32> to vector<1x8x1xf32>
    tpu.vector_store %arg3[%c0_6, %c0_7, %c0_8], %13 {strides = array<i32>} : memref<1x8x1xf32, #tpu.memory_space<vmem>>, vector<1x8x1xf32>,
    %c0_9 = arith.constant 0 : index
    %c0_10 = arith.constant 0 : index
    %c0_11 = arith.constant 0 : index
    %14 = vector.load %arg4[%c0_9, %c0_10, %c0_11] : memref<1x8x1xf32, #tpu.memory_space<vmem>>, vector<1x8x1xf32>
    %15 = vector.shape_cast %14 : vector<1x8x1xf32> to vector<8x1xf32>
    %16 = arith.mulf %5, %5 : vector<8x512xf32>
    %cst_12 = arith.constant dense<0.000000e+00> : vector<8xf32>
    %17 = vector.multi_reduction <add>, %16, %cst_12 [1] : vector<8x512xf32> to vector<8xf32>
    %18 = vector.shape_cast %17 : vector<8xf32> to vector<8x1xf32>
    %19 = arith.addf %15, %18 : vector<8x1xf32>
    %c0_13 = arith.constant 0 : index
    %c0_14 = arith.constant 0 : index
    %c0_15 = arith.constant 0 : index
    %20 = vector.load %arg4[%c0_13, %c0_14, %c0_15] : memref<1x8x1xf32, #tpu.memory_space<vmem>>, vector<1x8x1xf32>
    %21 = vector.shape_cast %20 : vector<1x8x1xf32> to vector<8x1xf32>
    %22 = vector.shape_cast %19 : vector<8x1xf32> to vector<1x8x1xf32>
    tpu.vector_store %arg4[%c0_13, %c0_14, %c0_15], %22 {strides = array<i32>} : memref<1x8x1xf32, #tpu.memory_space<vmem>>, vector<1x8x1xf32>,
    return
  }
  func.func @transform_0(%arg0: i32, %arg1: i32) -> (i32, i32, i32) {
    %c0_i32 = arith.constant 0 : i32
    %c0_i32_0 = arith.constant 0 : i32
    return %arg0, %c0_i32, %arg1 : i32, i32, i32
  }
  func.func @transform_1(%arg0: i32, %arg1: i32) -> (i32, i32, i32) {
    %c0_i32 = arith.constant 0 : i32
    %c0_i32_0 = arith.constant 0 : i32
    %c0_i32_1 = arith.constant 0 : i32
    return %arg0, %c0_i32, %c0_i32_0 : i32, i32, i32
  }
  func.func @transform_2(%arg0: i32, %arg1: i32) -> (i32, i32, i32) {
    %c0_i32 = arith.constant 0 : i32
    %c0_i32_0 = arith.constant 0 : i32
    %c0_i32_1 = arith.constant 0 : i32
    return %arg0, %c0_i32, %c0_i32_0 : i32, i32, i32
  }
}

module attributes {stable_mosaic.version = 11 : i64} {
  func.func @kernel(%arg0: i32, %arg1: i32, %arg2: memref<1x8x512xbf16, #tpu.memory_space<vmem>>, %arg3: memref<1x2x8x1xf32, #tpu.memory_space<vmem>>, %arg4: memref<1x2x8x1xf32, #tpu.memory_space<vmem>>, %arg5: memref<2x2x8xbf16, #tpu.memory_space<vmem>>, %arg6: memref<2x1xf32, #tpu.memory_space<vmem>>, %arg7: memref<1x2x512xf32, #tpu.memory_space<vmem>>) attributes {dimension_semantics = [#tpu.dimension_semantics<parallel>, #tpu.dimension_semantics<parallel>], iteration_bounds = array<i64: 2, 1>, scalar_prefetch = 0 : i64, scratch_operands = 0 : i64, tpu.core_type = #tpu.core_type<tc>, window_params = [{transform_indices = @transform_0, window_bounds = array<i64: 1, 8, 512>}, {transform_indices = @transform_1, window_bounds = array<i64: 1, 2, 8, 1>}, {transform_indices = @transform_2, window_bounds = array<i64: 1, 2, 8, 1>}, {pipeline_mode = #tpu.pipeline_mode<synchronous>, transform_indices = @transform_3, window_bounds = array<i64: 2, 2, 8>}, {pipeline_mode = #tpu.pipeline_mode<synchronous>, transform_indices = @transform_4, window_bounds = array<i64: 2, 1>}, {transform_indices = @transform_5, window_bounds = array<i64: 1, 2, 512>}]} {
    %c0 = arith.constant 0 : index
    %c0_0 = arith.constant 0 : index
    %c0_1 = arith.constant 0 : index
    %0 = vector.load %arg2[%c0, %c0_0, %c0_1] : memref<1x8x512xbf16, #tpu.memory_space<vmem>>, vector<1x8x512xbf16>
    %1 = vector.shape_cast %0 : vector<1x8x512xbf16> to vector<8x512xbf16>
    %2 = arith.extf %1 : vector<8x512xbf16> to vector<8x512xf32>
    %cst = arith.constant 0.000000e+00 : f32
    %3 = vector.broadcast %cst : f32 to vector<2x512xf32>
    %c0_2 = arith.constant 0 : index
    %c0_3 = arith.constant 0 : index
    %4 = vector.load %arg6[%c0_2, %c0_3] : memref<2x1xf32, #tpu.memory_space<vmem>>, vector<2x1xf32>
    %5 = vector.broadcast %4 : vector<2x1xf32> to vector<2x512xf32>
    %6 = arith.addf %3, %5 : vector<2x512xf32>
    %c0_4 = arith.constant 0 : index
    %c0_5 = arith.constant 0 : index
    %c0_6 = arith.constant 0 : index
    %c0_7 = arith.constant 0 : index
    %7 = vector.load %arg3[%c0_4, %c0_5, %c0_6, %c0_7] : memref<1x2x8x1xf32, #tpu.memory_space<vmem>>, vector<1x1x8x1xf32>
    %8 = vector.shape_cast %7 : vector<1x1x8x1xf32> to vector<8x1xf32>
    %9 = vector.broadcast %8 : vector<8x1xf32> to vector<8x512xf32>
    %10 = arith.mulf %2, %9 : vector<8x512xf32>
    %c0_8 = arith.constant 0 : index
    %c0_9 = arith.constant 0 : index
    %c0_10 = arith.constant 0 : index
    %c0_11 = arith.constant 0 : index
    %11 = vector.load %arg4[%c0_8, %c0_9, %c0_10, %c0_11] : memref<1x2x8x1xf32, #tpu.memory_space<vmem>>, vector<1x1x8x1xf32>
    %12 = vector.shape_cast %11 : vector<1x1x8x1xf32> to vector<8x1xf32>
    %13 = vector.broadcast %12 : vector<8x1xf32> to vector<8x512xf32>
    %14 = arith.addf %10, %13 : vector<8x512xf32>
    %cst_12 = arith.constant 5.000000e-01 : f32
    %15 = vector.broadcast %cst_12 : f32 to vector<8x512xf32>
    %16 = arith.mulf %15, %14 : vector<8x512xf32>
    %cst_13 = arith.constant 4.471500e-02 : f32
    %17 = vector.broadcast %cst_13 : f32 to vector<8x512xf32>
    %18 = arith.mulf %17, %14 : vector<8x512xf32>
    %19 = arith.mulf %18, %14 : vector<8x512xf32>
    %20 = arith.mulf %19, %14 : vector<8x512xf32>
    %21 = arith.addf %14, %20 : vector<8x512xf32>
    %cst_14 = arith.constant 0.797884583 : f32
    %22 = vector.broadcast %cst_14 : f32 to vector<8x512xf32>
    %23 = arith.mulf %22, %21 : vector<8x512xf32>
    %24 = math.tanh %23 : vector<8x512xf32>
    %cst_15 = arith.constant 1.000000e+00 : f32
    %25 = vector.broadcast %cst_15 : f32 to vector<8x512xf32>
    %26 = arith.addf %25, %24 : vector<8x512xf32>
    %27 = arith.mulf %16, %26 : vector<8x512xf32>
    %c0_16 = arith.constant 0 : index
    %c0_17 = arith.constant 0 : index
    %c0_18 = arith.constant 0 : index
    %28 = vector.load %arg5[%c0_16, %c0_17, %c0_18] : memref<2x2x8xbf16, #tpu.memory_space<vmem>>, vector<1x2x8xbf16>
    %29 = vector.shape_cast %28 : vector<1x2x8xbf16> to vector<2x8xbf16>
    %30 = arith.truncf %27 : vector<8x512xf32> to vector<8x512xbf16>
    %cst_19 = arith.constant dense<0.000000e+00> : vector<2x512xf32>
    %31 = tpu.matmul %29, %30, %cst_19 {dimension_numbers = #tpu.dot_dimension_numbers<[1], [0], [0], [1], [0, 0, 1, 1], [], []>} : vector<2x8xbf16>, vector<8x512xbf16>, vector<2x512xf32> -> vector<2x512xf32>
    %32 = arith.addf %6, %31 : vector<2x512xf32>
    %c0_20 = arith.constant 0 : index
    %c1 = arith.constant 1 : index
    %c0_21 = arith.constant 0 : index
    %c0_22 = arith.constant 0 : index
    %33 = vector.load %arg3[%c0_20, %c1, %c0_21, %c0_22] : memref<1x2x8x1xf32, #tpu.memory_space<vmem>>, vector<1x1x8x1xf32>
    %34 = vector.shape_cast %33 : vector<1x1x8x1xf32> to vector<8x1xf32>
    %35 = vector.broadcast %34 : vector<8x1xf32> to vector<8x512xf32>
    %36 = arith.mulf %2, %35 : vector<8x512xf32>
    %c0_23 = arith.constant 0 : index
    %c1_24 = arith.constant 1 : index
    %c0_25 = arith.constant 0 : index
    %c0_26 = arith.constant 0 : index
    %37 = vector.load %arg4[%c0_23, %c1_24, %c0_25, %c0_26] : memref<1x2x8x1xf32, #tpu.memory_space<vmem>>, vector<1x1x8x1xf32>
    %38 = vector.shape_cast %37 : vector<1x1x8x1xf32> to vector<8x1xf32>
    %39 = vector.broadcast %38 : vector<8x1xf32> to vector<8x512xf32>
    %40 = arith.addf %36, %39 : vector<8x512xf32>
    %cst_27 = arith.constant 5.000000e-01 : f32
    %41 = vector.broadcast %cst_27 : f32 to vector<8x512xf32>
    %42 = arith.mulf %41, %40 : vector<8x512xf32>
    %cst_28 = arith.constant 4.471500e-02 : f32
    %43 = vector.broadcast %cst_28 : f32 to vector<8x512xf32>
    %44 = arith.mulf %43, %40 : vector<8x512xf32>
    %45 = arith.mulf %44, %40 : vector<8x512xf32>
    %46 = arith.mulf %45, %40 : vector<8x512xf32>
    %47 = arith.addf %40, %46 : vector<8x512xf32>
    %cst_29 = arith.constant 0.797884583 : f32
    %48 = vector.broadcast %cst_29 : f32 to vector<8x512xf32>
    %49 = arith.mulf %48, %47 : vector<8x512xf32>
    %50 = math.tanh %49 : vector<8x512xf32>
    %cst_30 = arith.constant 1.000000e+00 : f32
    %51 = vector.broadcast %cst_30 : f32 to vector<8x512xf32>
    %52 = arith.addf %51, %50 : vector<8x512xf32>
    %53 = arith.mulf %42, %52 : vector<8x512xf32>
    %c1_31 = arith.constant 1 : index
    %c0_32 = arith.constant 0 : index
    %c0_33 = arith.constant 0 : index
    %54 = vector.load %arg5[%c1_31, %c0_32, %c0_33] : memref<2x2x8xbf16, #tpu.memory_space<vmem>>, vector<1x2x8xbf16>
    %55 = vector.shape_cast %54 : vector<1x2x8xbf16> to vector<2x8xbf16>
    %56 = arith.truncf %53 : vector<8x512xf32> to vector<8x512xbf16>
    %cst_34 = arith.constant dense<0.000000e+00> : vector<2x512xf32>
    %57 = tpu.matmul %55, %56, %cst_34 {dimension_numbers = #tpu.dot_dimension_numbers<[1], [0], [0], [1], [0, 0, 1, 1], [], []>} : vector<2x8xbf16>, vector<8x512xbf16>, vector<2x512xf32> -> vector<2x512xf32>
    %58 = arith.addf %32, %57 : vector<2x512xf32>
    %c0_35 = arith.constant 0 : index
    %c0_36 = arith.constant 0 : index
    %c0_37 = arith.constant 0 : index
    %59 = vector.load %arg7[%c0_35, %c0_36, %c0_37] : memref<1x2x512xf32, #tpu.memory_space<vmem>>, vector<1x2x512xf32>
    %60 = vector.shape_cast %59 : vector<1x2x512xf32> to vector<2x512xf32>
    %61 = vector.shape_cast %58 : vector<2x512xf32> to vector<1x2x512xf32>
    tpu.vector_store %arg7[%c0_35, %c0_36, %c0_37], %61 {strides = array<i32>} : memref<1x2x512xf32, #tpu.memory_space<vmem>>, vector<1x2x512xf32>,
    return
  }
  func.func @transform_0(%arg0: i32, %arg1: i32) -> (i32, i32, i32) {
    %c0_i32 = arith.constant 0 : i32
    %c0_i32_0 = arith.constant 0 : i32
    return %arg0, %c0_i32, %arg1 : i32, i32, i32
  }
  func.func @transform_1(%arg0: i32, %arg1: i32) -> (i32, i32, i32, i32) {
    %c0_i32 = arith.constant 0 : i32
    %c0_i32_0 = arith.constant 0 : i32
    %c0_i32_1 = arith.constant 0 : i32
    %c0_i32_2 = arith.constant 0 : i32
    return %arg0, %c0_i32, %c0_i32_0, %c0_i32_1 : i32, i32, i32, i32
  }
  func.func @transform_2(%arg0: i32, %arg1: i32) -> (i32, i32, i32, i32) {
    %c0_i32 = arith.constant 0 : i32
    %c0_i32_0 = arith.constant 0 : i32
    %c0_i32_1 = arith.constant 0 : i32
    %c0_i32_2 = arith.constant 0 : i32
    return %arg0, %c0_i32, %c0_i32_0, %c0_i32_1 : i32, i32, i32, i32
  }
  func.func @transform_3(%arg0: i32, %arg1: i32) -> (i32, i32, i32) {
    %c0_i32 = arith.constant 0 : i32
    %c0_i32_0 = arith.constant 0 : i32
    %c0_i32_1 = arith.constant 0 : i32
    %c0_i32_2 = arith.constant 0 : i32
    return %c0_i32, %c0_i32_0, %c0_i32_1 : i32, i32, i32
  }
  func.func @transform_4(%arg0: i32, %arg1: i32) -> (i32, i32) {
    %c0_i32 = arith.constant 0 : i32
    %c0_i32_0 = arith.constant 0 : i32
    %c0_i32_1 = arith.constant 0 : i32
    return %c0_i32, %c0_i32_0 : i32, i32
  }
  func.func @transform_5(%arg0: i32, %arg1: i32) -> (i32, i32, i32) {
    %c0_i32 = arith.constant 0 : i32
    %c0_i32_0 = arith.constant 0 : i32
    return %arg0, %c0_i32, %arg1 : i32, i32, i32
  }
}

</mosaic_0001>

<bundles_post_ra>
// kernel: tfno_forward.12
= control target key start
LH: loop header
LB: loop body
LE: loop exit
PB: predicated region body
PF: predicated region fallthrough
CT: control target
= control target key end

     0   :  { %s407_s9 = smov 0   ;;  %s409_s10 = smov 0   ;;  %s468_s0 = inlined_call_operand.vmem [shape: f32[2,3,512], index: 0, kind: input, shape index: {}]   ;;  %s469_s1 = inlined_call_operand.vmem [shape: f32[2,3,1], index: 1, kind: output, shape index: {0}]   ;;  %s470_s2 = inlined_call_operand.vmem [shape: f32[2,3,1], index: 2, kind: output, shape index: {1}]  }
   0x1   :  { %s411_s11 = smov 0  }
   0x2 LB: > { %s25_s12 = sadd.s32 1, %s385_s10  ;;  %p332_p0 = scmp.ge.s32.totalorder %s389_s11, 1  ;;  %s389_s11 = sphi %s411_s11, %s13_s11   ;;  %s385_s10 = sphi %s409_s10, %s472_s10   ;;  %s381_s9 = sphi %s407_s9, %s471_s9  }
   0x3   : > { %p27_p1 = scmp.ge.s32.totalorder %s25_s12, 2  ;;  %p134_p2 = scmp.lt.s32.totalorder %s389_s11, 3 }
   0x5   : > { %s474_s12 = smov (%p27_p1, %s25_s12), 0  ;;  %p135_p3 = pnand %p332_p0, %p134_p2 }
   0x6   : > { %p164_p4 = scmp.lt.s32.totalorder (!%p135_p3), %s381_s9, 1 }
   0x7   : > { %138 = sbr.rel (%p135_p3) target bundleno = 170 (0xaa), region = 24 }
   0xc   : > { %s476_s9 = smov (!%p164_p4, %s381_s9), 1  ;;  %vm185_vm0 = vcmask 2048   ;;  %vm197_vm1 = vcmask 1042432   ;;  %v391_v2 = vmov 0.0  }
   0xd   : > { %s339_s13 = sshll.u32 %s476_s9, 4  ;;  %s335_s14 = sshll.u32 %s476_s9, 2 }
   0xe   : > { %s171_s17 = scalar_lea.vmem %s468_s0, %s339_s13  ;;  %s437_s20 = scalar_lea.vmem %s469_s1, %s335_s14 }
   0xf   : > { %v188_v0 = vld [vmem:[%s171_s17] sm:$0x77]  ;;  %v189_v1 = vld [vmem:[%s171_s17 + $0x8] sm:$0x77]  ;;  %186 = vst.msk [vmem:[%s437_s20] sm:$0x7] %vm185_vm0, %v391_v2  ;;  %s180_s23 = scalar_lea.vmem %s470_s2, %s335_s14 }
  0x10   : > { %v193_v3 = vcombine.high %v188_v0, %v188_v0  ;;  %v194_v4 = vcombine.high %v189_v1, %v189_v1  ;;  %v198_v5 = vsel %vm197_vm1, %v188_v0, 0.0  ;;  %v211_v6 = vmul.f32 %v188_v0, %v188_v0  ;;  %187 = vst.msk [vmem:[%s180_s23] sm:$0x7] %vm185_vm0, %v391_v2 }
  0x11   : > { %v212_v7 = vmul.f32 %v189_v1, %v189_v1  ;;  %v201_v9 = vsel %vm197_vm1, %v189_v1, 0.0 }
  0x12   : > { %v199_v8 = vsel %vm197_vm1, %v193_v3, 0.0  ;;  %v215_v11 = vcombine.high %v211_v6, %v211_v6  ;;  %v219_v13 = vsel %vm197_vm1, %v211_v6, 0.0  ;;  %v203_v14 = vsel %vm197_vm1, %v194_v4, 0.0 }
  0x13   : > { %v200_v10 = vadd.f32 %v199_v8, %v198_v5  ;;  %v216_v12 = vcombine.high %v212_v7, %v212_v7  ;;  %v222_v17 = vsel %vm197_vm1, %v212_v7, 0.0 }
  0x14   : > { %v220_v16 = vsel %vm197_vm1, %v215_v11, 0.0 }
  0x15   : > { %v202_v15 = vadd.f32 %v201_v9, %v200_v10  ;;  %v221_v18 = vadd.f32 %v220_v16, %v219_v13  ;;  %v224_v20 = vsel %vm197_vm1, %v216_v12, 0.0 }
  0x16   : > { %v190_v23 = vld [vmem:[%s437_s20] sm:$0x7] }
  0x17   : > { %v204_v19 = vadd.f32 %v203_v14, %v202_v15  ;;  %v223_v21 = vadd.f32 %v222_v17, %v221_v18  ;;  %v210_v26 = vld [vmem:[%s180_s23] sm:$0x7] }
  0x19   : > { %205 = vadd.xlane.f32.xlu0 %v204_v19  ;;  %v225_v22 = vadd.f32 %v224_v20, %v223_v21 }
  0x1d   : > { %226 = vadd.xlane.f32.xlu0 %v225_v22 }
  0xa2   : > { %v206_v24 = vpop.xlane.xlu0 %205 }
  0xa3   : > { %v207_v25 = vadd.f32 %v206_v24, %v190_v23 }
  0xa5   : > { %209 = vst.msk [vmem:[%s437_s20] sm:$0x7] %vm185_vm0, %v207_v25 }
  0xa6   : > { %v227_v27 = vpop.xlane.xlu0 %226 }
  0xa7   : > { %v228_v28 = vadd.f32 %v227_v27, %v210_v26 }
  0xa9   : > { %229 = vst.msk [vmem:[%s180_s23] sm:$0x7] %vm185_vm0, %v228_v28 }
  0xaa PF: > { %s13_s11 = sadd.s32 1, %s389_s11   ;;  %s471_s9 = smov %s385_s10 }
  0xab   : > { %p10_p5 = scmp.ge.s32.totalorder %s13_s11, 4   ;;  %s472_s10 = smov %s474_s12 }
  0xad   :  { %12 = sbr.rel (!%p10_p5) target bundleno = 2 (0x2), region = 70 }

// kernel: tfno_forward.13
= control target key start
LH: loop header
LB: loop body
LE: loop exit
PB: predicated region body
PF: predicated region fallthrough
CT: control target
= control target key end

     0   :  { %s708_s18 = smov 0   ;;  %s710_s19 = smov 0   ;;  %s761_s0 = inlined_call_operand.vmem [shape: f32[2,3,512], index: 0, kind: input, shape index: {}]   ;;  %s762_s1 = inlined_call_operand.vmem [shape: f32[2,3,1], index: 1, kind: input, shape index: {}]   ;;  %s763_s2 = inlined_call_operand.vmem [shape: f32[2,3,1], index: 2, kind: input, shape index: {}]   ;;  %s764_s3 = inlined_call_operand.vmem [shape: bf16[8,3], index: 3, kind: input, shape index: {}]   ;;  %s765_s4 = inlined_call_operand.vmem [shape: f32[8,1], index: 4, kind: input, shape index: {}]   ;;  %s766_s5 = inlined_call_operand.vmem [shape: bf16[2,8,512], index: 5, kind: output, shape index: {}]  }
   0x1   :  { %s712_s20 = smov 0  }
   0x2 LB: > { %s27_s21 = sadd.s32 1, %s669_s19  ;;  %p601_p0 = scmp.ge.s32.totalorder %s673_s20, 1  ;;  %s673_s20 = sphi %s712_s20, %s15_s20   ;;  %s669_s19 = sphi %s710_s19, %s768_s19   ;;  %s665_s18 = sphi %s708_s18, %s767_s18  }
   0x3   : > { %p29_p1 = scmp.ge.s32.totalorder %s27_s21, 2  ;;  %p226_p2 = scmp.lt.s32.totalorder %s673_s20, 3 }
   0x5   : > { %s770_s21 = smov (%p29_p1, %s27_s21), 0  ;;  %p227_p3 = pnand %p601_p0, %p226_p2 }
   0x6   : > { %p271_p4 = scmp.lt.s32.totalorder (!%p227_p3), %s665_s18, 1 }
   0x7   : > { %230 = sbr.rel (%p227_p3) target bundleno = 387 (0x183), region = 40 }
   0xc   : > { %v675_v0 = vmov 0   ;;  %s772_s18 = smov (!%p271_p4, %s665_s18), 1  ;;  %v360_v3 = vld [vmem:[%s765_s4] sm:$0xff]  ;;  %v676_v4 = vmov 839922192   ;;  %v309_v6 = vlaneseq  ;;  %vm370_vm0 = vcmask 1040384  }
   0xd   : > { %645 = vset.pattern.permute.xlu0 %v675_v0  ;;  %418 = vmatprep.mubr.bf16.mxu0 %v675_v0  ;;  %s604_s22 = sshll.u32 %s772_s18, 2  ;;  %v307_v5 = vunpack.c.l.s4 %v676_v4  ;;  %s614_s6 = sshll.u32 %s772_s18, 4  ;;  %vm371_vm1 = vcmask 1041408   ;;  %v677_v37 = vmov 65535   ;;  %v349_v51 = vld [vmem:[%s764_s3] sm:$0xf] }
   0xe   : > { %459 = vmatprep.mubr.bf16.mxu1 %v675_v0  ;;  %646 = vset.pattern.permute.xlu1 %v675_v0  ;;  %s283_s25 = scalar_lea.vmem %s762_s1, %s604_s22  ;;  %s287_s28 = scalar_lea.vmem %s763_s2, %s604_s22  ;;  %v310_v8 = vshrl.u32 %v309_v6, 7  ;;  %v372_v38 = vsel %vm370_vm0, 4294967295, %v677_v37  ;;  %vm366_vm2 = vcmask 23552  }
   0xf   : > { %v301_v1 = vld [vmem:[%s283_s25] sm:$0x7]  ;;  %363 = vperm.xlu1 %646, %v360_v3   ;;  %v308_v7 = vunpack.c.0.s8 %v307_v5  ;;  %s278_s9 = scalar_lea.vmem %s761_s0, %s614_s6  ;;  %v373_v44 = vsel %vm371_vm1, %v372_v38, 0  ;;  %s296_s14 = scalar_lea.vmem %s766_s5, %s614_s6 }
  0x10   : > { %304 = vperm.xlu0 %645, %v301_v1   ;;  %v316_v2 = vld [vmem:[%s287_s28] sm:$0x7]  ;;  %v300_v13 = vld [vmem:[%s278_s9 + $0x8] sm:$0x77] }
  0x11   : > { %v311_v9 = vsub.s32 %v308_v7, %v310_v8  ;;  %v299_v12 = vld [vmem:[%s278_s9] sm:$0x77] }
  0x14   : > { %319 = vperm.xlu0 %645, %v316_v2  }
  0x8a   : > { %v364_v52 = vpop.permute.xlu1 %363 }
  0x8b   : > { %v305_v10 = vpop.permute.xlu0 %304 }
  0x8c   : > { %v312_v11 = vrot.slane %v305_v10, %v311_v9 }
  0x8e   : > { %v314_v15 = vmul.f32 %v312_v11, %v299_v12  ;;  %v315_v16 = vmul.f32 %v312_v11, %v300_v13 }
  0x8f   : > { %v320_v14 = vpop.permute.xlu0 %319 }
  0x90   : > { %v327_v17 = vrot.slane %v320_v14, %v311_v9 }
  0x92   : > { %v329_v18 = vadd.f32 %v327_v17, %v314_v15  ;;  %v330_v19 = vadd.f32 %v327_v17, %v315_v16 }
  0x94   : > { %v333_v20 = vmul.f32 0.044715, %v329_v18  ;;  %v334_v21 = vmul.f32 0.044715, %v330_v19  ;;  %v331_v32 = vmul.f32 0.5, %v329_v18  ;;  %v332_v34 = vmul.f32 0.5, %v330_v19 }
  0x96   : > { %v335_v22 = vmul.f32 %v333_v20, %v329_v18  ;;  %v336_v23 = vmul.f32 %v334_v21, %v330_v19 }
  0x98   : > { %v337_v24 = vmul.f32 %v335_v22, %v329_v18  ;;  %v338_v25 = vmul.f32 %v336_v23, %v330_v19 }
  0x9a   : > { %v339_v26 = vadd.f32 %v337_v24, %v329_v18  ;;  %v340_v27 = vadd.f32 %v338_v25, %v330_v19 }
  0x9c   : > { %v341_v28 = vmul.f32 0.7978846, %v339_v26  ;;  %v342_v29 = vmul.f32 0.7978846, %v340_v27 }
  0x9e   : > { %647 = vtanh.f32 %v341_v28 }
  0x9f   : > { %649 = vtanh.f32 %v342_v29 }
  0xab   : > { %v648_v30 = vpop.eup %647 }
  0xac   : > { %v650_v31 = vpop.eup %649  ;;  %v345_v33 = vadd.f32 1.0, %v648_v30 }
  0xad   : > { %v346_v35 = vadd.f32 1.0, %v650_v31 }
  0xae   : > { %v347_v36 = vmul.f32 %v345_v33, %v331_v32 }
  0xaf   : > { %v348_v39 = vmul.f32 %v346_v35, %v332_v34 }
  0xb0   : > { %v352_v40 = vcombine.high %v347_v36, %v347_v36  ;;  %v356_v42 = vpack.c.bf16 %v347_v36, %v347_v36 }
  0xb1   : > { %v353_v41 = vcombine.high %v348_v39, %v348_v39  ;;  %v358_v45 = vpack.c.bf16 %v348_v39, %v348_v39 }
  0xb2   : > { %v357_v43 = vpack.c.bf16 %v352_v40, %v352_v40  ;;  %v375_v49 = vand.u32 %v373_v44, %v356_v42 }
  0xb3   : > { %v359_v46 = vpack.c.bf16 %v353_v41, %v353_v41  ;;  %v381_v50 = vand.u32 %v373_v44, %v358_v45 }
  0xb4   : > { %v378_v47 = vand.u32 %v373_v44, %v357_v43 }
  0xb5   : > { %v384_v48 = vand.u32 %v373_v44, %v359_v46 }
  0xb6   : > { %400 = vmatprep.subr.bf16.mxu0 %v378_v47 }
  0xb7   : > { %441 = vmatprep.subr.bf16.mxu1 %v384_v48  ;;  %401 = vmatpush1.bf16.msra.mxu0 %v375_v49 }
  0xb8   : > { %442 = vmatpush1.bf16.msra.mxu1 %v381_v50 }
  0xba   : > { %608 = vmatmul.mubr.msk.bf16.vlgmr.msra.gmra.mxu0 %vm366_vm2, %v349_v51 }
  0xbb   : > { %609 = vmatmul.mubr.msk.bf16.vlgmr.msra.gmra.mxu1 %vm366_vm2, %v349_v51 }
 0x17a   : > { %v420_v53 = vpop.f32.mrf.mxu0 }
 0x17b   : > { %v461_v54 = vpop.f32.mrf.mxu1  ;;  %v421_v56 = vadd.f32 %v420_v53, %v364_v52 }
 0x17c   : > { %v422_v55 = vpop.f32.mrf.mxu0  ;;  %v462_v59 = vadd.f32 %v461_v54, %v364_v52 }
 0x17d   : > { %v423_v57 = vadd.f32 %v422_v55, %v364_v52  ;;  %v463_v58 = vpop.f32.mrf.mxu1 }
 0x17e   : > { %v464_v60 = vadd.f32 %v463_v58, %v364_v52  ;;  %v424_v61 = vpop.f32.mrf.mxu0 }
 0x17f   : > { %v616_v62 = vpack.c.bf16 %v423_v57, %v421_v56  ;;  %v465_v63 = vpop.f32.mrf.mxu1 }
 0x180   : > { %v617_v0 = vpack.c.bf16 %v464_v60, %v462_v59  ;;  %v425_v1 = vpop.f32.mrf.mxu0 }
 0x181   : > { %484 = vst [vmem:[%s296_s14] sm:$0xff] %v616_v62  ;;  %v466_v2 = vpop.f32.mrf.mxu1 }
 0x182   : > { %485 = vst [vmem:[%s296_s14 + $0x8] sm:$0xff] %v617_v0 }
 0x183 PF: > { %s15_s20 = sadd.s32 1, %s673_s20   ;;  %s767_s18 = smov %s669_s19 }
 0x184   : > { %p12_p5 = scmp.ge.s32.totalorder %s15_s20, 4   ;;  %s768_s19 = smov %s770_s21 }
 0x186   :  { %14 = sbr.rel (!%p12_p5) target bundleno = 2 (0x2), region = 76 }

// kernel: tfno_forward.14
= control target key start
LH: loop header
LB: loop body
LE: loop exit
PB: predicated region body
PF: predicated region fallthrough
CT: control target
= control target key end

     0   :  { %s865_s18 = smov 0   ;;  %s867_s19 = smov 0   ;;  %s978_s0 = inlined_call_operand.vmem [shape: f32[2,8,48], index: 0, kind: input, shape index: {}]   ;;  %s979_s1 = inlined_call_operand.vmem [shape: f32[2,8,48], index: 1, kind: input, shape index: {}]   ;;  %s980_s2 = inlined_call_operand.vmem [shape: f32[8,8,48], index: 2, kind: input, shape index: {}]   ;;  %s981_s3 = inlined_call_operand.vmem [shape: f32[8,8,48], index: 3, kind: input, shape index: {}]   ;;  %s982_s4 = inlined_call_operand.vmem [shape: f32[2,8,48], index: 4, kind: output, shape index: {0}]   ;;  %s983_s5 = inlined_call_operand.vmem [shape: f32[2,8,48], index: 5, kind: output, shape index: {1}]  }
   0x1   :  { %s869_s20 = smov 0  }
   0x2 LB: > { %s28_s21 = sadd.s32 1, %s829_s19  ;;  %p750_p0 = scmp.ge.s32.totalorder %s833_s20, 1  ;;  %s833_s20 = sphi %s869_s20, %s16_s20   ;;  %s829_s19 = sphi %s867_s19, %s985_s19   ;;  %s825_s18 = sphi %s865_s18, %s984_s18  }
   0x3   : > { %p29_p1 = scmp.ge.s32.totalorder %s28_s21, 2  ;;  %p263_p2 = scmp.lt.s32.totalorder %s833_s20, 3 }
   0x5   : > { %s987_s21 = smov (%p29_p1, %s28_s21), 0  ;;  %p264_p3 = pnand %p750_p0, %p263_p2 }
   0x6   : > { %p329_p4 = scmp.lt.s32.totalorder (!%p264_p3), %s825_s18, 1 }
   0x7   : > { %267 = sbr.rel (%p264_p3) target bundleno = 42 (0x2a), region = 36 }
   0xc   : > { %s989_s18 = smov (!%p329_p4, %s825_s18), 1  ;;  %v379_v0 = vld [vmem:[%s980_s2] sm:$0xff]  ;;  %v757_v2 = vld [vmem:[%s980_s2 + $0x8] sm:$0xff]  ;;  %v761_v4 = vld [vmem:[%s980_s2 + $0x10] sm:$0xff]  ;;  %vm551_vm0 = vcmask 392192  }
   0xd   : > { %v380_v1 = vld [vmem:[%s981_s3] sm:$0xff]  ;;  %v758_v3 = vld [vmem:[%s981_s3 + $0x8] sm:$0xff]  ;;  %s895_s30 = sshll.u32 %s989_s18, 3  ;;  %v762_v5 = vld [vmem:[%s981_s3 + $0x10] sm:$0xff] }
   0xe   : > { %v765_v6 = vld [vmem:[%s980_s2 + $0x18] sm:$0xff]  ;;  %s910_s14 = scalar_lea.vmem %s978_s0, %s895_s30  ;;  %s916_s17 = scalar_lea.vmem %s979_s1, %s895_s30  ;;  %v769_v8 = vld [vmem:[%s980_s2 + $0x20] sm:$0xff]  ;;  %v773_v13 = vld [vmem:[%s980_s2 + $0x28] sm:$0xff] }
   0xf   : > { %v766_v7 = vld [vmem:[%s981_s3 + $0x18] sm:$0xff]  ;;  %v770_v9 = vld [vmem:[%s981_s3 + $0x20] sm:$0xff]  ;;  %v774_v14 = vld [vmem:[%s981_s3 + $0x28] sm:$0xff]  ;;  %s376_s23 = scalar_lea.vmem %s983_s5, %s895_s30 }
  0x10   : > { %v755_v10 = vld [vmem:[%s910_s14] ss:$0 sm:$0xff]  ;;  %v759_v12 = vld [vmem:[%s910_s14 + $0x1] ss:$0 sm:$0xff]  ;;  %v763_v19 = vld [vmem:[%s910_s14 + $0x2] ss:$0 sm:$0xff] }
  0x11   : > { %v756_v11 = vld [vmem:[%s916_s17] ss:$0 sm:$0xff]  ;;  %v385_v15 = vmul.f32 %v755_v10, %v379_v0  ;;  %v760_v17 = vld [vmem:[%s916_s17 + $0x1] ss:$0 sm:$0xff]  ;;  %v407_v18 = vmul.f32 %v759_v12, %v757_v2  ;;  %v764_v20 = vld [vmem:[%s916_s17 + $0x2] ss:$0 sm:$0xff]  ;;  %v429_v24 = vmul.f32 %v763_v19, %v761_v4  ;;  %v393_v31 = vmul.f32 %v755_v10, %v380_v1 }
  0x12   : > { %v390_v16 = vmul.f32 %v756_v11, %v380_v1  ;;  %v777_v21 = vld [vmem:[%s980_s2 + $0x30] sm:$0xff]  ;;  %v412_v23 = vmul.f32 %v760_v17, %v758_v3  ;;  %v434_v25 = vmul.f32 %v764_v20, %v762_v5  ;;  %v767_v26 = vld [vmem:[%s910_s14 + $0x3] ss:$0 sm:$0xff]  ;;  %v771_v28 = vld [vmem:[%s910_s14 + $0x4] ss:$0 sm:$0xff]  ;;  %v394_v45 = vmul.f32 %v756_v11, %v379_v0 }
  0x13   : > { %v778_v22 = vld [vmem:[%s981_s3 + $0x30] sm:$0xff]  ;;  %v768_v27 = vld [vmem:[%s916_s17 + $0x3] ss:$0 sm:$0xff]  ;;  %v781_v29 = vld [vmem:[%s980_s2 + $0x38] sm:$0xff]  ;;  %v451_v33 = vmul.f32 %v767_v26, %v765_v6  ;;  %v473_v36 = vmul.f32 %v771_v28, %v769_v8  ;;  %v415_v56 = vmul.f32 %v759_v12, %v758_v3  ;;  %v416_v59 = vmul.f32 %v760_v17, %v757_v2 }
  0x14   : > { %v782_v30 = vld [vmem:[%s981_s3 + $0x38] sm:$0xff]  ;;  %v391_v32 = vsub.f32 %v385_v15, %v390_v16  ;;  %v456_v34 = vmul.f32 %v768_v27, %v766_v7  ;;  %v772_v35 = vld [vmem:[%s916_s17 + $0x4] ss:$0 sm:$0xff]  ;;  %v775_v37 = vld [vmem:[%s910_s14 + $0x5] ss:$0 sm:$0xff]  ;;  %v413_v39 = vsub.f32 %v407_v18, %v412_v23  ;;  %v435_v40 = vsub.f32 %v429_v24, %v434_v25 }
  0x15   : > { %v776_v38 = vld [vmem:[%s916_s17 + $0x5] ss:$0 sm:$0xff]  ;;  %v478_v41 = vmul.f32 %v772_v35, %v770_v9  ;;  %v779_v42 = vld [vmem:[%s910_s14 + $0x6] ss:$0 sm:$0xff]  ;;  %v783_v44 = vld [vmem:[%s910_s14 + $0x7] ss:$0 sm:$0xff]  ;;  %v495_v46 = vmul.f32 %v775_v37, %v773_v13  ;;  %v395_v58 = vadd.f32 %v394_v45, %v393_v31  ;;  %v437_v60 = vmul.f32 %v763_v19, %v762_v5 }
  0x16   : > { %v780_v43 = vld [vmem:[%s916_s17 + $0x6] ss:$0 sm:$0xff]  ;;  %v500_v47 = vmul.f32 %v776_v38, %v774_v14  ;;  %v784_v48 = vld [vmem:[%s916_s17 + $0x7] ss:$0 sm:$0xff]  ;;  %v414_v49 = vadd.f32 %v413_v39, %v391_v32  ;;  %v457_v50 = vsub.f32 %v451_v33, %v456_v34  ;;  %v517_v51 = vmul.f32 %v779_v42, %v777_v21  ;;  %s366_s17 = scalar_lea.vmem %s982_s4, %s895_s30 }
  0x17   : > { %v522_v52 = vmul.f32 %v780_v43, %v778_v22  ;;  %v479_v53 = vsub.f32 %v473_v36, %v478_v41  ;;  %v539_v54 = vmul.f32 %v783_v44, %v781_v29  ;;  %v544_v55 = vmul.f32 %v784_v48, %v782_v30 }
  0x18   : > { %v436_v57 = vadd.f32 %v435_v40, %v414_v49  ;;  %v501_v61 = vsub.f32 %v495_v46, %v500_v47  ;;  %v438_v62 = vmul.f32 %v764_v20, %v761_v4  ;;  %v459_v63 = vmul.f32 %v767_v26, %v766_v7 }
  0x19   : > { %v460_v1 = vmul.f32 %v768_v27, %v765_v6  ;;  %v417_v10 = vadd.f32 %v416_v59, %v415_v56  ;;  %v481_v11 = vmul.f32 %v771_v28, %v770_v9  ;;  %v482_v15 = vmul.f32 %v772_v35, %v769_v8 }
  0x1a   : > { %v458_v0 = vadd.f32 %v457_v50, %v436_v57  ;;  %v439_v16 = vadd.f32 %v438_v62, %v437_v60  ;;  %v503_v18 = vmul.f32 %v775_v37, %v774_v14  ;;  %v504_v23 = vmul.f32 %v776_v38, %v773_v13 }
  0x1b   : > { %v523_v25 = vsub.f32 %v517_v51, %v522_v52  ;;  %v418_v32 = vadd.f32 %v417_v10, %v395_v58  ;;  %v461_v3 = vadd.f32 %v460_v1, %v459_v63  ;;  %v545_v12 = vsub.f32 %v539_v54, %v544_v55 }
  0x1c   : > { %v480_v24 = vadd.f32 %v479_v53, %v458_v0  ;;  %v525_v31 = vmul.f32 %v779_v42, %v778_v22  ;;  %v483_v17 = vadd.f32 %v482_v15, %v481_v11  ;;  %v526_v4 = vmul.f32 %v780_v43, %v777_v21 }
  0x1d   : > { %v440_v5 = vadd.f32 %v439_v16, %v418_v32  ;;  %v505_v6 = vadd.f32 %v504_v23, %v503_v18  ;;  %v547_v9 = vmul.f32 %v783_v44, %v782_v30  ;;  %v548_v8 = vmul.f32 %v784_v48, %v781_v29 }
  0x1e   : > { %v502_v2 = vadd.f32 %v501_v61, %v480_v24  ;;  %v527_v20 = vadd.f32 %v526_v4, %v525_v31 }
  0x1f   : > { %v462_v19 = vadd.f32 %v461_v3, %v440_v5  ;;  %v549_v26 = vadd.f32 %v548_v8, %v547_v9 }
  0x20   : > { %v524_v7 = vadd.f32 %v523_v25, %v502_v2 }
  0x21   : > { %v484_v14 = vadd.f32 %v483_v17, %v462_v19 }
  0x22   : > { %v546_v13 = vadd.f32 %v545_v12, %v524_v7 }
  0x23   : > { %v506_v22 = vadd.f32 %v505_v6, %v484_v14 }
  0x24   : > { %552 = vst.msk [vmem:[%s366_s17] sm:$0xff] %vm551_vm0, %v546_v13 }
  0x25   : > { %v528_v27 = vadd.f32 %v527_v20, %v506_v22 }
  0x27   : > { %v550_v21 = vadd.f32 %v549_v26, %v528_v27 }
  0x29   : > { %553 = vst.msk [vmem:[%s376_s23] sm:$0xff] %vm551_vm0, %v550_v21 }
  0x2a PF: > { %s16_s20 = sadd.s32 1, %s833_s20   ;;  %s984_s18 = smov %s829_s19 }
  0x2b   : > { %p13_p5 = scmp.ge.s32.totalorder %s16_s20, 4   ;;  %s985_s19 = smov %s987_s21 }
  0x2d   :  { %15 = sbr.rel (!%p13_p5) target bundleno = 2 (0x2), region = 101 }

// kernel: reverse.4
= control target key start
LH: loop header
LB: loop body
LE: loop exit
PB: predicated region body
PF: predicated region fallthrough
CT: control target
= control target key end

     0   :  { %s584_s0 = inlined_call_operand.vmem [shape: f32[2,8,8,8,3], index: 0, kind: input, shape index: {}]   ;;  %s585_s1 = inlined_call_operand.vmem [shape: f32[2,8,8,8,3], index: 1, kind: output, shape index: {}]  }
   0x1   :  { %v192_v0 = vld [vmem:[%s584_s0 + $0x10] sm:$0xff]  ;;  %v195_v2 = vld [vmem:[%s584_s0 + $0x28] sm:$0xff]  ;;  %v199_v4 = vld [vmem:[%s584_s0 + $0x40] sm:$0xff] }
   0x2   :  { %v193_v1 = vld [vmem:[%s584_s0 + $0xd0] sm:$0xff]  ;;  %4 = vst [vmem:[%s585_s1] sm:$0xff] %v192_v0  ;;  %196 = vst [vmem:[%s585_s1 + $0x18] sm:$0xff] %v195_v2  ;;  %v197_v3 = vld [vmem:[%s584_s0 + $0xe8] sm:$0xff] }
   0x3   :  { %194 = vst [vmem:[%s585_s1 + $0xc0] sm:$0xff] %v193_v1  ;;  %v201_v5 = vld [vmem:[%s584_s0 + $0x100] sm:$0xff]  ;;  %198 = vst [vmem:[%s585_s1 + $0xd8] sm:$0xff] %v197_v3  ;;  %v203_v6 = vld [vmem:[%s584_s0 + $0x58] sm:$0xff] }
   0x4   :  { %200 = vst [vmem:[%s585_s1 + $0x30] sm:$0xff] %v199_v4  ;;  %202 = vst [vmem:[%s585_s1 + $0xf0] sm:$0xff] %v201_v5  ;;  %v205_v7 = vld [vmem:[%s584_s0 + $0x118] sm:$0xff]  ;;  %v207_v8 = vld [vmem:[%s584_s0 + $0x70] sm:$0xff] }
   0x5   :  { %204 = vst [vmem:[%s585_s1 + $0x48] sm:$0xff] %v203_v6  ;;  %206 = vst [vmem:[%s585_s1 + $0x108] sm:$0xff] %v205_v7  ;;  %v209_v9 = vld [vmem:[%s584_s0 + $0x130] sm:$0xff]  ;;  %v211_v10 = vld [vmem:[%s584_s0 + $0x88] sm:$0xff] }
   0x6   :  { %208 = vst [vmem:[%s585_s1 + $0x60] sm:$0xff] %v207_v8  ;;  %v213_v11 = vld [vmem:[%s584_s0 + $0x148] sm:$0xff]  ;;  %210 = vst [vmem:[%s585_s1 + $0x120] sm:$0xff] %v209_v9  ;;  %v215_v12 = vld [vmem:[%s584_s0 + $0xa0] sm:$0xff] }
   0x7   :  { %212 = vst [vmem:[%s585_s1 + $0x78] sm:$0xff] %v211_v10  ;;  %214 = vst [vmem:[%s585_s1 + $0x138] sm:$0xff] %v213_v11  ;;  %v217_v13 = vld [vmem:[%s584_s0 + $0x160] sm:$0xff]  ;;  %v219_v14 = vld [vmem:[%s584_s0 + $0xb8] sm:$0xff] }
   0x8   :  { %216 = vst [vmem:[%s585_s1 + $0x90] sm:$0xff] %v215_v12  ;;  %218 = vst [vmem:[%s585_s1 + $0x150] sm:$0xff] %v217_v13  ;;  %v221_v15 = vld [vmem:[%s584_s0 + $0x178] sm:$0xff]  ;;  %v223_v16 = vld [vmem:[%s584_s0 + $0x8] sm:$0xff] }
   0x9   :  { %220 = vst [vmem:[%s585_s1 + $0xa8] sm:$0xff] %v219_v14  ;;  %v225_v17 = vld [vmem:[%s584_s0 + $0xc8] sm:$0xff]  ;;  %222 = vst [vmem:[%s585_s1 + $0x168] sm:$0xff] %v221_v15  ;;  %v227_v18 = vld [vmem:[%s584_s0 + $0x20] sm:$0xff] }
   0xa   :  { %224 = vst [vmem:[%s585_s1 + $0x8] sm:$0xff] %v223_v16  ;;  %226 = vst [vmem:[%s585_s1 + $0xc8] sm:$0xff] %v225_v17  ;;  %v229_v19 = vld [vmem:[%s584_s0 + $0xe0] sm:$0xff]  ;;  %v231_v20 = vld [vmem:[%s584_s0 + $0x38] sm:$0xff] }
   0xb   :  { %228 = vst [vmem:[%s585_s1 + $0x20] sm:$0xff] %v227_v18  ;;  %230 = vst [vmem:[%s585_s1 + $0xe0] sm:$0xff] %v229_v19  ;;  %v233_v21 = vld [vmem:[%s584_s0 + $0xf8] sm:$0xff]  ;;  %v235_v22 = vld [vmem:[%s584_s0 + $0x50] sm:$0xff] }
   0xc   :  { %232 = vst [vmem:[%s585_s1 + $0x38] sm:$0xff] %v231_v20  ;;  %v237_v23 = vld [vmem:[%s584_s0 + $0x110] sm:$0xff]  ;;  %234 = vst [vmem:[%s585_s1 + $0xf8] sm:$0xff] %v233_v21  ;;  %v239_v24 = vld [vmem:[%s584_s0 + $0x68] sm:$0xff] }
   0xd   :  { %236 = vst [vmem:[%s585_s1 + $0x50] sm:$0xff] %v235_v22  ;;  %238 = vst [vmem:[%s585_s1 + $0x110] sm:$0xff] %v237_v23  ;;  %v241_v25 = vld [vmem:[%s584_s0 + $0x128] sm:$0xff]  ;;  %v243_v26 = vld [vmem:[%s584_s0 + $0x80] sm:$0xff] }
   0xe   :  { %240 = vst [vmem:[%s585_s1 + $0x68] sm:$0xff] %v239_v24  ;;  %242 = vst [vmem:[%s585_s1 + $0x128] sm:$0xff] %v241_v25  ;;  %v245_v27 = vld [vmem:[%s584_s0 + $0x140] sm:$0xff]  ;;  %v247_v28 = vld [vmem:[%s584_s0 + $0x98] sm:$0xff] }
   0xf   :  { %244 = vst [vmem:[%s585_s1 + $0x80] sm:$0xff] %v243_v26  ;;  %v249_v29 = vld [vmem:[%s584_s0 + $0x158] sm:$0xff]  ;;  %246 = vst [vmem:[%s585_s1 + $0x140] sm:$0xff] %v245_v27  ;;  %v251_v30 = vld [vmem:[%s584_s0 + $0xb0] sm:$0xff] }
  0x10   :  { %248 = vst [vmem:[%s585_s1 + $0x98] sm:$0xff] %v247_v28  ;;  %250 = vst [vmem:[%s585_s1 + $0x158] sm:$0xff] %v249_v29  ;;  %v253_v31 = vld [vmem:[%s584_s0 + $0x170] sm:$0xff]  ;;  %v129_v32 = vld [vmem:[%s584_s0] sm:$0xff] }
  0x11   :  { %252 = vst [vmem:[%s585_s1 + $0xb0] sm:$0xff] %v251_v30  ;;  %254 = vst [vmem:[%s585_s1 + $0x170] sm:$0xff] %v253_v31  ;;  %v256_v33 = vld [vmem:[%s584_s0 + $0xc0] sm:$0xff]  ;;  %v258_v34 = vld [vmem:[%s584_s0 + $0x18] sm:$0xff] }
  0x12   :  { %255 = vst [vmem:[%s585_s1 + $0x10] sm:$0xff] %v129_v32  ;;  %v260_v35 = vld [vmem:[%s584_s0 + $0xd8] sm:$0xff]  ;;  %257 = vst [vmem:[%s585_s1 + $0xd0] sm:$0xff] %v256_v33  ;;  %v262_v36 = vld [vmem:[%s584_s0 + $0x30] sm:$0xff] }
  0x13   :  { %259 = vst [vmem:[%s585_s1 + $0x28] sm:$0xff] %v258_v34  ;;  %261 = vst [vmem:[%s585_s1 + $0xe8] sm:$0xff] %v260_v35  ;;  %v264_v37 = vld [vmem:[%s584_s0 + $0xf0] sm:$0xff]  ;;  %v266_v38 = vld [vmem:[%s584_s0 + $0x48] sm:$0xff] }
  0x14   :  { %263 = vst [vmem:[%s585_s1 + $0x40] sm:$0xff] %v262_v36  ;;  %265 = vst [vmem:[%s585_s1 + $0x100] sm:$0xff] %v264_v37  ;;  %v268_v39 = vld [vmem:[%s584_s0 + $0x108] sm:$0xff]  ;;  %v270_v40 = vld [vmem:[%s584_s0 + $0x60] sm:$0xff] }
  0x15   :  { %267 = vst [vmem:[%s585_s1 + $0x58] sm:$0xff] %v266_v38  ;;  %v272_v41 = vld [vmem:[%s584_s0 + $0x120] sm:$0xff]  ;;  %269 = vst [vmem:[%s585_s1 + $0x118] sm:$0xff] %v268_v39  ;;  %v274_v42 = vld [vmem:[%s584_s0 + $0x78] sm:$0xff] }
  0x16   :  { %271 = vst [vmem:[%s585_s1 + $0x70] sm:$0xff] %v270_v40  ;;  %273 = vst [vmem:[%s585_s1 + $0x130] sm:$0xff] %v272_v41  ;;  %v276_v43 = vld [vmem:[%s584_s0 + $0x138] sm:$0xff]  ;;  %v278_v44 = vld [vmem:[%s584_s0 + $0x90] sm:$0xff] }
  0x17   :  { %275 = vst [vmem:[%s585_s1 + $0x88] sm:$0xff] %v274_v42  ;;  %277 = vst [vmem:[%s585_s1 + $0x148] sm:$0xff] %v276_v43  ;;  %v280_v45 = vld [vmem:[%s584_s0 + $0x150] sm:$0xff]  ;;  %v282_v46 = vld [vmem:[%s584_s0 + $0xa8] sm:$0xff] }
  0x18   :  { %279 = vst [vmem:[%s585_s1 + $0xa0] sm:$0xff] %v278_v44  ;;  %v284_v47 = vld [vmem:[%s584_s0 + $0x168] sm:$0xff]  ;;  %281 = vst [vmem:[%s585_s1 + $0x160] sm:$0xff] %v280_v45 }
  0x19   :  { %283 = vst [vmem:[%s585_s1 + $0xb8] sm:$0xff] %v282_v46  ;;  %285 = vst [vmem:[%s585_s1 + $0x178] sm:$0xff] %v284_v47 }

// kernel: tfno_forward.15
= control target key start
LH: loop header
LB: loop body
LE: loop exit
PB: predicated region body
PF: predicated region fallthrough
CT: control target
= control target key end

     0   :  { %s388_s9 = smov 0   ;;  %s390_s10 = smov 0   ;;  %s428_s0 = inlined_call_operand.vmem [shape: f32[2,8,512], index: 0, kind: input, shape index: {}]   ;;  %s429_s1 = inlined_call_operand.vmem [shape: f32[2,8,1], index: 1, kind: output, shape index: {0}]   ;;  %s430_s2 = inlined_call_operand.vmem [shape: f32[2,8,1], index: 2, kind: output, shape index: {1}]  }
   0x1   :  { %s392_s11 = smov 0  }
   0x2 LB: > { %s25_s12 = sadd.s32 1, %s366_s10  ;;  %p315_p0 = scmp.ge.s32.totalorder %s370_s11, 1  ;;  %s370_s11 = sphi %s392_s11, %s13_s11   ;;  %s366_s10 = sphi %s390_s10, %s432_s10   ;;  %s362_s9 = sphi %s388_s9, %s431_s9  }
   0x3   : > { %p27_p1 = scmp.ge.s32.totalorder %s25_s12, 2  ;;  %p134_p2 = scmp.lt.s32.totalorder %s370_s11, 3 }
   0x5   : > { %s434_s12 = smov (%p27_p1, %s25_s12), 0  ;;  %p135_p3 = pnand %p315_p0, %p134_p2 }
   0x6   : > { %p164_p4 = scmp.lt.s32.totalorder (!%p135_p3), %s362_s9, 1 }
   0x7   : > { %138 = sbr.rel (%p135_p3) target bundleno = 167 (0xa7), region = 24 }
   0xc   : > { %s436_s9 = smov (!%p164_p4, %s362_s9), 1  ;;  %vm185_vm0 = vcmask 7168   ;;  %v372_v3 = vmov 0.0  }
   0xd   : > { %s322_s13 = sshll.u32 %s436_s9, 5  ;;  %s318_s14 = sshll.u32 %s436_s9, 3 }
   0xe   : > { %s171_s17 = scalar_lea.vmem %s428_s0, %s322_s13  ;;  %s176_s20 = scalar_lea.vmem %s429_s1, %s318_s14 }
   0xf   : > { %v188_v0 = vld [vmem:[%s171_s17] sm:$0xff]  ;;  %v189_v1 = vld [vmem:[%s171_s17 + $0x8] sm:$0xff]  ;;  %v190_v2 = vld [vmem:[%s171_s17 + $0x10] sm:$0xff]  ;;  %186 = vst.msk [vmem:[%s176_s20] sm:$0xff] %vm185_vm0, %v372_v3  ;;  %s180_s23 = scalar_lea.vmem %s430_s2, %s318_s14 }
  0x10   : > { %v193_v4 = vadd.f32 %v189_v1, %v188_v0  ;;  %v202_v5 = vmul.f32 %v188_v0, %v188_v0  ;;  %v203_v6 = vmul.f32 %v189_v1, %v189_v1  ;;  %v204_v7 = vmul.f32 %v190_v2, %v190_v2  ;;  %v191_v8 = vld [vmem:[%s171_s17 + $0x18] sm:$0xff]  ;;  %187 = vst.msk [vmem:[%s180_s23] sm:$0xff] %vm185_vm0, %v372_v3 }
  0x11   : > { %v205_v10 = vmul.f32 %v191_v8, %v191_v8 }
  0x12   : > { %v194_v9 = vadd.f32 %v193_v4, %v190_v2  ;;  %v206_v11 = vadd.f32 %v203_v6, %v202_v5 }
  0x14   : > { %v195_v12 = vadd.f32 %v194_v9, %v191_v8  ;;  %v207_v13 = vadd.f32 %v206_v11, %v204_v7 }
  0x16   : > { %196 = vadd.xlane.f32.xlu0 %v195_v12  ;;  %v208_v14 = vadd.f32 %v207_v13, %v205_v10  ;;  %v192_v15 = vld [vmem:[%s176_s20] sm:$0xff] }
  0x17   : > { %v201_v18 = vld [vmem:[%s180_s23] sm:$0xff] }
  0x1a   : > { %209 = vadd.xlane.f32.xlu0 %v208_v14 }
  0x9f   : > { %v197_v16 = vpop.xlane.xlu0 %196 }
  0xa0   : > { %v198_v17 = vadd.f32 %v197_v16, %v192_v15 }
  0xa2   : > { %200 = vst.msk [vmem:[%s176_s20] sm:$0xff] %vm185_vm0, %v198_v17 }
  0xa3   : > { %v210_v19 = vpop.xlane.xlu0 %209 }
  0xa4   : > { %v211_v20 = vadd.f32 %v210_v19, %v201_v18 }
  0xa6   : > { %212 = vst.msk [vmem:[%s180_s23] sm:$0xff] %vm185_vm0, %v211_v20 }
  0xa7 PF: > { %s13_s11 = sadd.s32 1, %s370_s11   ;;  %s431_s9 = smov %s366_s10 }
  0xa8   : > { %p10_p5 = scmp.ge.s32.totalorder %s13_s11, 4   ;;  %s432_s10 = smov %s434_s12 }
  0xaa   :  { %12 = sbr.rel (!%p10_p5) target bundleno = 2 (0x2), region = 70 }

// kernel: tfno_forward.16
= control target key start
LH: loop header
LB: loop body
LE: loop exit
PB: predicated region body
PF: predicated region fallthrough
CT: control target
= control target key end

     0   :  { %s1215_s13 = smov 0   ;;  %s1217_s14 = smov 0   ;;  %s1305_s0 = inlined_call_operand.vmem [shape: f32[2,8,512], index: 0, kind: input, shape index: {}]   ;;  %s1306_s1 = inlined_call_operand.vmem [shape: bf16[2,8,512], index: 1, kind: input, shape index: {}]   ;;  %s1307_s2 = inlined_call_operand.vmem [shape: f32[2,8,1], index: 2, kind: input, shape index: {}]   ;;  %s1308_s3 = inlined_call_operand.vmem [shape: f32[2,8,1], index: 3, kind: input, shape index: {}]   ;;  %s1309_s4 = inlined_call_operand.vmem [shape: bf16[4,8], index: 4, kind: input, shape index: {}]   ;;  %s1310_s5 = inlined_call_operand.vmem [shape: f32[4,1], index: 5, kind: input, shape index: {}]   ;;  %s1311_s6 = inlined_call_operand.vmem [shape: bf16[8,4], index: 6, kind: input, shape index: {}]   ;;  %s1312_s7 = inlined_call_operand.vmem [shape: f32[8,1], index: 7, kind: input, shape index: {}]   ;;  %s1313_s8 = inlined_call_operand.vmem [shape: bf16[2,8,512], index: 8, kind: output, shape index: {0}]   ;;  %s1314_s9 = inlined_call_operand.vmem [shape: f32[2,8,1], index: 9, kind: output, shape index: {1}]   ;;  %s1315_s10 = inlined_call_operand.vmem [shape: f32[2,8,1], index: 10, kind: output, shape index: {2}]  }
   0x1   :  { %s1219_s15 = smov 0  }
   0x2 LB: > { %s33_s16 = sadd.s32 1, %s1152_s14  ;;  %p1062_p0 = scmp.ge.s32.totalorder %s1156_s15, 1  ;;  %s1156_s15 = sphi %s1219_s15, %s21_s15   ;;  %s1152_s14 = sphi %s1217_s14, %s1317_s14   ;;  %s1148_s13 = sphi %s1215_s13, %s1316_s13  }
   0x3   : > { %p35_p1 = scmp.ge.s32.totalorder %s33_s16, 2  ;;  %p373_p2 = scmp.lt.s32.totalorder %s1156_s15, 3 }
   0x5   : > { %s1319_s16 = smov (%p35_p1, %s33_s16), 0  ;;  %p374_p3 = pnand %p1062_p0, %p373_p2 }
   0x6   : > { %p445_p4 = scmp.lt.s32.totalorder (!%p374_p3), %s1148_s13, 1 }
   0x7   : > { %377 = sbr.rel (%p374_p3) target bundleno = 765 (0x2fd), region = 52 }
   0xc   : > { %v1158_v0 = vmov 0   ;;  %s1321_s13 = smov (!%p445_p4, %s1148_s13), 1  ;;  %v573_v3 = vld [vmem:[%s1310_s5] sm:$0xf]  ;;  %vm583_vm0 = vcmask 1043456   ;;  %vm579_vm1 = vcmask 64512  }
   0xd   : > { %1116 = vset.pattern.permute.xlu0 %v1158_v0  ;;  %628 = vmatprep.mubr.bf16.mxu0 %v1158_v0  ;;  %s1240_s17 = sshll.u32 %s1321_s13, 3  ;;  %v719_v4 = vld [vmem:[%s1312_s7] sm:$0xff]  ;;  %s1085_s28 = sshll.u32 %s1321_s13, 5  ;;  %vm729_vm2 = vcmask 1041408   ;;  %vm725_vm3 = vcmask 31744   ;;  %vm495_vm4 = vcmask 7168  }
   0xe   : > { %669 = vmatprep.mubr.bf16.mxu1 %v1158_v0  ;;  %1117 = vset.pattern.permute.xlu1 %v1158_v0  ;;  %s467_s20 = scalar_lea.vmem %s1307_s2, %s1240_s17  ;;  %s471_s23 = scalar_lea.vmem %s1308_s3, %s1240_s17 }
   0xf   : > { %v508_v1 = vld [vmem:[%s467_s20] sm:$0xff]  ;;  %576 = vperm.xlu1 %1117, %v573_v3   ;;  %s1086_s29 = sshll.u32 %s1321_s13, 4  ;;  %s452_s12 = scalar_lea.vmem %s1305_s0, %s1085_s28 }
  0x10   : > { %511 = vperm.xlu0 %1116, %v508_v1   ;;  %v518_v2 = vld [vmem:[%s471_s23] sm:$0xff]  ;;  %s462_s20 = scalar_lea.vmem %s1306_s1, %s1086_s29  ;;  %v499_v9 = vld [vmem:[%s452_s12 + $0x8] sm:$0xff]  ;;  %v500_v10 = vld [vmem:[%s452_s12 + $0x10] sm:$0xff]  ;;  %s1278_s27 = scalar_lea.vmem %s1314_s9, %s1240_s17 }
  0x11   : > { %v498_v5 = vld [vmem:[%s452_s12] sm:$0xff]  ;;  %v503_v7 = vld [vmem:[%s462_s20 + $0x8] sm:$0xff]  ;;  %v501_v11 = vld [vmem:[%s452_s12 + $0x18] sm:$0xff]  ;;  %s480_s11 = scalar_lea.vmem %s1313_s8, %s1086_s29  ;;  %s489_s12 = scalar_lea.vmem %s1315_s10, %s1240_s17 }
  0x12   : > { %v502_v6 = vld [vmem:[%s462_s20] sm:$0xff]  ;;  %v506_v14 = vunpack.c.l.bf16 %v503_v7  ;;  %v507_v15 = vunpack.c.h.bf16 %v503_v7 }
  0x13   : > { %722 = vperm.xlu1 %1117, %v719_v4   ;;  %v504_v12 = vunpack.c.l.bf16 %v502_v6  ;;  %v505_v13 = vunpack.c.h.bf16 %v502_v6 }
  0x14   : > { %521 = vperm.xlu0 %1116, %v518_v2  }
  0x8b   : > { %v512_v8 = vpop.permute.xlu0 %511 }
  0x8c   : > { %v514_v16 = vmul.f32 %v512_v8, %v498_v5  ;;  %v515_v17 = vmul.f32 %v512_v8, %v499_v9  ;;  %v516_v18 = vmul.f32 %v512_v8, %v500_v10  ;;  %v517_v19 = vmul.f32 %v512_v8, %v501_v11  ;;  %v568_v8 = vld [vmem:[%s1309_s4] sm:$0x3]  ;;  %v577_v9 = vpop.permute.xlu1 %576 }
  0x8f   : > { %v522_v20 = vpop.permute.xlu0 %521 }
  0x90   : > { %v524_v21 = vadd.f32 %v522_v20, %v514_v16  ;;  %v525_v22 = vadd.f32 %v522_v20, %v515_v17  ;;  %v526_v23 = vadd.f32 %v522_v20, %v516_v18  ;;  %v527_v24 = vadd.f32 %v522_v20, %v517_v19 }
  0x92   : > { %v528_v25 = vadd.f32 %v524_v21, %v504_v12  ;;  %v529_v26 = vadd.f32 %v525_v22, %v505_v13  ;;  %v530_v27 = vadd.f32 %v526_v23, %v506_v14  ;;  %v531_v28 = vadd.f32 %v527_v24, %v507_v15 }
  0x94   : > { %v537_v29 = vmul.f32 0.044715, %v529_v26  ;;  %v539_v30 = vmul.f32 0.044715, %v531_v28  ;;  %v536_v31 = vmul.f32 0.044715, %v528_v25 }
  0x95   : > { %v538_v32 = vmul.f32 0.044715, %v530_v27  ;;  %v533_v51 = vmul.f32 0.5, %v529_v26  ;;  %v535_v54 = vmul.f32 0.5, %v531_v28  ;;  %v532_v58 = vmul.f32 0.5, %v528_v25 }
  0x96   : > { %v541_v33 = vmul.f32 %v537_v29, %v529_v26  ;;  %v543_v34 = vmul.f32 %v539_v30, %v531_v28  ;;  %v540_v35 = vmul.f32 %v536_v31, %v528_v25  ;;  %v534_v61 = vmul.f32 0.5, %v530_v27 }
  0x97   : > { %v542_v36 = vmul.f32 %v538_v32, %v530_v27 }
  0x98   : > { %v545_v37 = vmul.f32 %v541_v33, %v529_v26  ;;  %v547_v38 = vmul.f32 %v543_v34, %v531_v28  ;;  %v544_v39 = vmul.f32 %v540_v35, %v528_v25 }
  0x99   : > { %v546_v40 = vmul.f32 %v542_v36, %v530_v27 }
  0x9a   : > { %v549_v41 = vadd.f32 %v545_v37, %v529_v26  ;;  %v551_v42 = vadd.f32 %v547_v38, %v531_v28  ;;  %v548_v43 = vadd.f32 %v544_v39, %v528_v25 }
  0x9b   : > { %v550_v44 = vadd.f32 %v546_v40, %v530_v27 }
  0x9c   : > { %v553_v45 = vmul.f32 0.7978846, %v549_v41  ;;  %v555_v46 = vmul.f32 0.7978846, %v551_v42  ;;  %v552_v47 = vmul.f32 0.7978846, %v548_v43 }
  0x9d   : > { %v554_v48 = vmul.f32 0.7978846, %v550_v44 }
  0x9e   : > { %1118 = vtanh.f32 %v553_v45 }
  0x9f   : > { %1120 = vtanh.f32 %v555_v46 }
  0xa0   : > { %1122 = vtanh.f32 %v552_v47 }
  0xa1   : > { %1124 = vtanh.f32 %v554_v48 }
  0xab   : > { %v1119_v49 = vpop.eup %1118 }
  0xac   : > { %v1121_v50 = vpop.eup %1120  ;;  %v561_v52 = vadd.f32 1.0, %v1119_v49 }
  0xad   : > { %v1123_v53 = vpop.eup %1122  ;;  %v563_v55 = vadd.f32 1.0, %v1121_v50 }
  0xae   : > { %v1125_v56 = vpop.eup %1124  ;;  %v565_v57 = vmul.f32 %v561_v52, %v533_v51  ;;  %v560_v59 = vadd.f32 1.0, %v1123_v53 }
  0xaf   : > { %v567_v60 = vmul.f32 %v563_v55, %v535_v54  ;;  %v562_v62 = vadd.f32 1.0, %v1125_v56 }
  0xb0   : > { %v570_v63 = vpack.c.bf16 %v565_v57, %v565_v57  ;;  %v564_v1 = vmul.f32 %v560_v59, %v532_v58 }
  0xb1   : > { %v572_v2 = vpack.c.bf16 %v567_v60, %v567_v60  ;;  %v566_v3 = vmul.f32 %v562_v62, %v534_v61 }
  0xb2   : > { %1073 = vmatprep.subr.msk.bf16.mxu0 %vm583_vm0, %v570_v63  ;;  %v569_v4 = vpack.c.bf16 %v564_v1, %v564_v1  ;;  %v714_v63 = vld [vmem:[%s1311_s6] sm:$0xf]  ;;  %v1159_v1 = vmov 0.0  }
  0xb3   : > { %1075 = vmatprep.subr.msk.bf16.mxu1 %vm583_vm0, %v572_v2  ;;  %v571_v5 = vpack.c.bf16 %v566_v3, %v566_v3  ;;  %496 = vst.msk [vmem:[%s1278_s27] sm:$0xff] %vm495_vm4, %v1159_v1  ;;  %v723_v2 = vpop.permute.xlu1 %722  ;;  %497 = vst.msk [vmem:[%s489_s12] sm:$0xff] %vm495_vm4, %v1159_v1 }
  0xb4   : > { %v585_v6 = vsel %vm583_vm0, %v569_v4, 0 }
  0xb5   : > { %611 = vmatpush1.bf16.msra.mxu0 %v585_v6  ;;  %v591_v7 = vsel %vm583_vm0, %v571_v5, 0 }
  0xb6   : > { %652 = vmatpush1.bf16.msra.mxu1 %v591_v7 }
  0xb8   : > { %1074 = vmatmul.mubr.msk.bf16.vlgmr.msra.gmra.mxu0 %vm579_vm1, %v568_v8 }
  0xb9   : > { %1076 = vmatmul.mubr.msk.bf16.vlgmr.msra.gmra.mxu1 %vm579_vm1, %v568_v8  ;;  %774 = vmatprep.mubr.bf16.mxu0 %v1158_v0 }
  0xba   : > { %815 = vmatprep.mubr.bf16.mxu1 %v1158_v0 }
 0x178   : > { %v630_v10 = vpop.f32.mrf.mxu0 }
 0x179   : > { %v631_v11 = vadd.f32 %v630_v10, %v577_v9  ;;  %v671_v12 = vpop.f32.mrf.mxu1 }
 0x17a   : > { %v672_v13 = vadd.f32 %v671_v12, %v577_v9  ;;  %v632_v14 = vpop.f32.mrf.mxu0 }
 0x17b   : > { %v682_v15 = vmul.f32 0.044715, %v631_v11  ;;  %v633_v16 = vadd.f32 %v632_v14, %v577_v9  ;;  %v673_v17 = vpop.f32.mrf.mxu1  ;;  %v678_v43 = vmul.f32 0.5, %v631_v11 }
 0x17c   : > { %v684_v18 = vmul.f32 0.044715, %v672_v13  ;;  %v674_v19 = vadd.f32 %v673_v17, %v577_v9  ;;  %v634_v20 = vpop.f32.mrf.mxu0  ;;  %v680_v46 = vmul.f32 0.5, %v672_v13 }
 0x17d   : > { %v686_v21 = vmul.f32 %v682_v15, %v631_v11  ;;  %v683_v22 = vmul.f32 0.044715, %v633_v16  ;;  %v675_v23 = vpop.f32.mrf.mxu1  ;;  %v679_v49 = vmul.f32 0.5, %v633_v16 }
 0x17e   : > { %v688_v24 = vmul.f32 %v684_v18, %v672_v13  ;;  %v685_v25 = vmul.f32 0.044715, %v674_v19  ;;  %v635_v26 = vpop.f32.mrf.mxu0  ;;  %v681_v52 = vmul.f32 0.5, %v674_v19 }
 0x17f   : > { %v690_v27 = vmul.f32 %v686_v21, %v631_v11  ;;  %v687_v0 = vmul.f32 %v683_v22, %v633_v16  ;;  %v676_v28 = vpop.f32.mrf.mxu1 }
 0x180   : > { %v692_v29 = vmul.f32 %v688_v24, %v672_v13  ;;  %v689_v30 = vmul.f32 %v685_v25, %v674_v19 }
 0x181   : > { %v691_v31 = vmul.f32 %v687_v0, %v633_v16  ;;  %v694_v32 = vadd.f32 %v690_v27, %v631_v11 }
 0x182   : > { %v693_v33 = vmul.f32 %v689_v30, %v674_v19  ;;  %v696_v34 = vadd.f32 %v692_v29, %v672_v13 }
 0x183   : > { %v695_v35 = vadd.f32 %v691_v31, %v633_v16  ;;  %v698_v36 = vmul.f32 0.7978846, %v694_v32 }
 0x184   : > { %v697_v37 = vadd.f32 %v693_v33, %v674_v19  ;;  %v700_v38 = vmul.f32 0.7978846, %v696_v34  ;;  %v846_v34 = vld [vmem:[%s1278_s27] sm:$0xff] }
 0x185   : > { %v699_v39 = vmul.f32 0.7978846, %v695_v35  ;;  %1126 = vtanh.f32 %v698_v36  ;;  %v855_v36 = vld [vmem:[%s489_s12] sm:$0xff] }
 0x186   : > { %v701_v40 = vmul.f32 0.7978846, %v697_v37  ;;  %1128 = vtanh.f32 %v700_v38 }
 0x187   : > { %1130 = vtanh.f32 %v699_v39 }
 0x188   : > { %1132 = vtanh.f32 %v701_v40 }
 0x192   : > { %v1127_v41 = vpop.eup %1126 }
 0x193   : > { %v1129_v42 = vpop.eup %1128  ;;  %v706_v44 = vadd.f32 1.0, %v1127_v41 }
 0x194   : > { %v1131_v45 = vpop.eup %1130  ;;  %v708_v47 = vadd.f32 1.0, %v1129_v42 }
 0x195   : > { %v1133_v48 = vpop.eup %1132  ;;  %v707_v50 = vadd.f32 1.0, %v1131_v45  ;;  %v710_v51 = vmul.f32 %v706_v44, %v678_v43 }
 0x196   : > { %v709_v53 = vadd.f32 1.0, %v1133_v48  ;;  %v712_v54 = vmul.f32 %v708_v47, %v680_v46 }
 0x197   : > { %v711_v55 = vmul.f32 %v707_v50, %v679_v49  ;;  %v715_v56 = vpack.c.bf16 %v710_v51, %v710_v51 }
 0x198   : > { %v713_v57 = vmul.f32 %v709_v53, %v681_v52  ;;  %v717_v58 = vpack.c.bf16 %v712_v54, %v712_v54 }
 0x199   : > { %v716_v59 = vpack.c.bf16 %v711_v55, %v711_v55  ;;  %v731_v61 = vsel %vm729_vm2, %v715_v56, 0 }
 0x19a   : > { %v718_v60 = vpack.c.bf16 %v713_v57, %v713_v57  ;;  %v737_v62 = vsel %vm729_vm2, %v717_v58, 0 }
 0x19b   : > { %1077 = vmatprep.subr.msk.bf16.mxu0 %vm729_vm2, %v716_v59 }
 0x19c   : > { %1079 = vmatprep.subr.msk.bf16.mxu1 %vm729_vm2, %v718_v60  ;;  %757 = vmatpush1.bf16.msra.mxu0 %v731_v61 }
 0x19d   : > { %798 = vmatpush1.bf16.msra.mxu1 %v737_v62 }
 0x19f   : > { %1078 = vmatmul.mubr.msk.bf16.vlgmr.msra.gmra.mxu0 %vm725_vm3, %v714_v63 }
 0x1a0   : > { %1080 = vmatmul.mubr.msk.bf16.vlgmr.msra.gmra.mxu1 %vm725_vm3, %v714_v63 }
 0x25f   : > { %v776_v3 = vpop.f32.mrf.mxu0 }
 0x260   : > { %v777_v4 = vadd.f32 %v776_v3, %v723_v2  ;;  %v817_v5 = vpop.f32.mrf.mxu1 }
 0x261   : > { %v818_v6 = vadd.f32 %v817_v5, %v723_v2  ;;  %v778_v7 = vpop.f32.mrf.mxu0 }
 0x262   : > { %v824_v8 = vpack.c.bf16 %v777_v4, %v777_v4  ;;  %v779_v9 = vadd.f32 %v778_v7, %v723_v2  ;;  %v819_v10 = vpop.f32.mrf.mxu1 }
 0x263   : > { %v826_v11 = vpack.c.bf16 %v818_v6, %v818_v6  ;;  %v820_v12 = vadd.f32 %v819_v10, %v723_v2  ;;  %v780_v13 = vpop.f32.mrf.mxu0 }
 0x264   : > { %v842_v14 = vunpack.c.l.bf16 %v824_v8  ;;  %v825_v15 = vpack.c.bf16 %v779_v9, %v779_v9  ;;  %v1088_v16 = vpack.c.bf16 %v779_v9, %v777_v4  ;;  %v821_v17 = vpop.f32.mrf.mxu1 }
 0x265   : > { %v827_v18 = vpack.c.bf16 %v820_v12, %v820_v12  ;;  %v1089_v19 = vpack.c.bf16 %v820_v12, %v818_v6  ;;  %v781_v20 = vpop.f32.mrf.mxu0  ;;  %v844_v21 = vunpack.c.l.bf16 %v826_v11 }
 0x266   : > { %840 = vst [vmem:[%s480_s11] sm:$0xff] %v1088_v16  ;;  %v843_v22 = vunpack.c.l.bf16 %v825_v15  ;;  %v822_v23 = vpop.f32.mrf.mxu1  ;;  %v856_v24 = vmul.f32 %v842_v14, %v842_v14 }
 0x267   : > { %841 = vst [vmem:[%s480_s11 + $0x8] sm:$0xff] %v1089_v19  ;;  %v845_v27 = vunpack.c.l.bf16 %v827_v18  ;;  %v858_v0 = vmul.f32 %v844_v21, %v844_v21 }
 0x268   : > { %v847_v25 = vadd.f32 %v843_v22, %v842_v14  ;;  %v857_v26 = vmul.f32 %v843_v22, %v843_v22 }
 0x269   : > { %v859_v31 = vmul.f32 %v845_v27, %v845_v27 }
 0x26a   : > { %v848_v28 = vadd.f32 %v847_v25, %v844_v21  ;;  %v860_v29 = vadd.f32 %v857_v26, %v856_v24 }
 0x26c   : > { %v849_v30 = vadd.f32 %v848_v28, %v845_v27  ;;  %v861_v32 = vadd.f32 %v860_v29, %v858_v0 }
 0x26e   : > { %850 = vadd.xlane.f32.xlu0 %v849_v30  ;;  %v862_v33 = vadd.f32 %v861_v32, %v859_v31 }
 0x270   : > { %863 = vadd.xlane.f32.xlu1 %v862_v33 }
 0x2f7   : > { %v851_v35 = vpop.xlane.xlu0 %850 }
 0x2f8   : > { %v852_v37 = vadd.f32 %v851_v35, %v846_v34 }
 0x2f9   : > { %v864_v38 = vpop.xlane.xlu1 %863 }
 0x2fa   : > { %854 = vst.msk [vmem:[%s1278_s27] sm:$0xff] %vm495_vm4, %v852_v37  ;;  %v865_v39 = vadd.f32 %v864_v38, %v855_v36 }
 0x2fc   : > { %866 = vst.msk [vmem:[%s489_s12] sm:$0xff] %vm495_vm4, %v865_v39 }
 0x2fd PF: > { %s21_s15 = sadd.s32 1, %s1156_s15   ;;  %s1316_s13 = smov %s1152_s14 }
 0x2fe   : > { %p18_p5 = scmp.ge.s32.totalorder %s21_s15, 4   ;;  %s1317_s14 = smov %s1319_s16 }
 0x300   :  { %20 = sbr.rel (!%p18_p5) target bundleno = 2 (0x2), region = 119 }

// kernel: tfno_forward.17
= control target key start
LH: loop header
LB: loop body
LE: loop exit
PB: predicated region body
PF: predicated region fallthrough
CT: control target
= control target key end

     0   :  { %s632_s15 = smov 0   ;;  %s634_s16 = smov 0   ;;  %s679_s0 = inlined_call_operand.vmem [shape: bf16[2,8,512], index: 0, kind: input, shape index: {}]   ;;  %s680_s1 = inlined_call_operand.vmem [shape: f32[2,8,1], index: 1, kind: input, shape index: {}]   ;;  %s681_s2 = inlined_call_operand.vmem [shape: f32[2,8,1], index: 2, kind: input, shape index: {}]   ;;  %s682_s3 = inlined_call_operand.vmem [shape: bf16[2,8,512], index: 3, kind: input, shape index: {}]   ;;  %s683_s4 = inlined_call_operand.vmem [shape: bf16[2,8,512], index: 4, kind: output, shape index: {}]  }
   0x1   :  { %s636_s17 = smov 0  }
   0x2 LB: > { %s26_s18 = sadd.s32 1, %s600_s16  ;;  %p530_p0 = scmp.ge.s32.totalorder %s604_s17, 1  ;;  %s604_s17 = sphi %s636_s17, %s14_s17   ;;  %s600_s16 = sphi %s634_s16, %s685_s16   ;;  %s596_s15 = sphi %s632_s15, %s684_s15  }
   0x3   : > { %p28_p1 = scmp.ge.s32.totalorder %s26_s18, 2  ;;  %p218_p2 = scmp.lt.s32.totalorder %s604_s17, 3 }
   0x5   : > { %s687_s18 = smov (%p28_p1, %s26_s18), 0  ;;  %p219_p3 = pnand %p530_p0, %p218_p2 }
   0x6   : > { %p270_p4 = scmp.lt.s32.totalorder (!%p219_p3), %s596_s15, 1 }
   0x7   : > { %222 = sbr.rel (%p219_p3) target bundleno = 151 (0x97), region = 36 }
   0xc   : > { %v606_v0 = vmov 0   ;;  %s689_s15 = smov (!%p270_p4, %s596_s15), 1 }
   0xd   : > { %573 = vset.pattern.permute.xlu0 %v606_v0  ;;  %s533_s19 = sshll.u32 %s689_s15, 3  ;;  %s656_s26 = sshll.u32 %s689_s15, 4 }
   0xe   : > { %s282_s22 = scalar_lea.vmem %s680_s1, %s533_s19  ;;  %s286_s25 = scalar_lea.vmem %s681_s2, %s533_s19 }
   0xf   : > { %v355_v1 = vld [vmem:[%s282_s22] sm:$0xff]  ;;  %s295_s29 = scalar_lea.vmem %s682_s3, %s656_s26  ;;  %s277_s6 = scalar_lea.vmem %s679_s0, %s656_s26 }
  0x10   : > { %358 = vperm.xlu0 %573, %v355_v1   ;;  %v365_v2 = vld [vmem:[%s286_s25] sm:$0xff]  ;;  %v314_v4 = vld [vmem:[%s295_s29 + $0x8] sm:$0xff]  ;;  %s305_s9 = scalar_lea.vmem %s683_s4, %s656_s26 }
  0x11   : > { %v313_v3 = vld [vmem:[%s295_s29] sm:$0xff]  ;;  %v317_v7 = vunpack.c.l.bf16 %v314_v4  ;;  %v318_v8 = vunpack.c.h.bf16 %v314_v4  ;;  %v308_v34 = vld [vmem:[%s277_s6 + $0x8] sm:$0xff] }
  0x12   : > { %v315_v5 = vunpack.c.l.bf16 %v313_v3  ;;  %v316_v6 = vunpack.c.h.bf16 %v313_v3  ;;  %v307_v33 = vld [vmem:[%s277_s6] sm:$0xff]  ;;  %v311_v45 = vunpack.c.l.bf16 %v308_v34  ;;  %v312_v46 = vunpack.c.h.bf16 %v308_v34 }
  0x13   : > { %v325_v11 = vmul.f32 0.044715, %v317_v7  ;;  %v326_v12 = vmul.f32 0.044715, %v318_v8  ;;  %v321_v37 = vmul.f32 0.5, %v317_v7  ;;  %v322_v38 = vmul.f32 0.5, %v318_v8 }
  0x14   : > { %368 = vperm.xlu0 %573, %v365_v2   ;;  %v323_v9 = vmul.f32 0.044715, %v315_v5  ;;  %v324_v10 = vmul.f32 0.044715, %v316_v6  ;;  %v319_v35 = vmul.f32 0.5, %v315_v5  ;;  %v320_v36 = vmul.f32 0.5, %v316_v6 }
  0x15   : > { %v329_v15 = vmul.f32 %v325_v11, %v317_v7  ;;  %v330_v16 = vmul.f32 %v326_v12, %v318_v8  ;;  %v309_v43 = vunpack.c.l.bf16 %v307_v33  ;;  %v310_v44 = vunpack.c.h.bf16 %v307_v33 }
  0x16   : > { %v327_v13 = vmul.f32 %v323_v9, %v315_v5  ;;  %v328_v14 = vmul.f32 %v324_v10, %v316_v6 }
  0x17   : > { %v333_v19 = vmul.f32 %v329_v15, %v317_v7  ;;  %v334_v20 = vmul.f32 %v330_v16, %v318_v8 }
  0x18   : > { %v331_v17 = vmul.f32 %v327_v13, %v315_v5  ;;  %v332_v18 = vmul.f32 %v328_v14, %v316_v6 }
  0x19   : > { %v337_v23 = vadd.f32 %v333_v19, %v317_v7  ;;  %v338_v24 = vadd.f32 %v334_v20, %v318_v8 }
  0x1a   : > { %v335_v21 = vadd.f32 %v331_v17, %v315_v5  ;;  %v336_v22 = vadd.f32 %v332_v18, %v316_v6 }
  0x1b   : > { %v341_v27 = vmul.f32 0.7978846, %v337_v23  ;;  %v342_v28 = vmul.f32 0.7978846, %v338_v24 }
  0x1c   : > { %v339_v25 = vmul.f32 0.7978846, %v335_v21  ;;  %v340_v26 = vmul.f32 0.7978846, %v336_v22 }
  0x1e   : > { %574 = vtanh.f32 %v339_v25 }
  0x1f   : > { %576 = vtanh.f32 %v340_v26 }
  0x20   : > { %578 = vtanh.f32 %v341_v27 }
  0x21   : > { %580 = vtanh.f32 %v342_v28 }
  0x2b   : > { %v575_v29 = vpop.eup %574 }
  0x2c   : > { %v577_v30 = vpop.eup %576  ;;  %v347_v39 = vadd.f32 1.0, %v575_v29 }
  0x2d   : > { %v579_v31 = vpop.eup %578  ;;  %v348_v40 = vadd.f32 1.0, %v577_v30 }
  0x2e   : > { %v581_v32 = vpop.eup %580  ;;  %v349_v41 = vadd.f32 1.0, %v579_v31  ;;  %v351_v48 = vmul.f32 %v347_v39, %v319_v35 }
  0x2f   : > { %v350_v42 = vadd.f32 1.0, %v581_v32  ;;  %v352_v49 = vmul.f32 %v348_v40, %v320_v36 }
  0x30   : > { %v353_v50 = vmul.f32 %v349_v41, %v321_v37 }
  0x31   : > { %v354_v51 = vmul.f32 %v350_v42, %v322_v38 }
  0x8b   : > { %v359_v47 = vpop.permute.xlu0 %358 }
  0x8c   : > { %v361_v52 = vmul.f32 %v359_v47, %v309_v43  ;;  %v362_v53 = vmul.f32 %v359_v47, %v310_v44  ;;  %v363_v54 = vmul.f32 %v359_v47, %v311_v45  ;;  %v364_v55 = vmul.f32 %v359_v47, %v312_v46 }
  0x8f   : > { %v369_v56 = vpop.permute.xlu0 %368 }
  0x90   : > { %v371_v57 = vadd.f32 %v369_v56, %v361_v52  ;;  %v372_v58 = vadd.f32 %v369_v56, %v362_v53  ;;  %v373_v59 = vadd.f32 %v369_v56, %v363_v54  ;;  %v374_v60 = vadd.f32 %v369_v56, %v364_v55 }
  0x92   : > { %v375_v61 = vadd.f32 %v371_v57, %v351_v48  ;;  %v376_v62 = vadd.f32 %v372_v58, %v352_v49  ;;  %v377_v63 = vadd.f32 %v373_v59, %v353_v50  ;;  %v378_v0 = vadd.f32 %v374_v60, %v354_v51 }
  0x94   : > { %v546_v1 = vpack.c.bf16 %v376_v62, %v375_v61  ;;  %v547_v2 = vpack.c.bf16 %v378_v0, %v377_v63 }
  0x96   : > { %395 = vst [vmem:[%s305_s9] sm:$0xff] %v546_v1  ;;  %396 = vst [vmem:[%s305_s9 + $0x8] sm:$0xff] %v547_v2 }
  0x97 PF: > { %s14_s17 = sadd.s32 1, %s604_s17   ;;  %s684_s15 = smov %s600_s16 }
  0x98   : > { %p11_p5 = scmp.ge.s32.totalorder %s14_s17, 4   ;;  %s685_s16 = smov %s687_s18 }
  0x9a   :  { %13 = sbr.rel (!%p11_p5) target bundleno = 2 (0x2), region = 75 }

// kernel: tfno_forward.22
= control target key start
LH: loop header
LB: loop body
LE: loop exit
PB: predicated region body
PF: predicated region fallthrough
CT: control target
= control target key end

     0   :  { %s390_s9 = smov 0   ;;  %s392_s10 = smov 0   ;;  %s430_s0 = inlined_call_operand.vmem [shape: bf16[2,8,512], index: 0, kind: input, shape index: {}]   ;;  %s431_s1 = inlined_call_operand.vmem [shape: f32[2,8,1], index: 1, kind: output, shape index: {0}]   ;;  %s432_s2 = inlined_call_operand.vmem [shape: f32[2,8,1], index: 2, kind: output, shape index: {1}]  }
   0x1   :  { %s394_s11 = smov 0  }
   0x2 LB: > { %s25_s12 = sadd.s32 1, %s368_s10  ;;  %p317_p0 = scmp.ge.s32.totalorder %s372_s11, 1  ;;  %s372_s11 = sphi %s394_s11, %s13_s11   ;;  %s368_s10 = sphi %s392_s10, %s434_s10   ;;  %s364_s9 = sphi %s390_s9, %s433_s9  }
   0x3   : > { %p27_p1 = scmp.ge.s32.totalorder %s25_s12, 2  ;;  %p134_p2 = scmp.lt.s32.totalorder %s372_s11, 3 }
   0x5   : > { %s436_s12 = smov (%p27_p1, %s25_s12), 0  ;;  %p135_p3 = pnand %p317_p0, %p134_p2 }
   0x6   : > { %p164_p4 = scmp.lt.s32.totalorder (!%p135_p3), %s364_s9, 1 }
   0x7   : > { %138 = sbr.rel (%p135_p3) target bundleno = 169 (0xa9), region = 24 }
   0xc   : > { %s438_s9 = smov (!%p164_p4, %s364_s9), 1  ;;  %vm185_vm0 = vcmask 7168   ;;  %v374_v2 = vmov 0.0  }
   0xd   : > { %s324_s13 = sshll.u32 %s438_s9, 4  ;;  %s320_s14 = sshll.u32 %s438_s9, 3 }
   0xe   : > { %s171_s17 = scalar_lea.vmem %s430_s0, %s324_s13  ;;  %s176_s20 = scalar_lea.vmem %s431_s1, %s320_s14 }
   0xf   : > { %v188_v0 = vld [vmem:[%s171_s17] sm:$0xff]  ;;  %v189_v1 = vld [vmem:[%s171_s17 + $0x8] sm:$0xff]  ;;  %186 = vst.msk [vmem:[%s176_s20] sm:$0xff] %vm185_vm0, %v374_v2  ;;  %s180_s23 = scalar_lea.vmem %s432_s2, %s320_s14 }
  0x10   : > { %v190_v3 = vunpack.c.l.bf16 %v188_v0  ;;  %v191_v4 = vunpack.c.h.bf16 %v188_v0  ;;  %v192_v5 = vunpack.c.l.bf16 %v189_v1  ;;  %v193_v6 = vunpack.c.h.bf16 %v189_v1  ;;  %187 = vst.msk [vmem:[%s180_s23] sm:$0xff] %vm185_vm0, %v374_v2 }
  0x12   : > { %v195_v7 = vadd.f32 %v191_v4, %v190_v3  ;;  %v204_v8 = vmul.f32 %v190_v3, %v190_v3  ;;  %v205_v9 = vmul.f32 %v191_v4, %v191_v4  ;;  %v206_v10 = vmul.f32 %v192_v5, %v192_v5 }
  0x13   : > { %v207_v12 = vmul.f32 %v193_v6, %v193_v6 }
  0x14   : > { %v196_v11 = vadd.f32 %v195_v7, %v192_v5  ;;  %v208_v13 = vadd.f32 %v205_v9, %v204_v8 }
  0x16   : > { %v197_v14 = vadd.f32 %v196_v11, %v193_v6  ;;  %v209_v15 = vadd.f32 %v208_v13, %v206_v10  ;;  %v194_v17 = vld [vmem:[%s176_s20] sm:$0xff] }
  0x17   : > { %v203_v20 = vld [vmem:[%s180_s23] sm:$0xff] }
  0x18   : > { %198 = vadd.xlane.f32.xlu0 %v197_v14  ;;  %v210_v16 = vadd.f32 %v209_v15, %v207_v12 }
  0x1c   : > { %211 = vadd.xlane.f32.xlu0 %v210_v16 }
  0xa1   : > { %v199_v18 = vpop.xlane.xlu0 %198 }
  0xa2   : > { %v200_v19 = vadd.f32 %v199_v18, %v194_v17 }
  0xa4   : > { %202 = vst.msk [vmem:[%s176_s20] sm:$0xff] %vm185_vm0, %v200_v19 }
  0xa5   : > { %v212_v21 = vpop.xlane.xlu0 %211 }
  0xa6   : > { %v213_v22 = vadd.f32 %v212_v21, %v203_v20 }
  0xa8   : > { %214 = vst.msk [vmem:[%s180_s23] sm:$0xff] %vm185_vm0, %v213_v22 }
  0xa9 PF: > { %s13_s11 = sadd.s32 1, %s372_s11   ;;  %s433_s9 = smov %s368_s10 }
  0xaa   : > { %p10_p5 = scmp.ge.s32.totalorder %s13_s11, 4   ;;  %s434_s10 = smov %s436_s12 }
  0xac   :  { %12 = sbr.rel (!%p10_p5) target bundleno = 2 (0x2), region = 70 }

// kernel: tfno_forward.23
= control target key start
LH: loop header
LB: loop body
LE: loop exit
PB: predicated region body
PF: predicated region fallthrough
CT: control target
= control target key end

     0   :  { %s911_s18 = smov 0   ;;  %s913_s19 = smov 0   ;;  %s1023_s0 = inlined_call_operand.vmem [shape: bf16[2,8,512], index: 0, kind: input, shape index: {}]   ;;  %s1024_s1 = inlined_call_operand.vmem [shape: f32[2,2,8,1], index: 1, kind: input, shape index: {}]   ;;  %s1025_s2 = inlined_call_operand.vmem [shape: f32[2,2,8,1], index: 2, kind: input, shape index: {}]   ;;  %s1026_s3 = inlined_call_operand.vmem [shape: bf16[2,2,8], index: 3, kind: input, shape index: {}]   ;;  %s1027_s4 = inlined_call_operand.vmem [shape: f32[2,1], index: 4, kind: input, shape index: {}]   ;;  %s1028_s5 = inlined_call_operand.vmem [shape: f32[2,2,512], index: 5, kind: output, shape index: {}]  }
   0x1   :  { %s915_s20 = smov 0  }
   0x2 LB: > { %s27_s21 = sadd.s32 1, %s873_s19  ;;  %p785_p0 = scmp.ge.s32.totalorder %s877_s20, 1  ;;  %s877_s20 = sphi %s915_s20, %s15_s20   ;;  %s873_s19 = sphi %s913_s19, %s1030_s19   ;;  %s869_s18 = sphi %s911_s18, %s1029_s18  }
   0x3   : > { %p29_p1 = scmp.ge.s32.totalorder %s27_s21, 2  ;;  %p228_p2 = scmp.lt.s32.totalorder %s877_s20, 3 }
   0x5   : > { %s1032_s21 = smov (%p29_p1, %s27_s21), 0  ;;  %p229_p3 = pnand %p785_p0, %p228_p2 }
   0x6   : > { %p275_p4 = scmp.lt.s32.totalorder (!%p229_p3), %s869_s18, 1 }
   0x7   : > { %232 = sbr.rel (%p229_p3) target bundleno = 396 (0x18c), region = 40 }
   0xc   : > { %v879_v0 = vmov 0   ;;  %s1034_s18 = smov (!%p275_p4, %s869_s18), 1  ;;  %v311_v5 = vld [vmem:[%s1027_s4] sm:$0x3]  ;;  %vm383_vm0 = vcmask 1043456   ;;  %vm379_vm1 = vcmask 64512  }
   0xd   : > { %838 = vset.pattern.permute.xlu1 %v879_v0  ;;  %837 = vset.pattern.permute.xlu0 %v879_v0  ;;  %s807_s22 = sshll.u32 %s1034_s18, 4  ;;  %s810_s13 = sshll.u32 %s1034_s18, 3 }
   0xe   : > { %428 = vmatprep.mubr.bf16.mxu0 %v879_v0  ;;  %469 = vmatprep.mubr.bf16.mxu1 %v879_v0  ;;  %s288_s25 = scalar_lea.vmem %s1024_s1, %s807_s22  ;;  %s293_s28 = scalar_lea.vmem %s1025_s2, %s807_s22 }
   0xf   : > { %v798_v1 = vld [vmem:[%s288_s25 + $0x8] sm:$0xff]  ;;  %v318_v2 = vld [vmem:[%s288_s25] sm:$0xff]  ;;  %s282_s8 = scalar_lea.vmem %s1023_s0, %s807_s22  ;;  %s302_s16 = scalar_lea.vmem %s1028_s5, %s810_s13 }
  0x10   : > { %486 = vperm.xlu1 %838, %v798_v1   ;;  %321 = vperm.xlu0 %837, %v318_v2   ;;  %v799_v3 = vld [vmem:[%s293_s28 + $0x8] sm:$0xff]  ;;  %v328_v4 = vld [vmem:[%s293_s28] sm:$0xff] }
  0x11   : > { %v305_v6 = vld [vmem:[%s282_s8] sm:$0xff]  ;;  %v306_v7 = vld [vmem:[%s282_s8 + $0x8] sm:$0xff] }
  0x12   : > { %v307_v10 = vunpack.c.l.bf16 %v305_v6  ;;  %v308_v11 = vunpack.c.h.bf16 %v305_v6  ;;  %v309_v12 = vunpack.c.l.bf16 %v306_v7  ;;  %v310_v13 = vunpack.c.h.bf16 %v306_v7 }
  0x14   : > { %497 = vperm.xlu1 %838, %v799_v3   ;;  %331 = vperm.xlu0 %837, %v328_v4  }
  0x18   : > { %314 = vperm.xlu0 %837, %v311_v5  }
  0x8b   : > { %v487_v8 = vpop.permute.xlu1 %486  ;;  %v322_v9 = vpop.permute.xlu0 %321 }
  0x8c   : > { %v489_v14 = vmul.f32 %v487_v8, %v307_v10  ;;  %v490_v15 = vmul.f32 %v487_v8, %v308_v11  ;;  %v491_v16 = vmul.f32 %v487_v8, %v309_v12  ;;  %v492_v17 = vmul.f32 %v487_v8, %v310_v13 }
  0x8d   : > { %v324_v18 = vmul.f32 %v322_v9, %v307_v10  ;;  %v325_v19 = vmul.f32 %v322_v9, %v308_v11  ;;  %v327_v20 = vmul.f32 %v322_v9, %v310_v13  ;;  %v326_v23 = vmul.f32 %v322_v9, %v309_v12 }
  0x8f   : > { %v498_v21 = vpop.permute.xlu1 %497  ;;  %v332_v22 = vpop.permute.xlu0 %331 }
  0x90   : > { %v948_v24 = vadd.f32 %v498_v21, %v489_v14  ;;  %v950_v25 = vadd.f32 %v498_v21, %v490_v15  ;;  %v952_v26 = vadd.f32 %v498_v21, %v492_v17  ;;  %v954_v27 = vadd.f32 %v498_v21, %v491_v16 }
  0x91   : > { %v956_v28 = vadd.f32 %v332_v22, %v324_v18  ;;  %v335_v29 = vadd.f32 %v332_v22, %v325_v19  ;;  %v337_v30 = vadd.f32 %v332_v22, %v327_v20  ;;  %v960_v33 = vadd.f32 %v332_v22, %v326_v23 }
  0x92   : > { %v508_v31 = vmul.f32 0.044715, %v948_v24  ;;  %v509_v32 = vmul.f32 0.044715, %v950_v25  ;;  %v511_v34 = vmul.f32 0.044715, %v952_v26 }
  0x93   : > { %v343_v35 = vmul.f32 0.044715, %v335_v29  ;;  %v345_v37 = vmul.f32 0.044715, %v337_v30  ;;  %v510_v38 = vmul.f32 0.044715, %v954_v27 }
  0x94   : > { %v513_v36 = vmul.f32 %v509_v32, %v950_v25  ;;  %v515_v39 = vmul.f32 %v511_v34, %v952_v26  ;;  %v342_v41 = vmul.f32 0.044715, %v956_v28  ;;  %v512_v42 = vmul.f32 %v508_v31, %v948_v24 }
  0x95   : > { %v347_v40 = vmul.f32 %v343_v35, %v335_v29  ;;  %v349_v44 = vmul.f32 %v345_v37, %v337_v30  ;;  %v344_v45 = vmul.f32 0.044715, %v960_v33  ;;  %v514_v52 = vmul.f32 %v510_v38, %v954_v27 }
  0x96   : > { %v517_v43 = vmul.f32 %v513_v36, %v950_v25  ;;  %v519_v46 = vmul.f32 %v515_v39, %v952_v26  ;;  %v346_v48 = vmul.f32 %v342_v41, %v956_v28  ;;  %v516_v59 = vmul.f32 %v512_v42, %v948_v24 }
  0x97   : > { %v351_v47 = vmul.f32 %v347_v40, %v335_v29  ;;  %v353_v49 = vmul.f32 %v349_v44, %v337_v30  ;;  %v348_v50 = vmul.f32 %v344_v45, %v960_v33  ;;  %v518_v4 = vmul.f32 %v514_v52, %v954_v27 }
  0x98   : > { %v521_v51 = vadd.f32 %v517_v43, %v950_v25  ;;  %v350_v54 = vmul.f32 %v346_v48, %v956_v28  ;;  %v523_v55 = vadd.f32 %v519_v46, %v952_v26  ;;  %v520_v1 = vadd.f32 %v516_v59, %v948_v24 }
  0x99   : > { %v355_v53 = vadd.f32 %v351_v47, %v335_v29  ;;  %v357_v56 = vadd.f32 %v353_v49, %v337_v30  ;;  %v352_v57 = vmul.f32 %v348_v50, %v960_v33  ;;  %v522_v7 = vadd.f32 %v518_v4, %v954_v27  ;;  %v374_v50 = vld [vmem:[%s1026_s3] sm:$0x1]  ;;  %v315_v4 = vpop.permute.xlu0 %314 }
  0x9a   : > { %v525_v58 = vmul.f32 0.7978846, %v521_v51  ;;  %v354_v61 = vadd.f32 %v350_v54, %v956_v28  ;;  %v527_v3 = vmul.f32 0.7978846, %v523_v55  ;;  %v524_v6 = vmul.f32 0.7978846, %v520_v1 }
  0x9b   : > { %v359_v60 = vmul.f32 0.7978846, %v355_v53  ;;  %v361_v62 = vmul.f32 0.7978846, %v357_v56  ;;  %v356_v63 = vadd.f32 %v352_v57, %v960_v33  ;;  %v526_v8 = vmul.f32 0.7978846, %v522_v7 }
  0x9c   : > { %839 = vtanh.f32 %v525_v58  ;;  %v358_v2 = vmul.f32 0.7978846, %v354_v61  ;;  %v339_v12 = vmul.f32 0.5, %v335_v29  ;;  %v341_v16 = vmul.f32 0.5, %v337_v30  ;;  %v800_v54 = vld [vmem:[%s1026_s3 + $0x1] sm:$0x1] }
  0x9d   : > { %841 = vtanh.f32 %v359_v60  ;;  %v360_v5 = vmul.f32 0.7978846, %v356_v63  ;;  %v338_v20 = vmul.f32 0.5, %v956_v28  ;;  %v505_v22 = vmul.f32 0.5, %v950_v25 }
  0x9e   : > { %843 = vtanh.f32 %v361_v62  ;;  %v340_v32 = vmul.f32 0.5, %v960_v33  ;;  %v507_v29 = vmul.f32 0.5, %v952_v26  ;;  %v504_v28 = vmul.f32 0.5, %v948_v24 }
  0x9f   : > { %845 = vtanh.f32 %v358_v2  ;;  %v506_v33 = vmul.f32 0.5, %v954_v27  ;;  %v880_v59 = vmov 1983009808   ;;  %v656_v61 = vlaneseq }
  0xa0   : > { %847 = vtanh.f32 %v360_v5  ;;  %v654_v60 = vunpack.c.l.s4 %v880_v59 }
  0xa1   : > { %849 = vtanh.f32 %v527_v3  ;;  %v657_v3 = vshrl.u32 %v656_v61, 7 }
  0xa2   : > { %851 = vtanh.f32 %v524_v6 }
  0xa3   : > { %853 = vtanh.f32 %v526_v8 }
  0xa9   : > { %v840_v9 = vpop.eup %839 }
  0xaa   : > { %v842_v10 = vpop.eup %841  ;;  %v533_v14 = vadd.f32 1.0, %v840_v9 }
  0xab   : > { %v844_v11 = vpop.eup %843  ;;  %v367_v13 = vadd.f32 1.0, %v842_v10 }
  0xac   : > { %v846_v15 = vpop.eup %845  ;;  %v369_v17 = vadd.f32 1.0, %v844_v11  ;;  %v537_v38 = vmul.f32 %v533_v14, %v505_v22 }
  0xad   : > { %v848_v18 = vpop.eup %847  ;;  %v371_v19 = vmul.f32 %v367_v13, %v339_v12  ;;  %v366_v21 = vadd.f32 1.0, %v846_v15 }
  0xae   : > { %v850_v23 = vpop.eup %849  ;;  %v373_v31 = vmul.f32 %v369_v17, %v341_v16  ;;  %v368_v34 = vadd.f32 1.0, %v848_v18  ;;  %v543_v47 = vpack.c.bf16 %v537_v38, %v537_v38 }
  0xaf   : > { %v852_v35 = vpop.eup %851  ;;  %v376_v36 = vpack.c.bf16 %v371_v19, %v371_v19  ;;  %v370_v37 = vmul.f32 %v366_v21, %v338_v20  ;;  %v535_v30 = vadd.f32 1.0, %v850_v23 }
  0xb0   : > { %v854_v39 = vpop.eup %853  ;;  %v378_v40 = vpack.c.bf16 %v373_v31, %v373_v31  ;;  %v372_v41 = vmul.f32 %v368_v34, %v340_v32  ;;  %v532_v42 = vadd.f32 1.0, %v852_v35 }
  0xb1   : > { %794 = vmatprep.subr.msk.bf16.mxu0 %vm383_vm0, %v376_v36  ;;  %v375_v25 = vpack.c.bf16 %v370_v37, %v370_v37  ;;  %v539_v43 = vmul.f32 %v535_v30, %v507_v29  ;;  %v534_v44 = vadd.f32 1.0, %v854_v39 }
  0xb2   : > { %796 = vmatprep.subr.msk.bf16.mxu1 %vm383_vm0, %v378_v40  ;;  %v377_v26 = vpack.c.bf16 %v372_v41, %v372_v41  ;;  %v536_v45 = vmul.f32 %v532_v42, %v504_v28 }
  0xb3   : > { %v385_v46 = vsel %vm383_vm0, %v375_v25, 0  ;;  %v538_v48 = vmul.f32 %v534_v44, %v506_v33  ;;  %v545_v24 = vpack.c.bf16 %v539_v43, %v539_v43 }
  0xb4   : > { %411 = vmatpush1.bf16.msra.mxu0 %v385_v46  ;;  %v391_v49 = vsel %vm383_vm0, %v377_v26, 0  ;;  %v542_v51 = vpack.c.bf16 %v536_v45, %v536_v45 }
  0xb5   : > { %452 = vmatpush1.bf16.msra.mxu1 %v391_v49  ;;  %801 = vmatprep.subr.msk.bf16.mxu0 %vm383_vm0, %v543_v47  ;;  %v544_v27 = vpack.c.bf16 %v538_v48, %v538_v48 }
  0xb6   : > { %803 = vmatprep.subr.msk.bf16.mxu1 %vm383_vm0, %v545_v24  ;;  %v550_v52 = vsel %vm383_vm0, %v542_v51, 0 }
  0xb7   : > { %795 = vmatmul.mubr.msk.bf16.vlgmr.msra.gmra.mxu0 %vm379_vm1, %v374_v50  ;;  %v556_v53 = vsel %vm383_vm0, %v544_v27, 0 }
  0xb8   : > { %797 = vmatmul.mubr.msk.bf16.vlgmr.msra.gmra.mxu1 %vm379_vm1, %v374_v50  ;;  %576 = vmatpush1.bf16.msra.mxu0 %v550_v52 }
  0xb9   : > { %617 = vmatpush1.bf16.msra.mxu1 %v556_v53  ;;  %593 = vmatprep.mubr.bf16.mxu0 %v879_v0 }
  0xba   : > { %634 = vmatprep.mubr.bf16.mxu1 %v879_v0  ;;  %v655_v0 = vunpack.c.0.s8 %v654_v60 }
  0xbc   : > { %v658_v14 = vsub.s32 %v655_v0, %v657_v3 }
  0xbf   : > { %802 = vmatmul.mubr.msk.bf16.vlgmr.msra.gmra.mxu0 %vm379_vm1, %v800_v54 }
  0xc0   : > { %804 = vmatmul.mubr.msk.bf16.vlgmr.msra.gmra.mxu1 %vm379_vm1, %v800_v54 }
 0x177   : > { %v430_v55 = vpop.f32.mrf.mxu0 }
 0x178   : > { %v471_v56 = vpop.f32.mrf.mxu1  ;;  %v478_v6 = vadd.f32 %v430_v55, %v315_v4 }
 0x179   : > { %v432_v57 = vpop.f32.mrf.mxu0  ;;  %v480_v9 = vadd.f32 %v471_v56, %v315_v4 }
 0x17a   : > { %v473_v58 = vpop.f32.mrf.mxu1  ;;  %v479_v7 = vadd.f32 %v432_v57, %v315_v4 }
 0x17b   : > { %v434_v62 = vpop.f32.mrf.mxu0  ;;  %v481_v10 = vadd.f32 %v473_v58, %v315_v4 }
 0x17c   : > { %v475_v63 = vpop.f32.mrf.mxu1 }
 0x17d   : > { %v435_v1 = vpop.f32.mrf.mxu0 }
 0x17e   : > { %v476_v2 = vpop.f32.mrf.mxu1 }
 0x17f   : > { %v595_v5 = vpop.f32.mrf.mxu0 }
 0x180   : > { %v636_v8 = vpop.f32.mrf.mxu1  ;;  %v643_v12 = vadd.f32 %v595_v5, %v478_v6 }
 0x181   : > { %v597_v11 = vpop.f32.mrf.mxu0  ;;  %v645_v16 = vadd.f32 %v636_v8, %v480_v9 }
 0x182   : > { %v644_v13 = vadd.f32 %v597_v11, %v479_v7  ;;  %v638_v15 = vpop.f32.mrf.mxu1 }
 0x183   : > { %v646_v17 = vadd.f32 %v638_v15, %v481_v10  ;;  %v599_v18 = vpop.f32.mrf.mxu0 }
 0x184   : > { %v651_v19 = vcombine.low %v643_v12, %v644_v13  ;;  %v640_v20 = vpop.f32.mrf.mxu1 }
 0x185   : > { %v652_v21 = vcombine.low %v645_v16, %v646_v17  ;;  %v600_v22 = vpop.f32.mrf.mxu0 }
 0x186   : > { %v659_v23 = vrot.slane %v651_v19, %v658_v14  ;;  %v641_v31 = vpop.f32.mrf.mxu1 }
 0x187   : > { %v666_v32 = vrot.slane %v652_v21, %v658_v14 }
 0x189   : > { %v667_v34 = vcombine.low %v659_v23, %v666_v32 }
 0x18b   : > { %669 = vst [vmem:[%s302_s16] sm:$0xff] %v667_v34 }
 0x18c PF: > { %s15_s20 = sadd.s32 1, %s877_s20   ;;  %s1029_s18 = smov %s873_s19 }
 0x18d   : > { %p12_p5 = scmp.ge.s32.totalorder %s15_s20, 4   ;;  %s1030_s19 = smov %s1032_s21 }
 0x18f   :  { %14 = sbr.rel (!%p12_p5) target bundleno = 2 (0x2), region = 79 }

</bundles_post_ra>
